<compile_context>
chip_gen: v6e
topology: v6e:2x2x1
jax: 0.10.0
libtpu: 0.0.40
codegen_flags: <defaults>
</compile_context>

<pallas_src>
import math

import jax
import jax.numpy as jnp
from jax.experimental import pallas as pl
from jax.experimental.pallas import tpu as pltpu

_LN_EPS = 1e-5   # PyTorch nn.LayerNorm default
_LANE = 128

KERNEL_WEIGHT_NAMES = (
    "w_enc", "b_enc",
    "w_qkv", "b_qkv", "w_sao",
    "w_cq", "w_ck", "w_cvo",
    "w_ff1", "b_ff1", "w_ff2",
    "b_dpack", "ln_g", "ln_b",
    "w_out", "b_out",
)


def _round_up(n, m):
    return ((n + m - 1) // m) * m


# ---------------------------------------------------------------------------
# Shared math (used inside the Pallas kernel AND by the pure-JAX reference;
# weights are accessed via  w[name][...]  which works for both Refs and arrays)
# ---------------------------------------------------------------------------
def _layernorm(x, gamma, beta):
    mu = jnp.mean(x, axis=-1, keepdims=True)
    var = jnp.mean((x - mu) ** 2, axis=-1, keepdims=True)
    return (x - mu) * jax.lax.rsqrt(var + _LN_EPS) * gamma + beta


def _softmax(x, use_pl_recip=False):
    m = jnp.max(x, axis=-1, keepdims=True)
    e = jnp.exp(x - m)
    den = jnp.sum(e, axis=-1, keepdims=True)
    if use_pl_recip:
        return e * pl.reciprocal(den, approx=True)   # EUP slot, otherwise idle
    return e / den


def _mm(a, b):                       # (rows, K) @ (K, N), bf16 in, f32 accumulate
    return jnp.dot(a.astype(jnp.bfloat16), b, preferred_element_type=jnp.float32)


def _mm_nt(a, b):                    # a @ b.T without materializing a transpose
    return jax.lax.dot_general(a.astype(jnp.bfloat16), b,
                               (((1,), (1,)), ((), ())),
                               preferred_element_type=jnp.float32)


def _bmm(eq, a, b):                  # batched einsum, bf16 in, f32 accumulate
    return jnp.einsum(eq, a.astype(jnp.bfloat16), b.astype(jnp.bfloat16),
                      preferred_element_type=jnp.float32)


def _caption_math(x_cs, h0, mask, w, *, use_pl_recip=False):
    """x_cs (bb,C,S) bf16 pixels, h0 (bb,T,D) f32 embedded targets, mask (bb,T,T)."""
    bb, T, D = h0.shape
    C, S = x_cs.shape[1], x_cs.shape[2]
    Dp = _round_up(D, _LANE)
    scale = 1.0 / math.sqrt(D)
    bf = jnp.bfloat16

    # ---- encoder: pixel-wise linear (1x1 conv) + ReLU.  K = C is tiny, so this is an
    #      unrolled VPU multiply-add over channels in a (D, S) lane-dense layout
    #      (w_enc stored (D, C): each channel column broadcasts along lanes).
    w_enc = w["w_enc"][...]                                   # (D, C) f32
    feats = w_enc[:, 0:1][None] * x_cs[:, 0][:, None, :]      # (bb, D, S) f32
    for c in range(1, C):                                     # static unroll, C small
        feats = feats + w_enc[:, c:c + 1][None] * x_cs[:, c][:, None, :]
    feats = jnp.maximum(feats + w["b_enc"][...], 0.0)         # b_enc: (D, 1)
    feats_bf = feats.astype(bf)

    ln_g = w["ln_g"][...]
    ln_b = w["ln_b"][...]
    b_d = w["b_dpack"][...]                                   # rows: sao, cq, cvo, ff2

    h = h0.reshape(bb * T, D)                                 # f32 residual stream
    h_bf = h.astype(bf)                                       # bf16 shadow for matmuls

    # ---- masked self-attention (fused QKV projection; each section is padded to a
    #      128-lane boundary, so the slices below are zero-cost lane-aligned views)
    qkv = _mm(h_bf, w["w_qkv"][...]) + w["b_qkv"][...]        # (bb*T, 3*Dp)
    q = qkv[:, 0 * Dp:1 * Dp].reshape(bb, T, Dp) * scale
    k = qkv[:, 1 * Dp:2 * Dp].reshape(bb, T, Dp)
    v = qkv[:, 2 * Dp:3 * Dp].reshape(bb, T, Dp)
    s = _bmm("btd,bsd->bts", q, k) + mask                     # zero pad cols contribute 0
    p = _softmax(s, use_pl_recip)
    sa = _bmm("bts,bsd->btd", p, v).reshape(bb * T, Dp)
    sa = _mm(sa, w["w_sao"][...]) + b_d[0:1]                  # w_sao rows padded to Dp
    h = _layernorm(h + sa, ln_g[0:1], ln_b[0:1])
    h_bf = h.astype(bf)

    # ---- cross-attention to image features (reassociated so the K/V projections scale
    #      with T query rows instead of S pixel rows; key-bias term dropped because a
    #      per-query constant over keys is a no-op under softmax)
    q2 = (_mm(h_bf, w["w_cq"][...]) + b_d[1:2]) * scale       # (bb*T, D)
    qw = _mm_nt(q2, w["w_ck"][...])                           # q2 @ Wck^T
    s2 = _bmm("btd,bds->bts", qw.reshape(bb, T, D), feats_bf)
    p2 = _softmax(s2, use_pl_recip)
    pv = _bmm("bts,bds->btd", p2, feats_bf).reshape(bb * T, D)
    # softmax rows sum to 1  =>  P @ (feats @ Wcv + b) == (P @ feats) @ Wcv + b,
    # and Wcv @ Wcao (no nonlinearity between them) is fused on the host into w_cvo.
    ca = _mm(pv, w["w_cvo"][...]) + b_d[2:3]
    h = _layernorm(h + ca, ln_g[1:2], ln_b[1:2])
    h_bf = h.astype(bf)

    # ---- feed-forward
    ff = jnp.maximum(_mm(h_bf, w["w_ff1"][...]) + w["b_ff1"][...], 0.0)
    ff = _mm(ff, w["w_ff2"][...]) + b_d[3:4]
    h = _layernorm(h + ff, ln_g[2:3], ln_b[2:3])
    h_bf = h.astype(bf)

    # ---- vocab projection (V padded to multiple of 128 -> lane-dense stores)
    logits = _mm(h_bf, w["w_out"][...]) + w["b_out"][...]
    return logits.reshape(bb, T, -1)


# ---------------------------------------------------------------------------
# Pallas kernel (grid over batch blocks; weights are full-extent blocks)
# ---------------------------------------------------------------------------
def caption_kernel(x_ref, emb_ref, kpm_ref, tmask_ref, *rest):
    out_ref = rest[-1]
    w = dict(zip(KERNEL_WEIGHT_NAMES, rest[:-1]))
    # additive mask: causal (T,T) + key-padding (bb,1,T) -> (bb,T,T)
    mask = tmask_ref[...][None, :, :] + kpm_ref[...]
    logits = _caption_math(x_ref[...], emb_ref[...], mask, w, use_pl_recip=True)
    out_ref[...] = logits.astype(out_ref.dtype)


# ---------------------------------------------------------------------------
# Parameter preparation (fusion / padding / layout / bf16 cast)
# ---------------------------------------------------------------------------
def prepare_kernel_params(params):
    D = params["w_q"].shape[0]
    V = params["w_out"].shape[1]
    bf = jnp.bfloat16
    f32 = jnp.float32
    Dp = _round_up(D, _LANE)
    Vp = _round_up(V, _LANE)

    def pad_cols(a, n):
        return jnp.pad(a, ((0, 0), (0, n - a.shape[1])))

    # fused QKV, each section individually padded to a 128-lane boundary
    w_qkv = jnp.concatenate([pad_cols(params["w_q"], Dp),
                             pad_cols(params["w_k"], Dp),
                             pad_cols(params["w_v"], Dp)], axis=1)        # (D, 3*Dp)
    b_qkv = jnp.concatenate([pad_cols(params["b_q"], Dp),
                             pad_cols(params["b_k"], Dp),
                             pad_cols(params["b_v"], Dp)], axis=1)        # (1, 3*Dp)
    # self-attn output projection consumes the Dp-padded value rows
    w_sao = jnp.pad(params["w_sao"], ((0, Dp - D), (0, 0)))               # (Dp, D)

    # fused cross-attn value + output projection
    w_cvo = params["w_cv"] @ params["w_cao"]                              # (D, D)
    b_cvo = params["b_cv"] @ params["w_cao"] + params["b_cao"]            # (1, D)

    w_out = pad_cols(params["w_out"], Vp)
    b_out = pad_cols(params["b_out"], Vp)

    # pack the (1, D) biases used after matmuls into one array (rows: sao, cq, cvo, ff2)
    b_dpack = jnp.concatenate([params["b_sao"], params["b_cq"],
                               b_cvo, params["b_ff2"]], axis=0)           # (4, D)

    return {
        "w_enc": params["w_enc"].T.astype(f32),           # (D, C): channel cols broadcast
        "b_enc": params["b_enc"].reshape(D, 1).astype(f32),
        "w_qkv": w_qkv.astype(bf), "b_qkv": b_qkv.astype(f32),
        "w_sao": w_sao.astype(bf),
        "w_cq": params["w_cq"].astype(bf),
        "w_ck": params["w_ck"].astype(bf),
        "w_cvo": w_cvo.astype(bf),
        "w_ff1": params["w_ff1"].astype(bf), "b_ff1": params["b_ff1"].astype(f32),
        "w_ff2": params["w_ff2"].astype(bf),
        "b_dpack": b_dpack.astype(f32),
        "ln_g": params["ln_g"].astype(f32), "ln_b": params["ln_b"].astype(f32),
        "w_out": w_out.astype(bf), "b_out": b_out.astype(f32),
    }


def _prepare_inputs(x, tgt_tokens, params, tgt_mask, tgt_key_padding_mask):
    B, C, H, W = x.shape
    T = tgt_tokens.shape[1]
    D = params["w_q"].shape[0]
    # Keep natural NCHW layout: spatial (H*W) lands on the lane axis, no transpose.
    x_cs = x.reshape(B, C, H * W).astype(jnp.bfloat16)
    emb = (params["embed"][tgt_tokens] * math.sqrt(D)
           + params["pos_enc"][None, :T]).astype(jnp.float32)
    tmask = (jnp.zeros((T, T), jnp.float32) if tgt_mask is None
             else tgt_mask.astype(jnp.float32))
    if tgt_key_padding_mask is None:
        kpm = jnp.zeros((B, 1, T), jnp.float32)
    else:
        kpm = jnp.where(tgt_key_padding_mask, -1e9, 0.0).astype(jnp.float32)[:, None, :]
    return x_cs, emb, tmask, kpm


def _tensorcores_per_chip():
    """Only v7x has 2 TensorCores per chip; v5e/v6e are single-TC."""
    try:
        kind = (getattr(jax.devices()[0], "device_kind", "") or "").lower()
        if "v7" in kind or "7x" in kind:
            return 2
    except Exception:
        pass
    return 1


def _choose_block_batch(B, T, n_cores):
    """Largest divisor of B giving <=512 rows per grid step.  Only on multi-TC chips
    (v7x) do we require >=2 grid steps; single-TC chips collapse to one step to avoid
    per-step pipeline overhead and keep matmul rows large."""
    target_rows = 512
    best = 1
    for d in range(1, B + 1):
        if B % d:
            continue
        if d * T > target_rows:
            continue
        if n_cores >= 2 and B >= 2 and (B // d) < 2:
            continue
        best = d
    return best


# ---------------------------------------------------------------------------
# Forward pass (Pallas) and pure-JAX reference
# ---------------------------------------------------------------------------
def image_caption_forward(x, tgt_tokens, params, tgt_mask=None,
                          tgt_key_padding_mask=None):
    B = x.shape[0]
    T = tgt_tokens.shape[1]
    V = params["w_out"].shape[1]

    kp = prepare_kernel_params(params)
    x_cs, emb, tmask, kpm = _prepare_inputs(x, tgt_tokens, params, tgt_mask,
                                            tgt_key_padding_mask)
    Vp = kp["w_out"].shape[1]

    n_cores = _tensorcores_per_chip()
    bb = _choose_block_batch(B, T, n_cores)
    grid = (B // bb,)

    per_batch = [x_cs, emb, kpm]
    weights = [kp[n] for n in KERNEL_WEIGHT_NAMES]

    def batch_spec(a):
        nz = a.ndim - 1
        return pl.BlockSpec((bb,) + a.shape[1:], lambda b, _nz=nz: (b,) + (0,) * _nz)

    def full_spec(a, pipeline_mode=None):
        nd = a.ndim
        idx = lambda b, _nd=nd: (0,) * _nd
        if pipeline_mode is None:
            return pl.BlockSpec(a.shape, idx)
        return pl.BlockSpec(a.shape, idx, pipeline_mode=pipeline_mode)

    # explicit VMEM budget: per-step blocks (+ double buffering) with headroom,
    # clamped so it stays within every generation's scoped/physical limits
    step_bytes = (sum(bb * math.prod(a.shape[1:]) * a.dtype.itemsize for a in per_batch)
                  + tmask.size * tmask.dtype.itemsize
                  + sum(a.size * a.dtype.itemsize for a in weights)
                  + bb * T * Vp * 4)
    vmem_limit = max(8 << 20, min(int(2.5 * step_bytes) + (2 << 20), 48 << 20))

    def run(weight_mode):
        in_specs = ([batch_spec(a) for a in per_batch]
                    + [full_spec(tmask, weight_mode)]
                    + [full_spec(a, weight_mode) for a in weights])
        return pl.pallas_call(
            caption_kernel,
            out_shape=jax.ShapeDtypeStruct((B, T, Vp), jnp.float32),
            grid=grid,
            in_specs=in_specs,
            out_specs=pl.BlockSpec((bb, T, Vp), lambda b: (b, 0, 0)),
            compiler_params=pltpu.CompilerParams(
                dimension_semantics=("parallel",),
                vmem_limit_bytes=vmem_limit),
        )(*per_batch, tmask, *weights)

    # Grid-invariant weight blocks only need a single buffer; fall back to the
    # default double-buffering if this JAX build rejects Buffered(1).
    buffered = getattr(pl, "Buffered", None)
    out = None
    if buffered is not None:
        try:
            out = run(buffered(1))
        except Exception:
            out = None
    if out is None:
        out = run(None)
    return out[..., :V]


def reference_forward(x, tgt_tokens, params, tgt_mask=None,
                      tgt_key_padding_mask=None):
    V = params["w_out"].shape[1]
    kp = prepare_kernel_params(params)
    x_cs, emb, tmask, kpm = _prepare_inputs(x, tgt_tokens, params, tgt_mask,
                                            tgt_key_padding_mask)
    mask = tmask[None, :, :] + kpm
    out = _caption_math(x_cs, emb, mask, kp, use_pl_recip=False)
    return out[..., :V]


# ---------------------------------------------------------------------------
# Deterministic parameter init
# ---------------------------------------------------------------------------
def _sinusoidal_pos(max_len, D):
    pos = jnp.arange(max_len, dtype=jnp.float32)[:, None]
    i = jnp.arange(D // 2, dtype=jnp.float32)[None, :]
    ang = pos / jnp.power(10000.0, 2.0 * i / D)
    pe = jnp.zeros((max_len, D), jnp.float32)
    pe = pe.at[:, 0::2].set(jnp.sin(ang))
    pe = pe.at[:, 1::2].set(jnp.cos(ang))
    return pe


def init_params(key, C, D, F, V, max_len):
    keys = iter(jax.random.split(key, 32))

    def w(shape, scale=0.02):
        return (scale * jax.random.normal(next(keys), shape)).astype(jnp.float32)

    return {
        "embed": w((V, D)),
        "pos_enc": _sinusoidal_pos(max_len, D),
        "w_enc": w((C, D)), "b_enc": w((1, D)),
        "w_q": w((D, D)), "w_k": w((D, D)), "w_v": w((D, D)),
        "b_q": w((1, D)), "b_k": w((1, D)), "b_v": w((1, D)),
        "w_sao": w((D, D)), "b_sao": w((1, D)),
        "w_cq": w((D, D)), "b_cq": w((1, D)),
        "w_ck": w((D, D)), "b_ck": w((1, D)),
        "w_cv": w((D, D)), "b_cv": w((1, D)),
        "w_cao": w((D, D)), "b_cao": w((1, D)),
        "w_ff1": w((D, F)), "b_ff1": w((1, F)),
        "w_ff2": w((F, D)), "b_ff2": w((1, D)),
        "ln_g": (1.0 + w((3, D))), "ln_b": w((3, D)),
        "w_out": w((D, V)), "b_out": w((1, V)),
    }


if __name__ == "__main__":
    B, C, H, W = 2, 4, 16, 16      # image: NCHW
    T, D, F, V = 8, 32, 64, 64     # seq len, d_model, ffn dim, vocab

    key = jax.random.PRNGKey(0)
    kx, kt, kp = jax.random.split(key, 3)
    x = jax.random.normal(kx, (B, C, H, W), jnp.float32)
    tgt_input = jax.random.randint(kt, (B, T), 0, V)
    params = init_params(kp, C, D, F, V, max_len=T)

    # causal additive tgt_mask (T, T)
    rows = jnp.arange(T)
    tgt_mask = jnp.where(rows[None, :] > rows[:, None], -1e9, 0.0).astype(jnp.float32)
    # key-padding mask: last token of batch 1 is padding
    tgt_key_padding_mask = jnp.zeros((B, T), dtype=bool).at[1, T - 1].set(True)

    out = image_caption_forward(x, tgt_input, params, tgt_mask, tgt_key_padding_mask)
    out = jax.block_until_ready(out)

    ref = reference_forward(x, tgt_input, params, tgt_mask, tgt_key_padding_mask)

    assert out.shape == (B, T, V), out.shape
    assert bool(jnp.all(jnp.isfinite(out)))
    assert bool(jnp.allclose(out, ref, atol=5e-2, rtol=5e-2)), "mismatch vs reference"
    print("KERNEL_OK")
</pallas_src>

<mosaic_0001>
module attributes {stable_mosaic.version = 11 : i64} {
  func.func @caption_kernel(%arg0: i32, %arg1: memref<2x4x256xbf16, #tpu.memory_space<vmem>>, %arg2: memref<2x8x32xf32, #tpu.memory_space<vmem>>, %arg3: memref<2x1x8xf32, #tpu.memory_space<vmem>>, %arg4: memref<8x8xf32, #tpu.memory_space<vmem>>, %arg5: memref<32x4xf32, #tpu.memory_space<vmem>>, %arg6: memref<32x1xf32, #tpu.memory_space<vmem>>, %arg7: memref<32x384xbf16, #tpu.memory_space<vmem>>, %arg8: memref<1x384xf32, #tpu.memory_space<vmem>>, %arg9: memref<128x32xbf16, #tpu.memory_space<vmem>>, %arg10: memref<32x32xbf16, #tpu.memory_space<vmem>>, %arg11: memref<32x32xbf16, #tpu.memory_space<vmem>>, %arg12: memref<32x32xbf16, #tpu.memory_space<vmem>>, %arg13: memref<32x64xbf16, #tpu.memory_space<vmem>>, %arg14: memref<1x64xf32, #tpu.memory_space<vmem>>, %arg15: memref<64x32xbf16, #tpu.memory_space<vmem>>, %arg16: memref<4x32xf32, #tpu.memory_space<vmem>>, %arg17: memref<3x32xf32, #tpu.memory_space<vmem>>, %arg18: memref<3x32xf32, #tpu.memory_space<vmem>>, %arg19: memref<32x128xbf16, #tpu.memory_space<vmem>>, %arg20: memref<1x128xf32, #tpu.memory_space<vmem>>, %arg21: memref<2x8x128xf32, #tpu.memory_space<vmem>>) attributes {dimension_semantics = [#tpu.dimension_semantics<parallel>], iteration_bounds = array<i64: 1>, scalar_prefetch = 0 : i64, scratch_operands = 0 : i64, tpu.core_type = #tpu.core_type<tc>, window_params = [{transform_indices = @transform_0, window_bounds = array<i64: 2, 4, 256>}, {transform_indices = @transform_1, window_bounds = array<i64: 2, 8, 32>}, {transform_indices = @transform_2, window_bounds = array<i64: 2, 1, 8>}, {pipeline_mode = #tpu.pipeline_mode<synchronous>, transform_indices = @transform_3, window_bounds = array<i64: 8, 8>}, {pipeline_mode = #tpu.pipeline_mode<synchronous>, transform_indices = @transform_4, window_bounds = array<i64: 32, 4>}, {pipeline_mode = #tpu.pipeline_mode<synchronous>, transform_indices = @transform_5, window_bounds = array<i64: 32, 1>}, {pipeline_mode = #tpu.pipeline_mode<synchronous>, transform_indices = @transform_6, window_bounds = array<i64: 32, 384>}, {pipeline_mode = #tpu.pipeline_mode<synchronous>, transform_indices = @transform_7, window_bounds = array<i64: 1, 384>}, {pipeline_mode = #tpu.pipeline_mode<synchronous>, transform_indices = @transform_8, window_bounds = array<i64: 128, 32>}, {pipeline_mode = #tpu.pipeline_mode<synchronous>, transform_indices = @transform_9, window_bounds = array<i64: 32, 32>}, {pipeline_mode = #tpu.pipeline_mode<synchronous>, transform_indices = @transform_10, window_bounds = array<i64: 32, 32>}, {pipeline_mode = #tpu.pipeline_mode<synchronous>, transform_indices = @transform_11, window_bounds = array<i64: 32, 32>}, {pipeline_mode = #tpu.pipeline_mode<synchronous>, transform_indices = @transform_12, window_bounds = array<i64: 32, 64>}, {pipeline_mode = #tpu.pipeline_mode<synchronous>, transform_indices = @transform_13, window_bounds = array<i64: 1, 64>}, {pipeline_mode = #tpu.pipeline_mode<synchronous>, transform_indices = @transform_14, window_bounds = array<i64: 64, 32>}, {pipeline_mode = #tpu.pipeline_mode<synchronous>, transform_indices = @transform_15, window_bounds = array<i64: 4, 32>}, {pipeline_mode = #tpu.pipeline_mode<synchronous>, transform_indices = @transform_16, window_bounds = array<i64: 3, 32>}, {pipeline_mode = #tpu.pipeline_mode<synchronous>, transform_indices = @transform_17, window_bounds = array<i64: 3, 32>}, {pipeline_mode = #tpu.pipeline_mode<synchronous>, transform_indices = @transform_18, window_bounds = array<i64: 32, 128>}, {pipeline_mode = #tpu.pipeline_mode<synchronous>, transform_indices = @transform_19, window_bounds = array<i64: 1, 128>}, {transform_indices = @transform_20, window_bounds = array<i64: 2, 8, 128>}]} {
    %c0 = arith.constant 0 : index
    %c0_0 = arith.constant 0 : index
    %0 = vector.load %arg4[%c0, %c0_0] : memref<8x8xf32, #tpu.memory_space<vmem>>, vector<8x8xf32>
    %1 = vector.shape_cast %0 : vector<8x8xf32> to vector<1x8x8xf32>
    %c0_1 = arith.constant 0 : index
    %c0_2 = arith.constant 0 : index
    %c0_3 = arith.constant 0 : index
    %2 = vector.load %arg3[%c0_1, %c0_2, %c0_3] : memref<2x1x8xf32, #tpu.memory_space<vmem>>, vector<2x1x8xf32>
    %3 = vector.broadcast %1 : vector<1x8x8xf32> to vector<2x8x8xf32>
    %4 = vector.broadcast %2 : vector<2x1x8xf32> to vector<2x8x8xf32>
    %5 = arith.addf %3, %4 : vector<2x8x8xf32>
    %c0_4 = arith.constant 0 : index
    %c0_5 = arith.constant 0 : index
    %c0_6 = arith.constant 0 : index
    %6 = vector.load %arg1[%c0_4, %c0_5, %c0_6] : memref<2x4x256xbf16, #tpu.memory_space<vmem>>, vector<2x4x256xbf16>
    %c0_7 = arith.constant 0 : index
    %c0_8 = arith.constant 0 : index
    %c0_9 = arith.constant 0 : index
    %7 = vector.load %arg2[%c0_7, %c0_8, %c0_9] : memref<2x8x32xf32, #tpu.memory_space<vmem>>, vector<2x8x32xf32>
    %c0_10 = arith.constant 0 : index
    %c0_11 = arith.constant 0 : index
    %8 = vector.load %arg5[%c0_10, %c0_11] : memref<32x4xf32, #tpu.memory_space<vmem>>, vector<32x4xf32>
    %9 = vector.extract_strided_slice %8 {offsets = [0, 0], sizes = [32, 1], strides = [1, 1]} : vector<32x4xf32> to vector<32x1xf32>
    %10 = vector.shape_cast %9 : vector<32x1xf32> to vector<1x32x1xf32>
    %11 = vector.extract_strided_slice %6 {offsets = [0, 0, 0], sizes = [2, 1, 256], strides = [1, 1, 1]} : vector<2x4x256xbf16> to vector<2x1x256xbf16>
    %12 = vector.shape_cast %11 : vector<2x1x256xbf16> to vector<2x256xbf16>
    %13 = vector.shape_cast %12 : vector<2x256xbf16> to vector<2x1x256xbf16>
    %14 = arith.extf %13 : vector<2x1x256xbf16> to vector<2x1x256xf32>
    %15 = vector.broadcast %10 : vector<1x32x1xf32> to vector<2x32x256xf32>
    %16 = vector.broadcast %14 : vector<2x1x256xf32> to vector<2x32x256xf32>
    %17 = arith.mulf %15, %16 : vector<2x32x256xf32>
    %18 = vector.extract_strided_slice %8 {offsets = [0, 1], sizes = [32, 1], strides = [1, 1]} : vector<32x4xf32> to vector<32x1xf32>
    %19 = vector.shape_cast %18 : vector<32x1xf32> to vector<1x32x1xf32>
    %20 = vector.extract_strided_slice %6 {offsets = [0, 1, 0], sizes = [2, 1, 256], strides = [1, 1, 1]} : vector<2x4x256xbf16> to vector<2x1x256xbf16>
    %21 = vector.shape_cast %20 : vector<2x1x256xbf16> to vector<2x256xbf16>
    %22 = vector.shape_cast %21 : vector<2x256xbf16> to vector<2x1x256xbf16>
    %23 = arith.extf %22 : vector<2x1x256xbf16> to vector<2x1x256xf32>
    %24 = vector.broadcast %19 : vector<1x32x1xf32> to vector<2x32x256xf32>
    %25 = vector.broadcast %23 : vector<2x1x256xf32> to vector<2x32x256xf32>
    %26 = arith.mulf %24, %25 : vector<2x32x256xf32>
    %27 = arith.addf %17, %26 : vector<2x32x256xf32>
    %28 = vector.extract_strided_slice %8 {offsets = [0, 2], sizes = [32, 1], strides = [1, 1]} : vector<32x4xf32> to vector<32x1xf32>
    %29 = vector.shape_cast %28 : vector<32x1xf32> to vector<1x32x1xf32>
    %30 = vector.extract_strided_slice %6 {offsets = [0, 2, 0], sizes = [2, 1, 256], strides = [1, 1, 1]} : vector<2x4x256xbf16> to vector<2x1x256xbf16>
    %31 = vector.shape_cast %30 : vector<2x1x256xbf16> to vector<2x256xbf16>
    %32 = vector.shape_cast %31 : vector<2x256xbf16> to vector<2x1x256xbf16>
    %33 = arith.extf %32 : vector<2x1x256xbf16> to vector<2x1x256xf32>
    %34 = vector.broadcast %29 : vector<1x32x1xf32> to vector<2x32x256xf32>
    %35 = vector.broadcast %33 : vector<2x1x256xf32> to vector<2x32x256xf32>
    %36 = arith.mulf %34, %35 : vector<2x32x256xf32>
    %37 = arith.addf %27, %36 : vector<2x32x256xf32>
    %38 = vector.extract_strided_slice %8 {offsets = [0, 3], sizes = [32, 1], strides = [1, 1]} : vector<32x4xf32> to vector<32x1xf32>
    %39 = vector.shape_cast %38 : vector<32x1xf32> to vector<1x32x1xf32>
    %40 = vector.extract_strided_slice %6 {offsets = [0, 3, 0], sizes = [2, 1, 256], strides = [1, 1, 1]} : vector<2x4x256xbf16> to vector<2x1x256xbf16>
    %41 = vector.shape_cast %40 : vector<2x1x256xbf16> to vector<2x256xbf16>
    %42 = vector.shape_cast %41 : vector<2x256xbf16> to vector<2x1x256xbf16>
    %43 = arith.extf %42 : vector<2x1x256xbf16> to vector<2x1x256xf32>
    %44 = vector.broadcast %39 : vector<1x32x1xf32> to vector<2x32x256xf32>
    %45 = vector.broadcast %43 : vector<2x1x256xf32> to vector<2x32x256xf32>
    %46 = arith.mulf %44, %45 : vector<2x32x256xf32>
    %47 = arith.addf %37, %46 : vector<2x32x256xf32>
    %c0_12 = arith.constant 0 : index
    %c0_13 = arith.constant 0 : index
    %48 = vector.load %arg6[%c0_12, %c0_13] : memref<32x1xf32, #tpu.memory_space<vmem>>, vector<32x1xf32>
    %49 = vector.shape_cast %48 : vector<32x1xf32> to vector<1x32x1xf32>
    %50 = vector.broadcast %49 : vector<1x32x1xf32> to vector<2x32x256xf32>
    %51 = arith.addf %47, %50 : vector<2x32x256xf32>
    %cst = arith.constant 0.000000e+00 : f32
    %52 = vector.broadcast %cst : f32 to vector<2x32x256xf32>
    %53 = arith.maximumf %51, %52 : vector<2x32x256xf32>
    %54 = arith.truncf %53 : vector<2x32x256xf32> to vector<2x32x256xbf16>
    %c0_14 = arith.constant 0 : index
    %c0_15 = arith.constant 0 : index
    %55 = vector.load %arg17[%c0_14, %c0_15] : memref<3x32xf32, #tpu.memory_space<vmem>>, vector<3x32xf32>
    %c0_16 = arith.constant 0 : index
    %c0_17 = arith.constant 0 : index
    %56 = vector.load %arg18[%c0_16, %c0_17] : memref<3x32xf32, #tpu.memory_space<vmem>>, vector<3x32xf32>
    %c0_18 = arith.constant 0 : index
    %c0_19 = arith.constant 0 : index
    %57 = vector.load %arg16[%c0_18, %c0_19] : memref<4x32xf32, #tpu.memory_space<vmem>>, vector<4x32xf32>
    %58 = vector.shape_cast %7 : vector<2x8x32xf32> to vector<16x32xf32>
    %59 = arith.truncf %58 : vector<16x32xf32> to vector<16x32xbf16>
    %c0_20 = arith.constant 0 : index
    %c0_21 = arith.constant 0 : index
    %60 = vector.load %arg7[%c0_20, %c0_21] : memref<32x384xbf16, #tpu.memory_space<vmem>>, vector<32x384xbf16>
    %cst_22 = arith.constant dense<0.000000e+00> : vector<16x384xf32>
    %61 = tpu.matmul %59, %60, %cst_22 {dimension_numbers = #tpu.dot_dimension_numbers<[1], [0], [0], [1], [0, 0, 1, 1], [], []>} : vector<16x32xbf16>, vector<32x384xbf16>, vector<16x384xf32> -> vector<16x384xf32>
    %c0_23 = arith.constant 0 : index
    %c0_24 = arith.constant 0 : index
    %62 = vector.load %arg8[%c0_23, %c0_24] : memref<1x384xf32, #tpu.memory_space<vmem>>, vector<1x384xf32>
    %63 = vector.broadcast %62 : vector<1x384xf32> to vector<16x384xf32>
    %64 = arith.addf %61, %63 : vector<16x384xf32>
    %65 = vector.extract_strided_slice %64 {offsets = [0, 0], sizes = [16, 128], strides = [1, 1]} : vector<16x384xf32> to vector<16x128xf32>
    %66 = vector.shape_cast %65 : vector<16x128xf32> to vector<2x8x128xf32>
    %cst_25 = arith.constant 0.176776692 : f32
    %67 = vector.broadcast %cst_25 : f32 to vector<2x8x128xf32>
    %68 = arith.mulf %66, %67 : vector<2x8x128xf32>
    %69 = vector.extract_strided_slice %64 {offsets = [0, 128], sizes = [16, 128], strides = [1, 1]} : vector<16x384xf32> to vector<16x128xf32>
    %70 = vector.shape_cast %69 : vector<16x128xf32> to vector<2x8x128xf32>
    %71 = vector.extract_strided_slice %64 {offsets = [0, 256], sizes = [16, 128], strides = [1, 1]} : vector<16x384xf32> to vector<16x128xf32>
    %72 = vector.shape_cast %71 : vector<16x128xf32> to vector<2x8x128xf32>
    %73 = arith.truncf %68 : vector<2x8x128xf32> to vector<2x8x128xbf16>
    %74 = arith.truncf %70 : vector<2x8x128xf32> to vector<2x8x128xbf16>
    "tpu.trace_start"() <{level = 10 : i32, message = "btd,bsd->bts"}> : () -> ()
    %cst_26 = arith.constant dense<0.000000e+00> : vector<2x8x8xf32>
    %75 = tpu.matmul %73, %74, %cst_26 {dimension_numbers = #tpu.dot_dimension_numbers<[2], [2], [1], [1], [0, 0, 0, 1, 1, 1], [0], [0]>} : vector<2x8x128xbf16>, vector<2x8x128xbf16>, vector<2x8x8xf32> -> vector<2x8x8xf32>
    "tpu.trace_stop"() : () -> ()
    %76 = arith.addf %75, %5 : vector<2x8x8xf32>
    %cst_27 = arith.constant dense<0xFF800000> : vector<2x8xf32>
    %77 = vector.multi_reduction <maximumf>, %76, %cst_27 [2] : vector<2x8x8xf32> to vector<2x8xf32>
    %78 = vector.shape_cast %77 : vector<2x8xf32> to vector<2x8x1xf32>
    %79 = vector.broadcast %78 : vector<2x8x1xf32> to vector<2x8x8xf32>
    %80 = arith.subf %76, %79 : vector<2x8x8xf32>
    %81 = math.exp %80 : vector<2x8x8xf32>
    %cst_28 = arith.constant dense<0.000000e+00> : vector<2x8xf32>
    %82 = vector.multi_reduction <add>, %81, %cst_28 [2] : vector<2x8x8xf32> to vector<2x8xf32>
    %83 = vector.shape_cast %82 : vector<2x8xf32> to vector<2x8x1xf32>
    %84 = tpu.reciprocal %83 {approx = true} : vector<2x8x1xf32> -> vector<2x8x1xf32>
    %85 = vector.broadcast %84 : vector<2x8x1xf32> to vector<2x8x8xf32>
    %86 = arith.mulf %81, %85 : vector<2x8x8xf32>
    %87 = arith.truncf %86 : vector<2x8x8xf32> to vector<2x8x8xbf16>
    %88 = arith.truncf %72 : vector<2x8x128xf32> to vector<2x8x128xbf16>
    "tpu.trace_start"() <{level = 10 : i32, message = "bts,bsd->btd"}> : () -> ()
    %cst_29 = arith.constant dense<0.000000e+00> : vector<2x8x128xf32>
    %89 = tpu.matmul %87, %88, %cst_29 {dimension_numbers = #tpu.dot_dimension_numbers<[2], [1], [1], [2], [0, 0, 0, 1, 1, 2], [0], [0]>} : vector<2x8x8xbf16>, vector<2x8x128xbf16>, vector<2x8x128xf32> -> vector<2x8x128xf32>
    "tpu.trace_stop"() : () -> ()
    %90 = vector.shape_cast %89 : vector<2x8x128xf32> to vector<16x128xf32>
    %c0_30 = arith.constant 0 : index
    %c0_31 = arith.constant 0 : index
    %91 = vector.load %arg9[%c0_30, %c0_31] : memref<128x32xbf16, #tpu.memory_space<vmem>>, vector<128x32xbf16>
    %92 = arith.truncf %90 : vector<16x128xf32> to vector<16x128xbf16>
    %cst_32 = arith.constant dense<0.000000e+00> : vector<16x32xf32>
    %93 = tpu.matmul %92, %91, %cst_32 {dimension_numbers = #tpu.dot_dimension_numbers<[1], [0], [0], [1], [0, 0, 1, 1], [], []>} : vector<16x128xbf16>, vector<128x32xbf16>, vector<16x32xf32> -> vector<16x32xf32>
    %94 = vector.extract_strided_slice %57 {offsets = [0, 0], sizes = [1, 32], strides = [1, 1]} : vector<4x32xf32> to vector<1x32xf32>
    %95 = vector.broadcast %94 : vector<1x32xf32> to vector<16x32xf32>
    %96 = arith.addf %93, %95 : vector<16x32xf32>
    %97 = arith.addf %58, %96 : vector<16x32xf32>
    %98 = vector.extract_strided_slice %55 {offsets = [0, 0], sizes = [1, 32], strides = [1, 1]} : vector<3x32xf32> to vector<1x32xf32>
    %99 = vector.extract_strided_slice %56 {offsets = [0, 0], sizes = [1, 32], strides = [1, 1]} : vector<3x32xf32> to vector<1x32xf32>
    %cst_33 = arith.constant dense<0.000000e+00> : vector<16xf32>
    %100 = vector.multi_reduction <add>, %97, %cst_33 [1] : vector<16x32xf32> to vector<16xf32>
    %101 = vector.shape_cast %100 : vector<16xf32> to vector<16x1xf32>
    %cst_34 = arith.constant 3.200000e+01 : f32
    %102 = vector.broadcast %cst_34 : f32 to vector<16x1xf32>
    %103 = arith.divf %101, %102 : vector<16x1xf32>
    %104 = vector.broadcast %103 : vector<16x1xf32> to vector<16x32xf32>
    %105 = arith.subf %97, %104 : vector<16x32xf32>
    %106 = arith.mulf %105, %105 : vector<16x32xf32>
    %cst_35 = arith.constant dense<0.000000e+00> : vector<16xf32>
    %107 = vector.multi_reduction <add>, %106, %cst_35 [1] : vector<16x32xf32> to vector<16xf32>
    %108 = vector.shape_cast %107 : vector<16xf32> to vector<16x1xf32>
    %cst_36 = arith.constant 3.200000e+01 : f32
    %109 = vector.broadcast %cst_36 : f32 to vector<16x1xf32>
    %110 = arith.divf %108, %109 : vector<16x1xf32>
    %111 = vector.broadcast %103 : vector<16x1xf32> to vector<16x32xf32>
    %112 = arith.subf %97, %111 : vector<16x32xf32>
    %cst_37 = arith.constant 9.99999974E-6 : f32
    %113 = vector.broadcast %cst_37 : f32 to vector<16x1xf32>
    %114 = arith.addf %110, %113 : vector<16x1xf32>
    %115 = math.rsqrt %114 : vector<16x1xf32>
    %116 = vector.broadcast %115 : vector<16x1xf32> to vector<16x32xf32>
    %117 = arith.mulf %112, %116 : vector<16x32xf32>
    %118 = vector.broadcast %98 : vector<1x32xf32> to vector<16x32xf32>
    %119 = arith.mulf %117, %118 : vector<16x32xf32>
    %120 = vector.broadcast %99 : vector<1x32xf32> to vector<16x32xf32>
    %121 = arith.addf %119, %120 : vector<16x32xf32>
    %122 = arith.truncf %121 : vector<16x32xf32> to vector<16x32xbf16>
    %c0_38 = arith.constant 0 : index
    %c0_39 = arith.constant 0 : index
    %123 = vector.load %arg10[%c0_38, %c0_39] : memref<32x32xbf16, #tpu.memory_space<vmem>>, vector<32x32xbf16>
    %cst_40 = arith.constant dense<0.000000e+00> : vector<16x32xf32>
    %124 = tpu.matmul %122, %123, %cst_40 {dimension_numbers = #tpu.dot_dimension_numbers<[1], [0], [0], [1], [0, 0, 1, 1], [], []>} : vector<16x32xbf16>, vector<32x32xbf16>, vector<16x32xf32> -> vector<16x32xf32>
    %125 = vector.extract_strided_slice %57 {offsets = [1, 0], sizes = [1, 32], strides = [1, 1]} : vector<4x32xf32> to vector<1x32xf32>
    %126 = vector.broadcast %125 : vector<1x32xf32> to vector<16x32xf32>
    %127 = arith.addf %124, %126 : vector<16x32xf32>
    %cst_41 = arith.constant 0.176776692 : f32
    %128 = vector.broadcast %cst_41 : f32 to vector<16x32xf32>
    %129 = arith.mulf %127, %128 : vector<16x32xf32>
    %c0_42 = arith.constant 0 : index
    %c0_43 = arith.constant 0 : index
    %130 = vector.load %arg11[%c0_42, %c0_43] : memref<32x32xbf16, #tpu.memory_space<vmem>>, vector<32x32xbf16>
    %131 = arith.truncf %129 : vector<16x32xf32> to vector<16x32xbf16>
    %cst_44 = arith.constant dense<0.000000e+00> : vector<16x32xf32>
    %132 = tpu.matmul %131, %130, %cst_44 {dimension_numbers = #tpu.dot_dimension_numbers<[1], [1], [0], [0], [0, 0, 1, 0], [], []>} : vector<16x32xbf16>, vector<32x32xbf16>, vector<16x32xf32> -> vector<16x32xf32>
    %133 = vector.shape_cast %132 : vector<16x32xf32> to vector<2x8x32xf32>
    %134 = arith.truncf %133 : vector<2x8x32xf32> to vector<2x8x32xbf16>
    "tpu.trace_start"() <{level = 10 : i32, message = "btd,bds->bts"}> : () -> ()
    %cst_45 = arith.constant dense<0.000000e+00> : vector<2x8x256xf32>
    %135 = tpu.matmul %134, %54, %cst_45 {dimension_numbers = #tpu.dot_dimension_numbers<[2], [1], [1], [2], [0, 0, 0, 1, 1, 2], [0], [0]>} : vector<2x8x32xbf16>, vector<2x32x256xbf16>, vector<2x8x256xf32> -> vector<2x8x256xf32>
    "tpu.trace_stop"() : () -> ()
    %cst_46 = arith.constant dense<0xFF800000> : vector<2x8xf32>
    %136 = vector.multi_reduction <maximumf>, %135, %cst_46 [2] : vector<2x8x256xf32> to vector<2x8xf32>
    %137 = vector.shape_cast %136 : vector<2x8xf32> to vector<2x8x1xf32>
    %138 = vector.broadcast %137 : vector<2x8x1xf32> to vector<2x8x256xf32>
    %139 = arith.subf %135, %138 : vector<2x8x256xf32>
    %140 = math.exp %139 : vector<2x8x256xf32>
    %cst_47 = arith.constant dense<0.000000e+00> : vector<2x8xf32>
    %141 = vector.multi_reduction <add>, %140, %cst_47 [2] : vector<2x8x256xf32> to vector<2x8xf32>
    %142 = vector.shape_cast %141 : vector<2x8xf32> to vector<2x8x1xf32>
    %143 = tpu.reciprocal %142 {approx = true} : vector<2x8x1xf32> -> vector<2x8x1xf32>
    %144 = vector.broadcast %143 : vector<2x8x1xf32> to vector<2x8x256xf32>
    %145 = arith.mulf %140, %144 : vector<2x8x256xf32>
    %146 = arith.truncf %145 : vector<2x8x256xf32> to vector<2x8x256xbf16>
    "tpu.trace_start"() <{level = 10 : i32, message = "bts,bds->btd"}> : () -> ()
    %cst_48 = arith.constant dense<0.000000e+00> : vector<2x8x32xf32>
    %147 = tpu.matmul %146, %54, %cst_48 {dimension_numbers = #tpu.dot_dimension_numbers<[2], [2], [1], [1], [0, 0, 0, 1, 1, 1], [0], [0]>} : vector<2x8x256xbf16>, vector<2x32x256xbf16>, vector<2x8x32xf32> -> vector<2x8x32xf32>
    "tpu.trace_stop"() : () -> ()
    %148 = vector.shape_cast %147 : vector<2x8x32xf32> to vector<16x32xf32>
    %c0_49 = arith.constant 0 : index
    %c0_50 = arith.constant 0 : index
    %149 = vector.load %arg12[%c0_49, %c0_50] : memref<32x32xbf16, #tpu.memory_space<vmem>>, vector<32x32xbf16>
    %150 = arith.truncf %148 : vector<16x32xf32> to vector<16x32xbf16>
    %cst_51 = arith.constant dense<0.000000e+00> : vector<16x32xf32>
    %151 = tpu.matmul %150, %149, %cst_51 {dimension_numbers = #tpu.dot_dimension_numbers<[1], [0], [0], [1], [0, 0, 1, 1], [], []>} : vector<16x32xbf16>, vector<32x32xbf16>, vector<16x32xf32> -> vector<16x32xf32>
    %152 = vector.extract_strided_slice %57 {offsets = [2, 0], sizes = [1, 32], strides = [1, 1]} : vector<4x32xf32> to vector<1x32xf32>
    %153 = vector.broadcast %152 : vector<1x32xf32> to vector<16x32xf32>
    %154 = arith.addf %151, %153 : vector<16x32xf32>
    %155 = arith.addf %121, %154 : vector<16x32xf32>
    %156 = vector.extract_strided_slice %55 {offsets = [1, 0], sizes = [1, 32], strides = [1, 1]} : vector<3x32xf32> to vector<1x32xf32>
    %157 = vector.extract_strided_slice %56 {offsets = [1, 0], sizes = [1, 32], strides = [1, 1]} : vector<3x32xf32> to vector<1x32xf32>
    %cst_52 = arith.constant dense<0.000000e+00> : vector<16xf32>
    %158 = vector.multi_reduction <add>, %155, %cst_52 [1] : vector<16x32xf32> to vector<16xf32>
    %159 = vector.shape_cast %158 : vector<16xf32> to vector<16x1xf32>
    %cst_53 = arith.constant 3.200000e+01 : f32
    %160 = vector.broadcast %cst_53 : f32 to vector<16x1xf32>
    %161 = arith.divf %159, %160 : vector<16x1xf32>
    %162 = vector.broadcast %161 : vector<16x1xf32> to vector<16x32xf32>
    %163 = arith.subf %155, %162 : vector<16x32xf32>
    %164 = arith.mulf %163, %163 : vector<16x32xf32>
    %cst_54 = arith.constant dense<0.000000e+00> : vector<16xf32>
    %165 = vector.multi_reduction <add>, %164, %cst_54 [1] : vector<16x32xf32> to vector<16xf32>
    %166 = vector.shape_cast %165 : vector<16xf32> to vector<16x1xf32>
    %cst_55 = arith.constant 3.200000e+01 : f32
    %167 = vector.broadcast %cst_55 : f32 to vector<16x1xf32>
    %168 = arith.divf %166, %167 : vector<16x1xf32>
    %169 = vector.broadcast %161 : vector<16x1xf32> to vector<16x32xf32>
    %170 = arith.subf %155, %169 : vector<16x32xf32>
    %cst_56 = arith.constant 9.99999974E-6 : f32
    %171 = vector.broadcast %cst_56 : f32 to vector<16x1xf32>
    %172 = arith.addf %168, %171 : vector<16x1xf32>
    %173 = math.rsqrt %172 : vector<16x1xf32>
    %174 = vector.broadcast %173 : vector<16x1xf32> to vector<16x32xf32>
    %175 = arith.mulf %170, %174 : vector<16x32xf32>
    %176 = vector.broadcast %156 : vector<1x32xf32> to vector<16x32xf32>
    %177 = arith.mulf %175, %176 : vector<16x32xf32>
    %178 = vector.broadcast %157 : vector<1x32xf32> to vector<16x32xf32>
    %179 = arith.addf %177, %178 : vector<16x32xf32>
    %180 = arith.truncf %179 : vector<16x32xf32> to vector<16x32xbf16>
    %c0_57 = arith.constant 0 : index
    %c0_58 = arith.constant 0 : index
    %181 = vector.load %arg13[%c0_57, %c0_58] : memref<32x64xbf16, #tpu.memory_space<vmem>>, vector<32x64xbf16>
    %cst_59 = arith.constant dense<0.000000e+00> : vector<16x64xf32>
    %182 = tpu.matmul %180, %181, %cst_59 {dimension_numbers = #tpu.dot_dimension_numbers<[1], [0], [0], [1], [0, 0, 1, 1], [], []>} : vector<16x32xbf16>, vector<32x64xbf16>, vector<16x64xf32> -> vector<16x64xf32>
    %c0_60 = arith.constant 0 : index
    %c0_61 = arith.constant 0 : index
    %183 = vector.load %arg14[%c0_60, %c0_61] : memref<1x64xf32, #tpu.memory_space<vmem>>, vector<1x64xf32>
    %184 = vector.broadcast %183 : vector<1x64xf32> to vector<16x64xf32>
    %185 = arith.addf %182, %184 : vector<16x64xf32>
    %cst_62 = arith.constant 0.000000e+00 : f32
    %186 = vector.broadcast %cst_62 : f32 to vector<16x64xf32>
    %187 = arith.maximumf %185, %186 : vector<16x64xf32>
    %c0_63 = arith.constant 0 : index
    %c0_64 = arith.constant 0 : index
    %188 = vector.load %arg15[%c0_63, %c0_64] : memref<64x32xbf16, #tpu.memory_space<vmem>>, vector<64x32xbf16>
    %189 = arith.truncf %187 : vector<16x64xf32> to vector<16x64xbf16>
    %cst_65 = arith.constant dense<0.000000e+00> : vector<16x32xf32>
    %190 = tpu.matmul %189, %188, %cst_65 {dimension_numbers = #tpu.dot_dimension_numbers<[1], [0], [0], [1], [0, 0, 1, 1], [], []>} : vector<16x64xbf16>, vector<64x32xbf16>, vector<16x32xf32> -> vector<16x32xf32>
    %191 = vector.extract_strided_slice %57 {offsets = [3, 0], sizes = [1, 32], strides = [1, 1]} : vector<4x32xf32> to vector<1x32xf32>
    %192 = vector.broadcast %191 : vector<1x32xf32> to vector<16x32xf32>
    %193 = arith.addf %190, %192 : vector<16x32xf32>
    %194 = arith.addf %179, %193 : vector<16x32xf32>
    %195 = vector.extract_strided_slice %55 {offsets = [2, 0], sizes = [1, 32], strides = [1, 1]} : vector<3x32xf32> to vector<1x32xf32>
    %196 = vector.extract_strided_slice %56 {offsets = [2, 0], sizes = [1, 32], strides = [1, 1]} : vector<3x32xf32> to vector<1x32xf32>
    %cst_66 = arith.constant dense<0.000000e+00> : vector<16xf32>
    %197 = vector.multi_reduction <add>, %194, %cst_66 [1] : vector<16x32xf32> to vector<16xf32>
    %198 = vector.shape_cast %197 : vector<16xf32> to vector<16x1xf32>
    %cst_67 = arith.constant 3.200000e+01 : f32
    %199 = vector.broadcast %cst_67 : f32 to vector<16x1xf32>
    %200 = arith.divf %198, %199 : vector<16x1xf32>
    %201 = vector.broadcast %200 : vector<16x1xf32> to vector<16x32xf32>
    %202 = arith.subf %194, %201 : vector<16x32xf32>
    %203 = arith.mulf %202, %202 : vector<16x32xf32>
    %cst_68 = arith.constant dense<0.000000e+00> : vector<16xf32>
    %204 = vector.multi_reduction <add>, %203, %cst_68 [1] : vector<16x32xf32> to vector<16xf32>
    %205 = vector.shape_cast %204 : vector<16xf32> to vector<16x1xf32>
    %cst_69 = arith.constant 3.200000e+01 : f32
    %206 = vector.broadcast %cst_69 : f32 to vector<16x1xf32>
    %207 = arith.divf %205, %206 : vector<16x1xf32>
    %208 = vector.broadcast %200 : vector<16x1xf32> to vector<16x32xf32>
    %209 = arith.subf %194, %208 : vector<16x32xf32>
    %cst_70 = arith.constant 9.99999974E-6 : f32
    %210 = vector.broadcast %cst_70 : f32 to vector<16x1xf32>
    %211 = arith.addf %207, %210 : vector<16x1xf32>
    %212 = math.rsqrt %211 : vector<16x1xf32>
    %213 = vector.broadcast %212 : vector<16x1xf32> to vector<16x32xf32>
    %214 = arith.mulf %209, %213 : vector<16x32xf32>
    %215 = vector.broadcast %195 : vector<1x32xf32> to vector<16x32xf32>
    %216 = arith.mulf %214, %215 : vector<16x32xf32>
    %217 = vector.broadcast %196 : vector<1x32xf32> to vector<16x32xf32>
    %218 = arith.addf %216, %217 : vector<16x32xf32>
    %219 = arith.truncf %218 : vector<16x32xf32> to vector<16x32xbf16>
    %c0_71 = arith.constant 0 : index
    %c0_72 = arith.constant 0 : index
    %220 = vector.load %arg19[%c0_71, %c0_72] : memref<32x128xbf16, #tpu.memory_space<vmem>>, vector<32x128xbf16>
    %cst_73 = arith.constant dense<0.000000e+00> : vector<16x128xf32>
    %221 = tpu.matmul %219, %220, %cst_73 {dimension_numbers = #tpu.dot_dimension_numbers<[1], [0], [0], [1], [0, 0, 1, 1], [], []>} : vector<16x32xbf16>, vector<32x128xbf16>, vector<16x128xf32> -> vector<16x128xf32>
    %c0_74 = arith.constant 0 : index
    %c0_75 = arith.constant 0 : index
    %222 = vector.load %arg20[%c0_74, %c0_75] : memref<1x128xf32, #tpu.memory_space<vmem>>, vector<1x128xf32>
    %223 = vector.broadcast %222 : vector<1x128xf32> to vector<16x128xf32>
    %224 = arith.addf %221, %223 : vector<16x128xf32>
    %225 = vector.shape_cast %224 : vector<16x128xf32> to vector<2x8x128xf32>
    %c0_76 = arith.constant 0 : index
    %c0_77 = arith.constant 0 : index
    %c0_78 = arith.constant 0 : index
    %226 = vector.load %arg21[%c0_76, %c0_77, %c0_78] : memref<2x8x128xf32, #tpu.memory_space<vmem>>, vector<2x8x128xf32>
    tpu.vector_store %arg21[%c0_76, %c0_77, %c0_78], %225 {strides = array<i32>} : memref<2x8x128xf32, #tpu.memory_space<vmem>>, vector<2x8x128xf32>,
    return
  }
  func.func @transform_0(%arg0: i32) -> (i32, i32, i32) {
    %c0_i32 = arith.constant 0 : i32
    %c0_i32_0 = arith.constant 0 : i32
    %c0_i32_1 = arith.constant 0 : i32
    return %arg0, %c0_i32, %c0_i32_0 : i32, i32, i32
  }
  func.func @transform_1(%arg0: i32) -> (i32, i32, i32) {
    %c0_i32 = arith.constant 0 : i32
    %c0_i32_0 = arith.constant 0 : i32
    %c0_i32_1 = arith.constant 0 : i32
    return %arg0, %c0_i32, %c0_i32_0 : i32, i32, i32
  }
  func.func @transform_2(%arg0: i32) -> (i32, i32, i32) {
    %c0_i32 = arith.constant 0 : i32
    %c0_i32_0 = arith.constant 0 : i32
    %c0_i32_1 = arith.constant 0 : i32
    return %arg0, %c0_i32, %c0_i32_0 : i32, i32, i32
  }
  func.func @transform_3(%arg0: i32) -> (i32, i32) {
    %c0_i32 = arith.constant 0 : i32
    %c0_i32_0 = arith.constant 0 : i32
    %c0_i32_1 = arith.constant 0 : i32
    return %c0_i32, %c0_i32_0 : i32, i32
  }
  func.func @transform_4(%arg0: i32) -> (i32, i32) {
    %c0_i32 = arith.constant 0 : i32
    %c0_i32_0 = arith.constant 0 : i32
    %c0_i32_1 = arith.constant 0 : i32
    return %c0_i32, %c0_i32_0 : i32, i32
  }
  func.func @transform_5(%arg0: i32) -> (i32, i32) {
    %c0_i32 = arith.constant 0 : i32
    %c0_i32_0 = arith.constant 0 : i32
    %c0_i32_1 = arith.constant 0 : i32
    return %c0_i32, %c0_i32_0 : i32, i32
  }
  func.func @transform_6(%arg0: i32) -> (i32, i32) {
    %c0_i32 = arith.constant 0 : i32
    %c0_i32_0 = arith.constant 0 : i32
    %c0_i32_1 = arith.constant 0 : i32
    return %c0_i32, %c0_i32_0 : i32, i32
  }
  func.func @transform_7(%arg0: i32) -> (i32, i32) {
    %c0_i32 = arith.constant 0 : i32
    %c0_i32_0 = arith.constant 0 : i32
    %c0_i32_1 = arith.constant 0 : i32
    return %c0_i32, %c0_i32_0 : i32, i32
  }
  func.func @transform_8(%arg0: i32) -> (i32, i32) {
    %c0_i32 = arith.constant 0 : i32
    %c0_i32_0 = arith.constant 0 : i32
    %c0_i32_1 = arith.constant 0 : i32
    return %c0_i32, %c0_i32_0 : i32, i32
  }
  func.func @transform_9(%arg0: i32) -> (i32, i32) {
    %c0_i32 = arith.constant 0 : i32
    %c0_i32_0 = arith.constant 0 : i32
    %c0_i32_1 = arith.constant 0 : i32
    return %c0_i32, %c0_i32_0 : i32, i32
  }
  func.func @transform_10(%arg0: i32) -> (i32, i32) {
    %c0_i32 = arith.constant 0 : i32
    %c0_i32_0 = arith.constant 0 : i32
    %c0_i32_1 = arith.constant 0 : i32
    return %c0_i32, %c0_i32_0 : i32, i32
  }
  func.func @transform_11(%arg0: i32) -> (i32, i32) {
    %c0_i32 = arith.constant 0 : i32
    %c0_i32_0 = arith.constant 0 : i32
    %c0_i32_1 = arith.constant 0 : i32
    return %c0_i32, %c0_i32_0 : i32, i32
  }
  func.func @transform_12(%arg0: i32) -> (i32, i32) {
    %c0_i32 = arith.constant 0 : i32
    %c0_i32_0 = arith.constant 0 : i32
    %c0_i32_1 = arith.constant 0 : i32
    return %c0_i32, %c0_i32_0 : i32, i32
  }
  func.func @transform_13(%arg0: i32) -> (i32, i32) {
    %c0_i32 = arith.constant 0 : i32
    %c0_i32_0 = arith.constant 0 : i32
    %c0_i32_1 = arith.constant 0 : i32
    return %c0_i32, %c0_i32_0 : i32, i32
  }
  func.func @transform_14(%arg0: i32) -> (i32, i32) {
    %c0_i32 = arith.constant 0 : i32
    %c0_i32_0 = arith.constant 0 : i32
    %c0_i32_1 = arith.constant 0 : i32
    return %c0_i32, %c0_i32_0 : i32, i32
  }
  func.func @transform_15(%arg0: i32) -> (i32, i32) {
    %c0_i32 = arith.constant 0 : i32
    %c0_i32_0 = arith.constant 0 : i32
    %c0_i32_1 = arith.constant 0 : i32
    return %c0_i32, %c0_i32_0 : i32, i32
  }
  func.func @transform_16(%arg0: i32) -> (i32, i32) {
    %c0_i32 = arith.constant 0 : i32
    %c0_i32_0 = arith.constant 0 : i32
    %c0_i32_1 = arith.constant 0 : i32
    return %c0_i32, %c0_i32_0 : i32, i32
  }
  func.func @transform_17(%arg0: i32) -> (i32, i32) {
    %c0_i32 = arith.constant 0 : i32
    %c0_i32_0 = arith.constant 0 : i32
    %c0_i32_1 = arith.constant 0 : i32
    return %c0_i32, %c0_i32_0 : i32, i32
  }
  func.func @transform_18(%arg0: i32) -> (i32, i32) {
    %c0_i32 = arith.constant 0 : i32
    %c0_i32_0 = arith.constant 0 : i32
    %c0_i32_1 = arith.constant 0 : i32
    return %c0_i32, %c0_i32_0 : i32, i32
  }
  func.func @transform_19(%arg0: i32) -> (i32, i32) {
    %c0_i32 = arith.constant 0 : i32
    %c0_i32_0 = arith.constant 0 : i32
    %c0_i32_1 = arith.constant 0 : i32
    return %c0_i32, %c0_i32_0 : i32, i32
  }
  func.func @transform_20(%arg0: i32) -> (i32, i32, i32) {
    %c0_i32 = arith.constant 0 : i32
    %c0_i32_0 = arith.constant 0 : i32
    %c0_i32_1 = arith.constant 0 : i32
    return %arg0, %c0_i32, %c0_i32_0 : i32, i32, i32
  }
}

module attributes {stable_mosaic.version = 11 : i64} {
  func.func @caption_kernel(%arg0: i32, %arg1: memref<2x4x256xbf16, #tpu.memory_space<vmem>>, %arg2: memref<2x8x32xf32, #tpu.memory_space<vmem>>, %arg3: memref<2x1x8xf32, #tpu.memory_space<vmem>>, %arg4: memref<8x8xf32, #tpu.memory_space<vmem>>, %arg5: memref<32x4xf32, #tpu.memory_space<vmem>>, %arg6: memref<32x1xf32, #tpu.memory_space<vmem>>, %arg7: memref<32x384xbf16, #tpu.memory_space<vmem>>, %arg8: memref<1x384xf32, #tpu.memory_space<vmem>>, %arg9: memref<128x32xbf16, #tpu.memory_space<vmem>>, %arg10: memref<32x32xbf16, #tpu.memory_space<vmem>>, %arg11: memref<32x32xbf16, #tpu.memory_space<vmem>>, %arg12: memref<32x32xbf16, #tpu.memory_space<vmem>>, %arg13: memref<32x64xbf16, #tpu.memory_space<vmem>>, %arg14: memref<1x64xf32, #tpu.memory_space<vmem>>, %arg15: memref<64x32xbf16, #tpu.memory_space<vmem>>, %arg16: memref<4x32xf32, #tpu.memory_space<vmem>>, %arg17: memref<3x32xf32, #tpu.memory_space<vmem>>, %arg18: memref<3x32xf32, #tpu.memory_space<vmem>>, %arg19: memref<32x128xbf16, #tpu.memory_space<vmem>>, %arg20: memref<1x128xf32, #tpu.memory_space<vmem>>, %arg21: memref<2x8x128xf32, #tpu.memory_space<vmem>>) attributes {dimension_semantics = [#tpu.dimension_semantics<parallel>], iteration_bounds = array<i64: 1>, scalar_prefetch = 0 : i64, scratch_operands = 0 : i64, tpu.core_type = #tpu.core_type<tc>, window_params = [{transform_indices = @transform_0, window_bounds = array<i64: 2, 4, 256>}, {transform_indices = @transform_1, window_bounds = array<i64: 2, 8, 32>}, {transform_indices = @transform_2, window_bounds = array<i64: 2, 1, 8>}, {pipeline_mode = #tpu.pipeline_mode<synchronous>, transform_indices = @transform_3, window_bounds = array<i64: 8, 8>}, {pipeline_mode = #tpu.pipeline_mode<synchronous>, transform_indices = @transform_4, window_bounds = array<i64: 32, 4>}, {pipeline_mode = #tpu.pipeline_mode<synchronous>, transform_indices = @transform_5, window_bounds = array<i64: 32, 1>}, {pipeline_mode = #tpu.pipeline_mode<synchronous>, transform_indices = @transform_6, window_bounds = array<i64: 32, 384>}, {pipeline_mode = #tpu.pipeline_mode<synchronous>, transform_indices = @transform_7, window_bounds = array<i64: 1, 384>}, {pipeline_mode = #tpu.pipeline_mode<synchronous>, transform_indices = @transform_8, window_bounds = array<i64: 128, 32>}, {pipeline_mode = #tpu.pipeline_mode<synchronous>, transform_indices = @transform_9, window_bounds = array<i64: 32, 32>}, {pipeline_mode = #tpu.pipeline_mode<synchronous>, transform_indices = @transform_10, window_bounds = array<i64: 32, 32>}, {pipeline_mode = #tpu.pipeline_mode<synchronous>, transform_indices = @transform_11, window_bounds = array<i64: 32, 32>}, {pipeline_mode = #tpu.pipeline_mode<synchronous>, transform_indices = @transform_12, window_bounds = array<i64: 32, 64>}, {pipeline_mode = #tpu.pipeline_mode<synchronous>, transform_indices = @transform_13, window_bounds = array<i64: 1, 64>}, {pipeline_mode = #tpu.pipeline_mode<synchronous>, transform_indices = @transform_14, window_bounds = array<i64: 64, 32>}, {pipeline_mode = #tpu.pipeline_mode<synchronous>, transform_indices = @transform_15, window_bounds = array<i64: 4, 32>}, {pipeline_mode = #tpu.pipeline_mode<synchronous>, transform_indices = @transform_16, window_bounds = array<i64: 3, 32>}, {pipeline_mode = #tpu.pipeline_mode<synchronous>, transform_indices = @transform_17, window_bounds = array<i64: 3, 32>}, {pipeline_mode = #tpu.pipeline_mode<synchronous>, transform_indices = @transform_18, window_bounds = array<i64: 32, 128>}, {pipeline_mode = #tpu.pipeline_mode<synchronous>, transform_indices = @transform_19, window_bounds = array<i64: 1, 128>}, {transform_indices = @transform_20, window_bounds = array<i64: 2, 8, 128>}]} {
    %c0 = arith.constant 0 : index
    %c0_0 = arith.constant 0 : index
    %0 = vector.load %arg4[%c0, %c0_0] : memref<8x8xf32, #tpu.memory_space<vmem>>, vector<8x8xf32>
    %1 = vector.shape_cast %0 : vector<8x8xf32> to vector<1x8x8xf32>
    %c0_1 = arith.constant 0 : index
    %c0_2 = arith.constant 0 : index
    %c0_3 = arith.constant 0 : index
    %2 = vector.load %arg3[%c0_1, %c0_2, %c0_3] : memref<2x1x8xf32, #tpu.memory_space<vmem>>, vector<2x1x8xf32>
    %3 = vector.broadcast %1 : vector<1x8x8xf32> to vector<2x8x8xf32>
    %4 = vector.broadcast %2 : vector<2x1x8xf32> to vector<2x8x8xf32>
    %5 = arith.addf %3, %4 : vector<2x8x8xf32>
    %c0_4 = arith.constant 0 : index
    %c0_5 = arith.constant 0 : index
    %c0_6 = arith.constant 0 : index
    %6 = vector.load %arg1[%c0_4, %c0_5, %c0_6] : memref<2x4x256xbf16, #tpu.memory_space<vmem>>, vector<2x4x256xbf16>
    %c0_7 = arith.constant 0 : index
    %c0_8 = arith.constant 0 : index
    %c0_9 = arith.constant 0 : index
    %7 = vector.load %arg2[%c0_7, %c0_8, %c0_9] : memref<2x8x32xf32, #tpu.memory_space<vmem>>, vector<2x8x32xf32>
    %c0_10 = arith.constant 0 : index
    %c0_11 = arith.constant 0 : index
    %8 = vector.load %arg5[%c0_10, %c0_11] : memref<32x4xf32, #tpu.memory_space<vmem>>, vector<32x4xf32>
    %9 = vector.extract_strided_slice %8 {offsets = [0, 0], sizes = [32, 1], strides = [1, 1]} : vector<32x4xf32> to vector<32x1xf32>
    %10 = vector.shape_cast %9 : vector<32x1xf32> to vector<1x32x1xf32>
    %11 = vector.extract_strided_slice %6 {offsets = [0, 0, 0], sizes = [2, 1, 256], strides = [1, 1, 1]} : vector<2x4x256xbf16> to vector<2x1x256xbf16>
    %12 = vector.shape_cast %11 : vector<2x1x256xbf16> to vector<2x256xbf16>
    %13 = vector.shape_cast %12 : vector<2x256xbf16> to vector<2x1x256xbf16>
    %14 = arith.extf %13 : vector<2x1x256xbf16> to vector<2x1x256xf32>
    %15 = vector.broadcast %10 : vector<1x32x1xf32> to vector<2x32x256xf32>
    %16 = vector.broadcast %14 : vector<2x1x256xf32> to vector<2x32x256xf32>
    %17 = arith.mulf %15, %16 : vector<2x32x256xf32>
    %18 = vector.extract_strided_slice %8 {offsets = [0, 1], sizes = [32, 1], strides = [1, 1]} : vector<32x4xf32> to vector<32x1xf32>
    %19 = vector.shape_cast %18 : vector<32x1xf32> to vector<1x32x1xf32>
    %20 = vector.extract_strided_slice %6 {offsets = [0, 1, 0], sizes = [2, 1, 256], strides = [1, 1, 1]} : vector<2x4x256xbf16> to vector<2x1x256xbf16>
    %21 = vector.shape_cast %20 : vector<2x1x256xbf16> to vector<2x256xbf16>
    %22 = vector.shape_cast %21 : vector<2x256xbf16> to vector<2x1x256xbf16>
    %23 = arith.extf %22 : vector<2x1x256xbf16> to vector<2x1x256xf32>
    %24 = vector.broadcast %19 : vector<1x32x1xf32> to vector<2x32x256xf32>
    %25 = vector.broadcast %23 : vector<2x1x256xf32> to vector<2x32x256xf32>
    %26 = arith.mulf %24, %25 : vector<2x32x256xf32>
    %27 = arith.addf %17, %26 : vector<2x32x256xf32>
    %28 = vector.extract_strided_slice %8 {offsets = [0, 2], sizes = [32, 1], strides = [1, 1]} : vector<32x4xf32> to vector<32x1xf32>
    %29 = vector.shape_cast %28 : vector<32x1xf32> to vector<1x32x1xf32>
    %30 = vector.extract_strided_slice %6 {offsets = [0, 2, 0], sizes = [2, 1, 256], strides = [1, 1, 1]} : vector<2x4x256xbf16> to vector<2x1x256xbf16>
    %31 = vector.shape_cast %30 : vector<2x1x256xbf16> to vector<2x256xbf16>
    %32 = vector.shape_cast %31 : vector<2x256xbf16> to vector<2x1x256xbf16>
    %33 = arith.extf %32 : vector<2x1x256xbf16> to vector<2x1x256xf32>
    %34 = vector.broadcast %29 : vector<1x32x1xf32> to vector<2x32x256xf32>
    %35 = vector.broadcast %33 : vector<2x1x256xf32> to vector<2x32x256xf32>
    %36 = arith.mulf %34, %35 : vector<2x32x256xf32>
    %37 = arith.addf %27, %36 : vector<2x32x256xf32>
    %38 = vector.extract_strided_slice %8 {offsets = [0, 3], sizes = [32, 1], strides = [1, 1]} : vector<32x4xf32> to vector<32x1xf32>
    %39 = vector.shape_cast %38 : vector<32x1xf32> to vector<1x32x1xf32>
    %40 = vector.extract_strided_slice %6 {offsets = [0, 3, 0], sizes = [2, 1, 256], strides = [1, 1, 1]} : vector<2x4x256xbf16> to vector<2x1x256xbf16>
    %41 = vector.shape_cast %40 : vector<2x1x256xbf16> to vector<2x256xbf16>
    %42 = vector.shape_cast %41 : vector<2x256xbf16> to vector<2x1x256xbf16>
    %43 = arith.extf %42 : vector<2x1x256xbf16> to vector<2x1x256xf32>
    %44 = vector.broadcast %39 : vector<1x32x1xf32> to vector<2x32x256xf32>
    %45 = vector.broadcast %43 : vector<2x1x256xf32> to vector<2x32x256xf32>
    %46 = arith.mulf %44, %45 : vector<2x32x256xf32>
    %47 = arith.addf %37, %46 : vector<2x32x256xf32>
    %c0_12 = arith.constant 0 : index
    %c0_13 = arith.constant 0 : index
    %48 = vector.load %arg6[%c0_12, %c0_13] : memref<32x1xf32, #tpu.memory_space<vmem>>, vector<32x1xf32>
    %49 = vector.shape_cast %48 : vector<32x1xf32> to vector<1x32x1xf32>
    %50 = vector.broadcast %49 : vector<1x32x1xf32> to vector<2x32x256xf32>
    %51 = arith.addf %47, %50 : vector<2x32x256xf32>
    %cst = arith.constant 0.000000e+00 : f32
    %52 = vector.broadcast %cst : f32 to vector<2x32x256xf32>
    %53 = arith.maximumf %51, %52 : vector<2x32x256xf32>
    %54 = arith.truncf %53 : vector<2x32x256xf32> to vector<2x32x256xbf16>
    %c0_14 = arith.constant 0 : index
    %c0_15 = arith.constant 0 : index
    %55 = vector.load %arg17[%c0_14, %c0_15] : memref<3x32xf32, #tpu.memory_space<vmem>>, vector<3x32xf32>
    %c0_16 = arith.constant 0 : index
    %c0_17 = arith.constant 0 : index
    %56 = vector.load %arg18[%c0_16, %c0_17] : memref<3x32xf32, #tpu.memory_space<vmem>>, vector<3x32xf32>
    %c0_18 = arith.constant 0 : index
    %c0_19 = arith.constant 0 : index
    %57 = vector.load %arg16[%c0_18, %c0_19] : memref<4x32xf32, #tpu.memory_space<vmem>>, vector<4x32xf32>
    %58 = vector.shape_cast %7 : vector<2x8x32xf32> to vector<16x32xf32>
    %59 = arith.truncf %58 : vector<16x32xf32> to vector<16x32xbf16>
    %c0_20 = arith.constant 0 : index
    %c0_21 = arith.constant 0 : index
    %60 = vector.load %arg7[%c0_20, %c0_21] : memref<32x384xbf16, #tpu.memory_space<vmem>>, vector<32x384xbf16>
    %cst_22 = arith.constant dense<0.000000e+00> : vector<16x384xf32>
    %61 = tpu.matmul %59, %60, %cst_22 {dimension_numbers = #tpu.dot_dimension_numbers<[1], [0], [0], [1], [0, 0, 1, 1], [], []>} : vector<16x32xbf16>, vector<32x384xbf16>, vector<16x384xf32> -> vector<16x384xf32>
    %c0_23 = arith.constant 0 : index
    %c0_24 = arith.constant 0 : index
    %62 = vector.load %arg8[%c0_23, %c0_24] : memref<1x384xf32, #tpu.memory_space<vmem>>, vector<1x384xf32>
    %63 = vector.broadcast %62 : vector<1x384xf32> to vector<16x384xf32>
    %64 = arith.addf %61, %63 : vector<16x384xf32>
    %65 = vector.extract_strided_slice %64 {offsets = [0, 0], sizes = [16, 128], strides = [1, 1]} : vector<16x384xf32> to vector<16x128xf32>
    %66 = vector.shape_cast %65 : vector<16x128xf32> to vector<2x8x128xf32>
    %cst_25 = arith.constant 0.176776692 : f32
    %67 = vector.broadcast %cst_25 : f32 to vector<2x8x128xf32>
    %68 = arith.mulf %66, %67 : vector<2x8x128xf32>
    %69 = vector.extract_strided_slice %64 {offsets = [0, 128], sizes = [16, 128], strides = [1, 1]} : vector<16x384xf32> to vector<16x128xf32>
    %70 = vector.shape_cast %69 : vector<16x128xf32> to vector<2x8x128xf32>
    %71 = vector.extract_strided_slice %64 {offsets = [0, 256], sizes = [16, 128], strides = [1, 1]} : vector<16x384xf32> to vector<16x128xf32>
    %72 = vector.shape_cast %71 : vector<16x128xf32> to vector<2x8x128xf32>
    %73 = arith.truncf %68 : vector<2x8x128xf32> to vector<2x8x128xbf16>
    %74 = arith.truncf %70 : vector<2x8x128xf32> to vector<2x8x128xbf16>
    "tpu.trace_start"() <{level = 10 : i32, message = "btd,bsd->bts"}> : () -> ()
    %cst_26 = arith.constant dense<0.000000e+00> : vector<2x8x8xf32>
    %75 = tpu.matmul %73, %74, %cst_26 {dimension_numbers = #tpu.dot_dimension_numbers<[2], [2], [1], [1], [0, 0, 0, 1, 1, 1], [0], [0]>} : vector<2x8x128xbf16>, vector<2x8x128xbf16>, vector<2x8x8xf32> -> vector<2x8x8xf32>
    "tpu.trace_stop"() : () -> ()
    %76 = arith.addf %75, %5 : vector<2x8x8xf32>
    %cst_27 = arith.constant dense<0xFF800000> : vector<2x8xf32>
    %77 = vector.multi_reduction <maximumf>, %76, %cst_27 [2] : vector<2x8x8xf32> to vector<2x8xf32>
    %78 = vector.shape_cast %77 : vector<2x8xf32> to vector<2x8x1xf32>
    %79 = vector.broadcast %78 : vector<2x8x1xf32> to vector<2x8x8xf32>
    %80 = arith.subf %76, %79 : vector<2x8x8xf32>
    %81 = math.exp %80 : vector<2x8x8xf32>
    %cst_28 = arith.constant dense<0.000000e+00> : vector<2x8xf32>
    %82 = vector.multi_reduction <add>, %81, %cst_28 [2] : vector<2x8x8xf32> to vector<2x8xf32>
    %83 = vector.shape_cast %82 : vector<2x8xf32> to vector<2x8x1xf32>
    %84 = tpu.reciprocal %83 {approx = true} : vector<2x8x1xf32> -> vector<2x8x1xf32>
    %85 = vector.broadcast %84 : vector<2x8x1xf32> to vector<2x8x8xf32>
    %86 = arith.mulf %81, %85 : vector<2x8x8xf32>
    %87 = arith.truncf %86 : vector<2x8x8xf32> to vector<2x8x8xbf16>
    %88 = arith.truncf %72 : vector<2x8x128xf32> to vector<2x8x128xbf16>
    "tpu.trace_start"() <{level = 10 : i32, message = "bts,bsd->btd"}> : () -> ()
    %cst_29 = arith.constant dense<0.000000e+00> : vector<2x8x128xf32>
    %89 = tpu.matmul %87, %88, %cst_29 {dimension_numbers = #tpu.dot_dimension_numbers<[2], [1], [1], [2], [0, 0, 0, 1, 1, 2], [0], [0]>} : vector<2x8x8xbf16>, vector<2x8x128xbf16>, vector<2x8x128xf32> -> vector<2x8x128xf32>
    "tpu.trace_stop"() : () -> ()
    %90 = vector.shape_cast %89 : vector<2x8x128xf32> to vector<16x128xf32>
    %c0_30 = arith.constant 0 : index
    %c0_31 = arith.constant 0 : index
    %91 = vector.load %arg9[%c0_30, %c0_31] : memref<128x32xbf16, #tpu.memory_space<vmem>>, vector<128x32xbf16>
    %92 = arith.truncf %90 : vector<16x128xf32> to vector<16x128xbf16>
    %cst_32 = arith.constant dense<0.000000e+00> : vector<16x32xf32>
    %93 = tpu.matmul %92, %91, %cst_32 {dimension_numbers = #tpu.dot_dimension_numbers<[1], [0], [0], [1], [0, 0, 1, 1], [], []>} : vector<16x128xbf16>, vector<128x32xbf16>, vector<16x32xf32> -> vector<16x32xf32>
    %94 = vector.extract_strided_slice %57 {offsets = [0, 0], sizes = [1, 32], strides = [1, 1]} : vector<4x32xf32> to vector<1x32xf32>
    %95 = vector.broadcast %94 : vector<1x32xf32> to vector<16x32xf32>
    %96 = arith.addf %93, %95 : vector<16x32xf32>
    %97 = arith.addf %58, %96 : vector<16x32xf32>
    %98 = vector.extract_strided_slice %55 {offsets = [0, 0], sizes = [1, 32], strides = [1, 1]} : vector<3x32xf32> to vector<1x32xf32>
    %99 = vector.extract_strided_slice %56 {offsets = [0, 0], sizes = [1, 32], strides = [1, 1]} : vector<3x32xf32> to vector<1x32xf32>
    %cst_33 = arith.constant dense<0.000000e+00> : vector<16xf32>
    %100 = vector.multi_reduction <add>, %97, %cst_33 [1] : vector<16x32xf32> to vector<16xf32>
    %101 = vector.shape_cast %100 : vector<16xf32> to vector<16x1xf32>
    %cst_34 = arith.constant 3.200000e+01 : f32
    %102 = vector.broadcast %cst_34 : f32 to vector<16x1xf32>
    %103 = arith.divf %101, %102 : vector<16x1xf32>
    %104 = vector.broadcast %103 : vector<16x1xf32> to vector<16x32xf32>
    %105 = arith.subf %97, %104 : vector<16x32xf32>
    %106 = arith.mulf %105, %105 : vector<16x32xf32>
    %cst_35 = arith.constant dense<0.000000e+00> : vector<16xf32>
    %107 = vector.multi_reduction <add>, %106, %cst_35 [1] : vector<16x32xf32> to vector<16xf32>
    %108 = vector.shape_cast %107 : vector<16xf32> to vector<16x1xf32>
    %cst_36 = arith.constant 3.200000e+01 : f32
    %109 = vector.broadcast %cst_36 : f32 to vector<16x1xf32>
    %110 = arith.divf %108, %109 : vector<16x1xf32>
    %111 = vector.broadcast %103 : vector<16x1xf32> to vector<16x32xf32>
    %112 = arith.subf %97, %111 : vector<16x32xf32>
    %cst_37 = arith.constant 9.99999974E-6 : f32
    %113 = vector.broadcast %cst_37 : f32 to vector<16x1xf32>
    %114 = arith.addf %110, %113 : vector<16x1xf32>
    %115 = math.rsqrt %114 : vector<16x1xf32>
    %116 = vector.broadcast %115 : vector<16x1xf32> to vector<16x32xf32>
    %117 = arith.mulf %112, %116 : vector<16x32xf32>
    %118 = vector.broadcast %98 : vector<1x32xf32> to vector<16x32xf32>
    %119 = arith.mulf %117, %118 : vector<16x32xf32>
    %120 = vector.broadcast %99 : vector<1x32xf32> to vector<16x32xf32>
    %121 = arith.addf %119, %120 : vector<16x32xf32>
    %122 = arith.truncf %121 : vector<16x32xf32> to vector<16x32xbf16>
    %c0_38 = arith.constant 0 : index
    %c0_39 = arith.constant 0 : index
    %123 = vector.load %arg10[%c0_38, %c0_39] : memref<32x32xbf16, #tpu.memory_space<vmem>>, vector<32x32xbf16>
    %cst_40 = arith.constant dense<0.000000e+00> : vector<16x32xf32>
    %124 = tpu.matmul %122, %123, %cst_40 {dimension_numbers = #tpu.dot_dimension_numbers<[1], [0], [0], [1], [0, 0, 1, 1], [], []>} : vector<16x32xbf16>, vector<32x32xbf16>, vector<16x32xf32> -> vector<16x32xf32>
    %125 = vector.extract_strided_slice %57 {offsets = [1, 0], sizes = [1, 32], strides = [1, 1]} : vector<4x32xf32> to vector<1x32xf32>
    %126 = vector.broadcast %125 : vector<1x32xf32> to vector<16x32xf32>
    %127 = arith.addf %124, %126 : vector<16x32xf32>
    %cst_41 = arith.constant 0.176776692 : f32
    %128 = vector.broadcast %cst_41 : f32 to vector<16x32xf32>
    %129 = arith.mulf %127, %128 : vector<16x32xf32>
    %c0_42 = arith.constant 0 : index
    %c0_43 = arith.constant 0 : index
    %130 = vector.load %arg11[%c0_42, %c0_43] : memref<32x32xbf16, #tpu.memory_space<vmem>>, vector<32x32xbf16>
    %131 = arith.truncf %129 : vector<16x32xf32> to vector<16x32xbf16>
    %cst_44 = arith.constant dense<0.000000e+00> : vector<16x32xf32>
    %132 = tpu.matmul %131, %130, %cst_44 {dimension_numbers = #tpu.dot_dimension_numbers<[1], [1], [0], [0], [0, 0, 1, 0], [], []>} : vector<16x32xbf16>, vector<32x32xbf16>, vector<16x32xf32> -> vector<16x32xf32>
    %133 = vector.shape_cast %132 : vector<16x32xf32> to vector<2x8x32xf32>
    %134 = arith.truncf %133 : vector<2x8x32xf32> to vector<2x8x32xbf16>
    "tpu.trace_start"() <{level = 10 : i32, message = "btd,bds->bts"}> : () -> ()
    %cst_45 = arith.constant dense<0.000000e+00> : vector<2x8x256xf32>
    %135 = tpu.matmul %134, %54, %cst_45 {dimension_numbers = #tpu.dot_dimension_numbers<[2], [1], [1], [2], [0, 0, 0, 1, 1, 2], [0], [0]>} : vector<2x8x32xbf16>, vector<2x32x256xbf16>, vector<2x8x256xf32> -> vector<2x8x256xf32>
    "tpu.trace_stop"() : () -> ()
    %cst_46 = arith.constant dense<0xFF800000> : vector<2x8xf32>
    %136 = vector.multi_reduction <maximumf>, %135, %cst_46 [2] : vector<2x8x256xf32> to vector<2x8xf32>
    %137 = vector.shape_cast %136 : vector<2x8xf32> to vector<2x8x1xf32>
    %138 = vector.broadcast %137 : vector<2x8x1xf32> to vector<2x8x256xf32>
    %139 = arith.subf %135, %138 : vector<2x8x256xf32>
    %140 = math.exp %139 : vector<2x8x256xf32>
    %cst_47 = arith.constant dense<0.000000e+00> : vector<2x8xf32>
    %141 = vector.multi_reduction <add>, %140, %cst_47 [2] : vector<2x8x256xf32> to vector<2x8xf32>
    %142 = vector.shape_cast %141 : vector<2x8xf32> to vector<2x8x1xf32>
    %143 = tpu.reciprocal %142 {approx = true} : vector<2x8x1xf32> -> vector<2x8x1xf32>
    %144 = vector.broadcast %143 : vector<2x8x1xf32> to vector<2x8x256xf32>
    %145 = arith.mulf %140, %144 : vector<2x8x256xf32>
    %146 = arith.truncf %145 : vector<2x8x256xf32> to vector<2x8x256xbf16>
    "tpu.trace_start"() <{level = 10 : i32, message = "bts,bds->btd"}> : () -> ()
    %cst_48 = arith.constant dense<0.000000e+00> : vector<2x8x32xf32>
    %147 = tpu.matmul %146, %54, %cst_48 {dimension_numbers = #tpu.dot_dimension_numbers<[2], [2], [1], [1], [0, 0, 0, 1, 1, 1], [0], [0]>} : vector<2x8x256xbf16>, vector<2x32x256xbf16>, vector<2x8x32xf32> -> vector<2x8x32xf32>
    "tpu.trace_stop"() : () -> ()
    %148 = vector.shape_cast %147 : vector<2x8x32xf32> to vector<16x32xf32>
    %c0_49 = arith.constant 0 : index
    %c0_50 = arith.constant 0 : index
    %149 = vector.load %arg12[%c0_49, %c0_50] : memref<32x32xbf16, #tpu.memory_space<vmem>>, vector<32x32xbf16>
    %150 = arith.truncf %148 : vector<16x32xf32> to vector<16x32xbf16>
    %cst_51 = arith.constant dense<0.000000e+00> : vector<16x32xf32>
    %151 = tpu.matmul %150, %149, %cst_51 {dimension_numbers = #tpu.dot_dimension_numbers<[1], [0], [0], [1], [0, 0, 1, 1], [], []>} : vector<16x32xbf16>, vector<32x32xbf16>, vector<16x32xf32> -> vector<16x32xf32>
    %152 = vector.extract_strided_slice %57 {offsets = [2, 0], sizes = [1, 32], strides = [1, 1]} : vector<4x32xf32> to vector<1x32xf32>
    %153 = vector.broadcast %152 : vector<1x32xf32> to vector<16x32xf32>
    %154 = arith.addf %151, %153 : vector<16x32xf32>
    %155 = arith.addf %121, %154 : vector<16x32xf32>
    %156 = vector.extract_strided_slice %55 {offsets = [1, 0], sizes = [1, 32], strides = [1, 1]} : vector<3x32xf32> to vector<1x32xf32>
    %157 = vector.extract_strided_slice %56 {offsets = [1, 0], sizes = [1, 32], strides = [1, 1]} : vector<3x32xf32> to vector<1x32xf32>
    %cst_52 = arith.constant dense<0.000000e+00> : vector<16xf32>
    %158 = vector.multi_reduction <add>, %155, %cst_52 [1] : vector<16x32xf32> to vector<16xf32>
    %159 = vector.shape_cast %158 : vector<16xf32> to vector<16x1xf32>
    %cst_53 = arith.constant 3.200000e+01 : f32
    %160 = vector.broadcast %cst_53 : f32 to vector<16x1xf32>
    %161 = arith.divf %159, %160 : vector<16x1xf32>
    %162 = vector.broadcast %161 : vector<16x1xf32> to vector<16x32xf32>
    %163 = arith.subf %155, %162 : vector<16x32xf32>
    %164 = arith.mulf %163, %163 : vector<16x32xf32>
    %cst_54 = arith.constant dense<0.000000e+00> : vector<16xf32>
    %165 = vector.multi_reduction <add>, %164, %cst_54 [1] : vector<16x32xf32> to vector<16xf32>
    %166 = vector.shape_cast %165 : vector<16xf32> to vector<16x1xf32>
    %cst_55 = arith.constant 3.200000e+01 : f32
    %167 = vector.broadcast %cst_55 : f32 to vector<16x1xf32>
    %168 = arith.divf %166, %167 : vector<16x1xf32>
    %169 = vector.broadcast %161 : vector<16x1xf32> to vector<16x32xf32>
    %170 = arith.subf %155, %169 : vector<16x32xf32>
    %cst_56 = arith.constant 9.99999974E-6 : f32
    %171 = vector.broadcast %cst_56 : f32 to vector<16x1xf32>
    %172 = arith.addf %168, %171 : vector<16x1xf32>
    %173 = math.rsqrt %172 : vector<16x1xf32>
    %174 = vector.broadcast %173 : vector<16x1xf32> to vector<16x32xf32>
    %175 = arith.mulf %170, %174 : vector<16x32xf32>
    %176 = vector.broadcast %156 : vector<1x32xf32> to vector<16x32xf32>
    %177 = arith.mulf %175, %176 : vector<16x32xf32>
    %178 = vector.broadcast %157 : vector<1x32xf32> to vector<16x32xf32>
    %179 = arith.addf %177, %178 : vector<16x32xf32>
    %180 = arith.truncf %179 : vector<16x32xf32> to vector<16x32xbf16>
    %c0_57 = arith.constant 0 : index
    %c0_58 = arith.constant 0 : index
    %181 = vector.load %arg13[%c0_57, %c0_58] : memref<32x64xbf16, #tpu.memory_space<vmem>>, vector<32x64xbf16>
    %cst_59 = arith.constant dense<0.000000e+00> : vector<16x64xf32>
    %182 = tpu.matmul %180, %181, %cst_59 {dimension_numbers = #tpu.dot_dimension_numbers<[1], [0], [0], [1], [0, 0, 1, 1], [], []>} : vector<16x32xbf16>, vector<32x64xbf16>, vector<16x64xf32> -> vector<16x64xf32>
    %c0_60 = arith.constant 0 : index
    %c0_61 = arith.constant 0 : index
    %183 = vector.load %arg14[%c0_60, %c0_61] : memref<1x64xf32, #tpu.memory_space<vmem>>, vector<1x64xf32>
    %184 = vector.broadcast %183 : vector<1x64xf32> to vector<16x64xf32>
    %185 = arith.addf %182, %184 : vector<16x64xf32>
    %cst_62 = arith.constant 0.000000e+00 : f32
    %186 = vector.broadcast %cst_62 : f32 to vector<16x64xf32>
    %187 = arith.maximumf %185, %186 : vector<16x64xf32>
    %c0_63 = arith.constant 0 : index
    %c0_64 = arith.constant 0 : index
    %188 = vector.load %arg15[%c0_63, %c0_64] : memref<64x32xbf16, #tpu.memory_space<vmem>>, vector<64x32xbf16>
    %189 = arith.truncf %187 : vector<16x64xf32> to vector<16x64xbf16>
    %cst_65 = arith.constant dense<0.000000e+00> : vector<16x32xf32>
    %190 = tpu.matmul %189, %188, %cst_65 {dimension_numbers = #tpu.dot_dimension_numbers<[1], [0], [0], [1], [0, 0, 1, 1], [], []>} : vector<16x64xbf16>, vector<64x32xbf16>, vector<16x32xf32> -> vector<16x32xf32>
    %191 = vector.extract_strided_slice %57 {offsets = [3, 0], sizes = [1, 32], strides = [1, 1]} : vector<4x32xf32> to vector<1x32xf32>
    %192 = vector.broadcast %191 : vector<1x32xf32> to vector<16x32xf32>
    %193 = arith.addf %190, %192 : vector<16x32xf32>
    %194 = arith.addf %179, %193 : vector<16x32xf32>
    %195 = vector.extract_strided_slice %55 {offsets = [2, 0], sizes = [1, 32], strides = [1, 1]} : vector<3x32xf32> to vector<1x32xf32>
    %196 = vector.extract_strided_slice %56 {offsets = [2, 0], sizes = [1, 32], strides = [1, 1]} : vector<3x32xf32> to vector<1x32xf32>
    %cst_66 = arith.constant dense<0.000000e+00> : vector<16xf32>
    %197 = vector.multi_reduction <add>, %194, %cst_66 [1] : vector<16x32xf32> to vector<16xf32>
    %198 = vector.shape_cast %197 : vector<16xf32> to vector<16x1xf32>
    %cst_67 = arith.constant 3.200000e+01 : f32
    %199 = vector.broadcast %cst_67 : f32 to vector<16x1xf32>
    %200 = arith.divf %198, %199 : vector<16x1xf32>
    %201 = vector.broadcast %200 : vector<16x1xf32> to vector<16x32xf32>
    %202 = arith.subf %194, %201 : vector<16x32xf32>
    %203 = arith.mulf %202, %202 : vector<16x32xf32>
    %cst_68 = arith.constant dense<0.000000e+00> : vector<16xf32>
    %204 = vector.multi_reduction <add>, %203, %cst_68 [1] : vector<16x32xf32> to vector<16xf32>
    %205 = vector.shape_cast %204 : vector<16xf32> to vector<16x1xf32>
    %cst_69 = arith.constant 3.200000e+01 : f32
    %206 = vector.broadcast %cst_69 : f32 to vector<16x1xf32>
    %207 = arith.divf %205, %206 : vector<16x1xf32>
    %208 = vector.broadcast %200 : vector<16x1xf32> to vector<16x32xf32>
    %209 = arith.subf %194, %208 : vector<16x32xf32>
    %cst_70 = arith.constant 9.99999974E-6 : f32
    %210 = vector.broadcast %cst_70 : f32 to vector<16x1xf32>
    %211 = arith.addf %207, %210 : vector<16x1xf32>
    %212 = math.rsqrt %211 : vector<16x1xf32>
    %213 = vector.broadcast %212 : vector<16x1xf32> to vector<16x32xf32>
    %214 = arith.mulf %209, %213 : vector<16x32xf32>
    %215 = vector.broadcast %195 : vector<1x32xf32> to vector<16x32xf32>
    %216 = arith.mulf %214, %215 : vector<16x32xf32>
    %217 = vector.broadcast %196 : vector<1x32xf32> to vector<16x32xf32>
    %218 = arith.addf %216, %217 : vector<16x32xf32>
    %219 = arith.truncf %218 : vector<16x32xf32> to vector<16x32xbf16>
    %c0_71 = arith.constant 0 : index
    %c0_72 = arith.constant 0 : index
    %220 = vector.load %arg19[%c0_71, %c0_72] : memref<32x128xbf16, #tpu.memory_space<vmem>>, vector<32x128xbf16>
    %cst_73 = arith.constant dense<0.000000e+00> : vector<16x128xf32>
    %221 = tpu.matmul %219, %220, %cst_73 {dimension_numbers = #tpu.dot_dimension_numbers<[1], [0], [0], [1], [0, 0, 1, 1], [], []>} : vector<16x32xbf16>, vector<32x128xbf16>, vector<16x128xf32> -> vector<16x128xf32>
    %c0_74 = arith.constant 0 : index
    %c0_75 = arith.constant 0 : index
    %222 = vector.load %arg20[%c0_74, %c0_75] : memref<1x128xf32, #tpu.memory_space<vmem>>, vector<1x128xf32>
    %223 = vector.broadcast %222 : vector<1x128xf32> to vector<16x128xf32>
    %224 = arith.addf %221, %223 : vector<16x128xf32>
    %225 = vector.shape_cast %224 : vector<16x128xf32> to vector<2x8x128xf32>
    %c0_76 = arith.constant 0 : index
    %c0_77 = arith.constant 0 : index
    %c0_78 = arith.constant 0 : index
    %226 = vector.load %arg21[%c0_76, %c0_77, %c0_78] : memref<2x8x128xf32, #tpu.memory_space<vmem>>, vector<2x8x128xf32>
    tpu.vector_store %arg21[%c0_76, %c0_77, %c0_78], %225 {strides = array<i32>} : memref<2x8x128xf32, #tpu.memory_space<vmem>>, vector<2x8x128xf32>,
    return
  }
  func.func @transform_0(%arg0: i32) -> (i32, i32, i32) {
    %c0_i32 = arith.constant 0 : i32
    %c0_i32_0 = arith.constant 0 : i32
    %c0_i32_1 = arith.constant 0 : i32
    return %arg0, %c0_i32, %c0_i32_0 : i32, i32, i32
  }
  func.func @transform_1(%arg0: i32) -> (i32, i32, i32) {
    %c0_i32 = arith.constant 0 : i32
    %c0_i32_0 = arith.constant 0 : i32
    %c0_i32_1 = arith.constant 0 : i32
    return %arg0, %c0_i32, %c0_i32_0 : i32, i32, i32
  }
  func.func @transform_2(%arg0: i32) -> (i32, i32, i32) {
    %c0_i32 = arith.constant 0 : i32
    %c0_i32_0 = arith.constant 0 : i32
    %c0_i32_1 = arith.constant 0 : i32
    return %arg0, %c0_i32, %c0_i32_0 : i32, i32, i32
  }
  func.func @transform_3(%arg0: i32) -> (i32, i32) {
    %c0_i32 = arith.constant 0 : i32
    %c0_i32_0 = arith.constant 0 : i32
    %c0_i32_1 = arith.constant 0 : i32
    return %c0_i32, %c0_i32_0 : i32, i32
  }
  func.func @transform_4(%arg0: i32) -> (i32, i32) {
    %c0_i32 = arith.constant 0 : i32
    %c0_i32_0 = arith.constant 0 : i32
    %c0_i32_1 = arith.constant 0 : i32
    return %c0_i32, %c0_i32_0 : i32, i32
  }
  func.func @transform_5(%arg0: i32) -> (i32, i32) {
    %c0_i32 = arith.constant 0 : i32
    %c0_i32_0 = arith.constant 0 : i32
    %c0_i32_1 = arith.constant 0 : i32
    return %c0_i32, %c0_i32_0 : i32, i32
  }
  func.func @transform_6(%arg0: i32) -> (i32, i32) {
    %c0_i32 = arith.constant 0 : i32
    %c0_i32_0 = arith.constant 0 : i32
    %c0_i32_1 = arith.constant 0 : i32
    return %c0_i32, %c0_i32_0 : i32, i32
  }
  func.func @transform_7(%arg0: i32) -> (i32, i32) {
    %c0_i32 = arith.constant 0 : i32
    %c0_i32_0 = arith.constant 0 : i32
    %c0_i32_1 = arith.constant 0 : i32
    return %c0_i32, %c0_i32_0 : i32, i32
  }
  func.func @transform_8(%arg0: i32) -> (i32, i32) {
    %c0_i32 = arith.constant 0 : i32
    %c0_i32_0 = arith.constant 0 : i32
    %c0_i32_1 = arith.constant 0 : i32
    return %c0_i32, %c0_i32_0 : i32, i32
  }
  func.func @transform_9(%arg0: i32) -> (i32, i32) {
    %c0_i32 = arith.constant 0 : i32
    %c0_i32_0 = arith.constant 0 : i32
    %c0_i32_1 = arith.constant 0 : i32
    return %c0_i32, %c0_i32_0 : i32, i32
  }
  func.func @transform_10(%arg0: i32) -> (i32, i32) {
    %c0_i32 = arith.constant 0 : i32
    %c0_i32_0 = arith.constant 0 : i32
    %c0_i32_1 = arith.constant 0 : i32
    return %c0_i32, %c0_i32_0 : i32, i32
  }
  func.func @transform_11(%arg0: i32) -> (i32, i32) {
    %c0_i32 = arith.constant 0 : i32
    %c0_i32_0 = arith.constant 0 : i32
    %c0_i32_1 = arith.constant 0 : i32
    return %c0_i32, %c0_i32_0 : i32, i32
  }
  func.func @transform_12(%arg0: i32) -> (i32, i32) {
    %c0_i32 = arith.constant 0 : i32
    %c0_i32_0 = arith.constant 0 : i32
    %c0_i32_1 = arith.constant 0 : i32
    return %c0_i32, %c0_i32_0 : i32, i32
  }
  func.func @transform_13(%arg0: i32) -> (i32, i32) {
    %c0_i32 = arith.constant 0 : i32
    %c0_i32_0 = arith.constant 0 : i32
    %c0_i32_1 = arith.constant 0 : i32
    return %c0_i32, %c0_i32_0 : i32, i32
  }
  func.func @transform_14(%arg0: i32) -> (i32, i32) {
    %c0_i32 = arith.constant 0 : i32
    %c0_i32_0 = arith.constant 0 : i32
    %c0_i32_1 = arith.constant 0 : i32
    return %c0_i32, %c0_i32_0 : i32, i32
  }
  func.func @transform_15(%arg0: i32) -> (i32, i32) {
    %c0_i32 = arith.constant 0 : i32
    %c0_i32_0 = arith.constant 0 : i32
    %c0_i32_1 = arith.constant 0 : i32
    return %c0_i32, %c0_i32_0 : i32, i32
  }
  func.func @transform_16(%arg0: i32) -> (i32, i32) {
    %c0_i32 = arith.constant 0 : i32
    %c0_i32_0 = arith.constant 0 : i32
    %c0_i32_1 = arith.constant 0 : i32
    return %c0_i32, %c0_i32_0 : i32, i32
  }
  func.func @transform_17(%arg0: i32) -> (i32, i32) {
    %c0_i32 = arith.constant 0 : i32
    %c0_i32_0 = arith.constant 0 : i32
    %c0_i32_1 = arith.constant 0 : i32
    return %c0_i32, %c0_i32_0 : i32, i32
  }
  func.func @transform_18(%arg0: i32) -> (i32, i32) {
    %c0_i32 = arith.constant 0 : i32
    %c0_i32_0 = arith.constant 0 : i32
    %c0_i32_1 = arith.constant 0 : i32
    return %c0_i32, %c0_i32_0 : i32, i32
  }
  func.func @transform_19(%arg0: i32) -> (i32, i32) {
    %c0_i32 = arith.constant 0 : i32
    %c0_i32_0 = arith.constant 0 : i32
    %c0_i32_1 = arith.constant 0 : i32
    return %c0_i32, %c0_i32_0 : i32, i32
  }
  func.func @transform_20(%arg0: i32) -> (i32, i32, i32) {
    %c0_i32 = arith.constant 0 : i32
    %c0_i32_0 = arith.constant 0 : i32
    %c0_i32_1 = arith.constant 0 : i32
    return %arg0, %c0_i32, %c0_i32_0 : i32, i32, i32
  }
}

</mosaic_0001>

<bundles_post_ra>
// kernel: tpu_custom_call.1
= control target key start
LH: loop header
LB: loop body
LE: loop exit
PB: predicated region body
PF: predicated region fallthrough
CT: control target
= control target key end

     0   :  { %s2653_s0 = inlined_call_operand.vmem [shape: bf16[2,4,256], index: 0, kind: input, shape index: {}]   ;;  %s2654_s1 = inlined_call_operand.vmem [shape: f32[2,8,32], index: 1, kind: input, shape index: {}]   ;;  %s2655_s2 = inlined_call_operand.hbm [shape: f32[2,1,8], index: 2, kind: input, shape index: {}]   ;;  %s2656_s3 = inlined_call_operand.vmem [shape: f32[8,8], index: 3, kind: input, shape index: {}]   ;;  %s2657_s4 = inlined_call_operand.vmem [shape: f32[32,4], index: 4, kind: input, shape index: {}]   ;;  %s2658_s5 = inlined_call_operand.vmem [shape: f32[32,1], index: 5, kind: input, shape index: {}]   ;;  %s2659_s6 = inlined_call_operand.vmem [shape: bf16[32,384], index: 6, kind: input, shape index: {}]   ;;  %s2660_s7 = inlined_call_operand.vmem [shape: f32[1,384], index: 7, kind: input, shape index: {}]   ;;  %s2661_s8 = inlined_call_operand.vmem [shape: bf16[128,32], index: 8, kind: input, shape index: {}]   ;;  %s2662_s9 = inlined_call_operand.vmem [shape: bf16[32,32], index: 9, kind: input, shape index: {}]   ;;  %s2663_s10 = inlined_call_operand.vmem [shape: bf16[32,32], index: 10, kind: input, shape index: {}]   ;;  %s2664_s11 = inlined_call_operand.vmem [shape: bf16[32,32], index: 11, kind: input, shape index: {}]   ;;  %s2665_s12 = inlined_call_operand.vmem [shape: bf16[32,64], index: 12, kind: input, shape index: {}]   ;;  %s2666_s13 = inlined_call_operand.vmem [shape: f32[1,64], index: 13, kind: input, shape index: {}]   ;;  %s2667_s14 = inlined_call_operand.vmem [shape: bf16[64,32], index: 14, kind: input, shape index: {}]   ;;  %s2668_s15 = inlined_call_operand.vmem [shape: f32[4,32], index: 15, kind: input, shape index: {}]   ;;  %s2669_s16 = inlined_call_operand.vmem [shape: f32[3,32], index: 16, kind: input, shape index: {}]   ;;  %s2670_s17 = inlined_call_operand.vmem [shape: f32[3,32], index: 17, kind: input, shape index: {}]   ;;  %s2671_s18 = inlined_call_operand.vmem [shape: bf16[32,128], index: 18, kind: input, shape index: {}]   ;;  %s2672_s19 = inlined_call_operand.vmem [shape: f32[1,128], index: 19, kind: input, shape index: {}]   ;;  %s2673_s20 = inlined_call_operand.hbm [shape: f32[2,8,128], index: 20, kind: output, shape index: {}]  }
   0x1   :  { %2682 = sst [smem:[#allocation10_spill]] %s2653_s0 }
   0x2   :  { %2683 = sst [smem:[#allocation11_spill]] %s2654_s1 }
   0x3   :  { %2684 = sst [smem:[#allocation12_spill]] %s2655_s2 }
   0x4   :  { %2685 = sst [smem:[#allocation13_spill]] %s2656_s3 }
   0x5   :  { %2686 = sst [smem:[#allocation14_spill]] %s2657_s4 }
   0x6   :  { %25 = vsyncpa [#allocation3], 0 }
   0x7   :  { %26 = vsyncpa [#allocation4], 0  ;;  %s2048_s1 = smov [#allocation2]  }
   0x8   :  { %s36_s22 = sshll.u32 %s2048_s1, 4  ;;  %s37_s22 = int_to_ptr.vmem [resolvable:$true] %s36_s22 }
   0x9   :  { %s2012_s23 = scalar_lea.vmem %s37_s22, 32  ;;  %p2017_p1 = scmp.lt.s32.totalorder %s37_s22, %s37_s22 }
   0xa   :  { %p2013_p0 = scmp.ne.s32.totalorder %s37_s22, %s2012_s23  ;;  %p2018_p2 = scmp.lt.s32.totalorder %s2012_s23, %s2012_s23 }
   0xc   :  { %p2019_p3 = por %p2018_p2, %p2017_p1 }
   0xe   :  { %p2020_p4 = pnand %p2019_p3, %p2013_p0 }
  0x10   :  { %2023 = shalt.err (!%p2020_p4)
}
  0x11   :  { %s2049_s24 = smov 16   ;;  %s2050_s2 = smov 1  }
  0x12   :  { %s2687_s26 = sld [smem:[#allocation12_spill]] }
  0x18   :  { %42 = dma.hbm_to_vmem [thread:$0]  %s2687_s26, 32, %s37_s22, [#allocation3], %s2049_s24, %s2049_s24, %s2050_s2  }
  0x19   :  { %2044 = dma.done.wait [#allocation3], 32  }
  0x1a   :  { %2045 = vsyncadd [#allocation3], 4294967264  ;;  %v2678_v0 = vmov 0   ;;  %v2676_v1 = vmov 0.0   ;;  %v1942_v2 = vld [vmem:[%s2659_s6 + $0x1c] ss:$12 sps:$4 sm:$0xff]   ;;  %v130_v11 = vlaneseq }
  0x1b   :  { %595 = vmatprep.mubr.bf16.mxu0 %v2678_v0  ;;  %1812 = vmatprep.subr.bf16.mxu1 %v2676_v1  ;;  %v1944_v3 = vld [vmem:[%s2659_s6 + $0x18] ss:$12 sps:$4 sm:$0xff]   ;;  %v1947_v5 = vld [vmem:[%s2659_s6] ss:$12 sps:$4 sm:$0xff]   ;;  %s2688_s24 = sld [smem:[#allocation11_spill]]  ;;  %vm559_vm0 = vcmask 261120  }
  0x1c   :  { %1929 = vset.pattern.permute.xlu1 %v2678_v0  ;;  %1928 = vset.pattern.permute.xlu0 %v2678_v0  ;;  %v1945_v4 = vld [vmem:[%s2659_s6 + $0x4] ss:$12 sps:$4 sm:$0xff]   ;;  %v1948_v8 = vld [vmem:[%s2659_s6 + $0x20] ss:$12 sps:$4 sm:$0xff]   ;;  %v1949_v10 = vld [vmem:[%s2659_s6 + $0x8] ss:$12 sps:$4 sm:$0xff]  }
  0x1d   :  { %575 = vmatprep.subr.bf16.mxu0 %v1942_v2  ;;  %1813 = vmatpush3.bf16.msra.mxu1 %v1948_v8  ;;  %vm2053_vm1 = vmmov 0   ;;  %v2213_v12 = vshrl.u32 %v130_v11, 7  ;;  %v510_v15 = vld [vmem:[%s2660_s7] sm:$0x7]  ;;  %vm763_vm2 = vcmask 1043456   ;;  %s2689_s30 = sld [smem:[#allocation13_spill]] }
  0x1e   :  { %576 = vmatpush1.bf16.msra.mxu0 %v1944_v3  ;;  %1814 = vmatprep.subr.bf16.mxu1 %v2676_v1  ;;  %v1724_v45 = vld [vmem:[#allocation2] ss:$0 sm:$0xff]  ;;  %v1725_v47 = vld [vmem:[#allocation2 + $0x1] ss:$0 sm:$0xff]  ;;  %vm733_vm3 = vcmask 64512   ;;  %s2692_s25 = sld [smem:[#allocation10_spill]] }
  0x1f   :  { %577 = vmatprep.subr.bf16.mxu0 %v1945_v4  ;;  %1816 = vmatprep.mubr.msk.bf16.mxu1 %vm2053_vm1, %v2676_v1  ;;  %v2216_v13 = vsub.s32 1, %v2213_v12  ;;  %v2219_v14 = vsub.s32 0, %v2213_v12  ;;  %v2233_v32 = vsub.s32 2, %v2213_v12  ;;  %vm1552_vm4 = vcmask 523264   ;;  %s2057_s23 = smov [#allocation5]  }
  0x21   :  { %v2187_v6 = vld [vmem:[%s2688_s24] sm:$0xff]  ;;  %v2192_v7 = vld [vmem:[%s2688_s24 + $0x8] sm:$0xff]  ;;  %1815 = vmatpush3.bf16.msra.mxu1 %v1949_v10  ;;  %v519_v16 = vrot.slane %v510_v15, %v2216_v13  ;;  %v515_v17 = vrot.slane %v510_v15, %v2219_v14  ;;  %v523_v33 = vrot.slane %v510_v15, %v2233_v32  ;;  %s2690_s24 = sld [smem:[#allocation14_spill]] }
  0x22   :  { %v501_v9 = vpack.c.bf16 %v2192_v7, %v2187_v6  ;;  %578 = vmatpush1.bf16.msra.mxu0 %v1947_v5  ;;  %1826 = vmatprep.subr.bf16.mxu1 %v2676_v1 }
  0x23   :  { %1820 = vmatprep.subr.bf16.mxu0 %v2676_v1  ;;  %v81_v44 = vld [vmem:[%s2689_s30] sm:$0xff] }
  0x24   :  { %1817 = vmatmul.mubr.msk.bf16.vlgmr.msra.gmra.mxu1 %vm559_vm0, %v501_v9  ;;  %v96_v46 = vadd.f32 %v1724_v45, %v81_v44  ;;  %v97_v50 = vadd.f32 %v1725_v47, %v81_v44 }
  0x25   :  { %1732 = vmatmul.mubr.msk.bf16.vlgmr.msra.gmra.mxu0 %vm559_vm0, %v501_v9  ;;  %1828 = vmatprep.mubr.msk.bf16.mxu1 %vm2053_vm1, %v2676_v1 }
  0x26   :  { %1822 = vmatprep.mubr.msk.bf16.mxu0 %vm2053_vm1, %v2676_v1 }
  0xe4   :  { %v640_v34 = vpop.f32.mrf.mxu1 }
  0xe5   :  { %v597_v18 = vpop.f32.mrf.mxu0  ;;  %v641_v35 = vadd.f32 %v640_v34, %v523_v33 }
  0xe6   :  { %v598_v21 = vadd.f32 %v597_v18, %v515_v17  ;;  %v1818_v36 = vpop.f32.mrf.mxu1  ;;  %v1950_v18 = vld [vmem:[%s2661_s8 + $0x38] sm:$0xff]  }
  0xe7   :  { %v599_v19 = vpop.f32.mrf.mxu0  ;;  %v758_v37 = vpack.c.bf16 %v641_v35, %v641_v35 }
  0xe8   :  { %v600_v20 = vadd.f32 %v599_v19, %v519_v16  ;;  %v647_v26 = vmul.f32 0.17677669, %v598_v21  ;;  %v643_v38 = vpop.f32.mrf.mxu1 }
  0xe9   :  { %v601_v22 = vpop.f32.mrf.mxu0  ;;  %v765_v39 = vsel %vm763_vm2, %v758_v37, 0  ;;  %v644_v40 = vadd.f32 %v643_v38, %v523_v33 }
  0xea   :  { %v651_v23 = vpack.c.bf16 %v600_v20, %v600_v20  ;;  %v602_v27 = vadd.f32 %v601_v22, %v515_v17  ;;  %v649_v29 = vpack.c.bf16 %v647_v26, %v647_v26  ;;  %v1819_v41 = vpop.f32.mrf.mxu1  ;;  %v1951_v22 = vld [vmem:[%s2661_s8 + $0x30] sm:$0xff]   ;;  %v1954_v26 = vld [vmem:[%s2661_s8 + $0x18] sm:$0xff]  }
  0xeb   :  { %v603_v24 = vpop.f32.mrf.mxu0  ;;  %v759_v42 = vpack.c.bf16 %v644_v40, %v644_v40  ;;  %v2286_v40 = vld [vmem:[%s2668_s15] sm:$0xf] }
  0xec   :  { %v604_v25 = vadd.f32 %v603_v24, %v519_v16  ;;  %1821 = vmatpush3.bf16.xpose.msra.mxu0 %v651_v23  ;;  %v648_v30 = vmul.f32 0.17677669, %v602_v27  ;;  %v1952_v24 = vld [vmem:[%s2661_s8 + $0x28] sm:$0xff]   ;;  %v1955_v27 = vld [vmem:[%s2661_s8 + $0x10] sm:$0xff]   ;;  %v873_v41 = vrot.slane %v2286_v40, %v2219_v14 }
  0xed   :  { %1832 = vmatprep.subr.bf16.mxu0 %v2676_v1  ;;  %v811_v43 = vsel %vm763_vm2, %v759_v42, 0 }
  0xee   :  { %v652_v28 = vpack.c.bf16 %v604_v25, %v604_v25  ;;  %v650_v31 = vpack.c.bf16 %v648_v30, %v648_v30  ;;  %v1953_v25 = vld [vmem:[%s2661_s8 + $0x20] sm:$0xff]  }
  0xf0   :  { %1827 = vmatpush3.bf16.xpose.msra.mxu1 %v652_v28  ;;  %v1956_v28 = vld [vmem:[%s2661_s8 + $0x8] sm:$0xff]  }
  0xf1   :  { %1838 = vmatprep.subr.bf16.mxu1 %v2676_v1 }
  0xf3   :  { %1823 = vmatmul.mubr.bf16.vlgmr.msra.gmra.mxu0 %v649_v29  ;;  %v1957_v29 = vld [vmem:[%s2661_s8] sm:$0xff]  }
  0xf4   :  { %1834 = vmatprep.mubr.msk.bf16.mxu0 %vm2053_vm1, %v2676_v1  ;;  %1833 = vmatpush3.bf16.msra.mxu0 %v765_v39 }
  0xf5   :  { %1844 = vmatprep.subr.bf16.mxu0 %v2676_v1 }
  0xf7   :  { %1829 = vmatmul.mubr.bf16.vlgmr.msra.gmra.mxu1 %v650_v31 }
  0xf8   :  { %1840 = vmatprep.mubr.msk.bf16.mxu1 %vm2053_vm1, %v2676_v1  ;;  %1839 = vmatpush3.bf16.msra.mxu1 %v811_v43 }
  0xf9   :  { %1864 = vmatprep.subr.bf16.mxu1 %v2676_v1 }
 0x1b3   :  { %v687_v48 = vpop.f32.mrf.mxu0 }
 0x1b4   :  { %v688_v49 = vadd.f32 %v687_v48, %v96_v46 }
 0x1b5   :  { %v1824_v51 = vpop.f32.mrf.mxu0 }
 0x1b6   :  { %v734_v52 = vsel %vm733_vm3, %v688_v49, -inf }
 0x1b7   :  { %v690_v53 = vpop.f32.mrf.mxu0  ;;  %v727_v54 = vpop.f32.mrf.mxu1  ;;  %735 = vmax.xlane.f32.xlu0 %v734_v52 }
 0x1b8   :  { %v728_v55 = vadd.f32 %v727_v54, %v97_v50 }
 0x1b9   :  { %v1825_v56 = vpop.f32.mrf.mxu0  ;;  %v1830_v57 = vpop.f32.mrf.mxu1 }
 0x1ba   :  { %v737_v58 = vsel %vm733_vm3, %v728_v55, -inf }
 0x1bb   :  { %v730_v59 = vpop.f32.mrf.mxu1  ;;  %738 = vmax.xlane.f32.xlu0 %v737_v58 }
 0x1bd   :  { %v1831_v60 = vpop.f32.mrf.mxu1 }
 0x240   :  { %v736_v61 = vpop.xlane.xlu0 %735 }
 0x241   :  { %v740_v62 = vsub.f32 %v688_v49, %v736_v61  ;;  %v1959_v61 = vld [vmem:[%s2662_s9] sm:$0xff]  }
 0x243   :  { %v742_v63 = vmul.f32 1.442695, %v740_v62  ;;  %v105_v62 = vld [vmem:[%s2690_s24 + $0x18] sm:$0xff] }
 0x244   :  { %v739_v2 = vpop.xlane.xlu0 %738 }
 0x245   :  { %1972 = vpow2.f32 %v742_v63  ;;  %v741_v3 = vsub.f32 %v728_v55, %v739_v2  ;;  %v104_v63 = vld [vmem:[%s2690_s24 + $0x10] sm:$0xff]  ;;  %v2054_v2 = vmov 1  }
 0x247   :  { %v744_v4 = vmul.f32 1.442695, %v741_v3  ;;  %v103_v3 = vld [vmem:[%s2690_s24 + $0x8] sm:$0xff] }
 0x249   :  { %1974 = vpow2.f32 %v744_v4  ;;  %v102_v4 = vld [vmem:[%s2690_s24] sm:$0xff] }
 0x252   :  { %v1973_v5 = vpop.eup %1972 }
 0x253   :  { %v746_v8 = vsel %vm733_vm3, %v1973_v5, 0.0 }
 0x254   :  { %747 = vadd.xlane.f32.xlu1 %v746_v8  ;;  %v2056_v8 = vmov 3  }
 0x256   :  { %v1975_v9 = vpop.eup %1974 }
 0x257   :  { %v749_v10 = vsel %vm733_vm3, %v1975_v9, 0.0 }
 0x258   :  { %750 = vadd.xlane.f32.xlu1 %v749_v10 }
 0x2dd   :  { %v748_v11 = vpop.xlane.xlu1 %747 }
 0x2de   :  { %1976 = vrcp.f32 %v748_v11 }
 0x2e1   :  { %v751_v15 = vpop.xlane.xlu1 %750 }
 0x2e2   :  { %1978 = vrcp.f32 %v751_v15 }
 0x2eb   :  { %v1977_v16 = vpop.eup %1976 }
 0x2ec   :  { %v754_v17 = vmul.f32 %v1977_v16, %v1973_v5  ;;  %v2055_v5 = vmov 2  }
 0x2ee   :  { %v756_v19 = vpack.c.bf16 %v754_v17, %v754_v17 }
 0x2ef   :  { %v1979_v20 = vpop.eup %1978 }
 0x2f0   :  { %1835 = vmatmul.mubr.msk.bf16.vlgmr.msra.gmra.mxu0 %vm733_vm3, %v756_v19  ;;  %v755_v21 = vmul.f32 %v1979_v20, %v1975_v9 }
 0x2f1   :  { %1845 = vmatpush3.bf16.msra.mxu0 %v1950_v18  ;;  %1860 = vmatprep.mubr.msk.bf16.mxu0 %vm2053_vm1, %v2676_v1  ;;  %v2322_v18 = vld [vmem:[%s2669_s16] sm:$0x7] }
 0x2f2   :  { %v757_v23 = vpack.c.bf16 %v755_v21, %v755_v21  ;;  %1846 = vmatprep.subr.bf16.mxu0 %v2676_v1  ;;  %v995_v21 = vrot.slane %v2322_v18, %v2219_v14 }
 0x2f4   :  { %1841 = vmatmul.mubr.msk.bf16.vlgmr.msra.gmra.mxu1 %vm733_vm3, %v757_v23 }
 0x2f5   :  { %1847 = vmatpush3.bf16.msra.mxu0 %v1951_v22  ;;  %1868 = vmatprep.mubr.msk.bf16.mxu1 %vm2053_vm1, %v2676_v1  ;;  %v2329_v22 = vld [vmem:[%s2670_s17] sm:$0x7] }
 0x2f6   :  { %1848 = vmatprep.subr.bf16.mxu0 %v2676_v1  ;;  %2691 = vst [vmem:[#allocation8_spill] sm:$0xff] %v2329_v22 }
 0x2f9   :  { %1849 = vmatpush3.bf16.msra.mxu0 %v1952_v24 }
 0x2fa   :  { %1850 = vmatprep.subr.bf16.mxu0 %v2676_v1 }
 0x2fd   :  { %1851 = vmatpush3.bf16.msra.mxu0 %v1953_v25 }
 0x2fe   :  { %1852 = vmatprep.subr.bf16.mxu0 %v2676_v1 }
 0x301   :  { %1853 = vmatpush3.bf16.msra.mxu0 %v1954_v26  ;;  %v1001_v26 = vrot.slane %v2329_v22, %v2219_v14 }
 0x302   :  { %1854 = vmatprep.subr.bf16.mxu0 %v2676_v1 }
 0x305   :  { %1855 = vmatpush3.bf16.msra.mxu0 %v1955_v27 }
 0x306   :  { %1856 = vmatprep.subr.bf16.mxu0 %v2676_v1 }
 0x309   :  { %1857 = vmatpush3.bf16.msra.mxu0 %v1956_v28  ;;  %v1960_v28 = vld [vmem:[%s2663_s10 + $0x8] sm:$0xff]  }
 0x30a   :  { %1858 = vmatprep.subr.bf16.mxu0 %v2676_v1 }
 0x30d   :  { %1859 = vmatpush3.bf16.msra.mxu0 %v1957_v29 }
 0x3b0   :  { %v801_v30 = vpop.f32.mrf.mxu0 }
 0x3b2   :  { %v1836_v31 = vpop.f32.mrf.mxu0 }
 0x3b4   :  { %v804_v33 = vpop.f32.mrf.mxu0  ;;  %v847_v34 = vpop.f32.mrf.mxu1 }
 0x3b5   :  { %v869_v35 = vpack.c.bf16 %v847_v34, %v801_v30  ;;  %v1093_v33 = vsel %vm559_vm0, %v1960_v28, 0  ;;  %v1961_v34 = vld [vmem:[%s2663_s10] sm:$0xff]   ;;  %s1712_s10 = sshll.u32 %s2057_s23, 4  ;;  %s1713_s10 = int_to_ptr.vmem [resolvable:$true] %s1712_s10 }
 0x3b6   :  { %v1837_v36 = vpop.f32.mrf.mxu0  ;;  %v1842_v37 = vpop.f32.mrf.mxu1  ;;  %s2024_s24 = scalar_lea.vmem %s1713_s10, 256  ;;  %p2029_p6 = scmp.lt.s32.totalorder %s1713_s10, %s1713_s10 }
 0x3b7   :  { %1861 = vmatmul.mubr.bf16.vlgmr.msra.gmra.mxu0 %v869_v35  ;;  %v1090_v35 = vsel %vm559_vm0, %v1961_v34, 0  ;;  %v436_v36 = vld [vmem:[%s2658_s5 + $0x10] sm:$0xff]  ;;  %v437_v37 = vld [vmem:[%s2658_s5 + $0x18] sm:$0xff]  ;;  %p2025_p5 = scmp.ne.s32.totalorder %s1713_s10, %s2024_s24  ;;  %p2030_p7 = scmp.lt.s32.totalorder %s2024_s24, %s2024_s24 }
 0x3b8   :  { %v850_v38 = vpop.f32.mrf.mxu1  ;;  %1217 = vmatprep.mubr.bf16.mxu0 %v2678_v0 }
 0x3b9   :  { %v434_v38 = vld [vmem:[%s2658_s5] sm:$0xff]  ;;  %p2031_p8 = por %p2030_p7, %p2029_p6 }
 0x3ba   :  { %v1843_v39 = vpop.f32.mrf.mxu1 }
 0x3bb   :  { %v435_v39 = vld [vmem:[%s2658_s5 + $0x8] sm:$0xff]  ;;  %p2032_p9 = pnand %p2031_p8, %p2025_p5 }
 0x477   :  { %v956_v42 = vpop.f32.mrf.mxu0 }
 0x478   :  { %v957_v43 = vadd.f32 %v956_v42, %v873_v41 }
 0x479   :  { %v1862_v44 = vpop.f32.mrf.mxu0 }
 0x47a   :  { %v963_v45 = vadd.f32 %v957_v43, %v2187_v6 }
 0x47b   :  { %v959_v46 = vpop.f32.mrf.mxu0 }
 0x47c   :  { %v960_v47 = vadd.f32 %v959_v46, %v873_v41  ;;  %v965_v48 = vsel %vm559_vm0, %v963_v45, 0.0  ;;  %v1769_v46 = vld [vmem:[%s2692_s25] sm:$0xff]  }
 0x47d   :  { %966 = vadd.xlane.f32.xlu0 %v965_v48  ;;  %v1863_v49 = vpop.f32.mrf.mxu0  ;;  %v2372_v48 = vunpack.c.h.bf16 %v1769_v46 }
 0x47e   :  { %v964_v50 = vadd.f32 %v960_v47, %v2192_v7  ;;  %v1958_v7 = vld [vmem:[%s2662_s9 + $0x8] sm:$0xff]   ;;  %v2370_v47 = vunpack.c.l.bf16 %v1769_v46  ;;  %v136_v49 = vsub.s32 4, %v2213_v12 }
 0x47f   :  { %1865 = vmatpush3.bf16.msra.mxu1 %v1958_v7 }
 0x480   :  { %v968_v51 = vsel %vm559_vm0, %v964_v50, 0.0  ;;  %1866 = vmatprep.subr.bf16.mxu1 %v2676_v1 }
 0x481   :  { %969 = vadd.xlane.f32.xlu1 %v968_v51  ;;  %v204_v51 = vsub.s32 5, %v2213_v12 }
 0x483   :  { %1867 = vmatpush3.bf16.msra.mxu1 %v1959_v61 }
 0x484   :  { %1872 = vmatprep.subr.bf16.mxu1 %v2676_v1 }
 0x506   :  { %v967_v52 = vpop.xlane.xlu0 %966 }
 0x507   :  { %v972_v53 = vmul.f32 0.03125, %v967_v52  ;;  %v133_v52 = vrot.slane %v2370_v47, %v2219_v14 }
 0x509   :  { %v974_v54 = vsub.f32 %v963_v45, %v972_v53  ;;  %v137_v53 = vrot.slane %v2370_v47, %v136_v49  ;;  %v2394_v7 = vrot.slane %v133_v52, %v2219_v14 }
 0x50a   :  { %v970_v55 = vpop.xlane.xlu1 %969 }
 0x50b   :  { %v973_v56 = vmul.f32 0.03125, %v970_v55  ;;  %v976_v57 = vmul.f32 %v974_v54, %v974_v54  ;;  %v201_v55 = vrot.slane %v2370_v47, %v2216_v13  ;;  %v2397_v61 = vrot.slane %v137_v53, %v2219_v14 }
 0x50d   :  { %v975_v58 = vsub.f32 %v964_v50, %v973_v56  ;;  %v978_v6 = vsel %vm559_vm0, %v976_v57, 0.0  ;;  %v145_v56 = vrot.slane %v2372_v48, %v136_v49  ;;  %v205_v57 = vrot.slane %v2370_v47, %v204_v51 }
 0x50e   :  { %979 = vadd.xlane.f32.xlu0 %v978_v6  ;;  %v213_v6 = vrot.slane %v2372_v48, %v204_v51 }
 0x50f   :  { %v977_v59 = vmul.f32 %v975_v58, %v975_v58 }
 0x511   :  { %v981_v60 = vsel %vm559_vm0, %v977_v59, 0.0 }
 0x512   :  { %982 = vadd.xlane.f32.xlu1 %v981_v60  ;;  %v288_v60 = vsub.s32 6, %v2213_v12 }
 0x523   :  { %125 = vperm.xlu1 %1929, %v105_v62  }
 0x524   :  { %120 = vperm.xlu0 %1928, %v104_v63  }
 0x527   :  { %1930 = vset.pattern.permute.xlu1 %v2054_v2 }
 0x528   :  { %1934 = vset.pattern.permute.xlu0 %v2054_v2  ;;  %191 = vperm.xlu1 %1930, %v104_v63  }
 0x529   :  { %187 = vperm.xlu0 %1934, %v103_v3  }
 0x52c   :  { %195 = vperm.xlu1 %1930, %v105_v62  }
 0x52d   :  { %1936 = vset.pattern.permute.xlu0 %v2055_v5 }
 0x52e   :  { %267 = vperm.xlu0 %1936, %v102_v4  }
 0x530   :  { %1931 = vset.pattern.permute.xlu1 %v2055_v5 }
 0x531   :  { %275 = vperm.xlu1 %1931, %v104_v63  }
 0x532   :  { %1939 = vset.pattern.permute.xlu0 %v2056_v8 }
 0x533   :  { %355 = vperm.xlu0 %1939, %v103_v3  }
 0x535   :  { %279 = vperm.xlu1 %1931, %v105_v62  }
 0x537   :  { %1941 = vset.pattern.permute.xlu0 %v2678_v0 }
 0x538   :  { %440 = vperm.xlu0 %1941, %v434_v38  }
 0x539   :  { %1932 = vset.pattern.permute.xlu1 %v2678_v0 }
 0x53a   :  { %110 = vperm.xlu1 %1932, %v102_v4  }
 0x53e   :  { %115 = vperm.xlu1 %1932, %v103_v3  }
 0x542   :  { %1933 = vset.pattern.permute.xlu1 %v2054_v2  ;;  %v2406_v2 = vrot.slane %v145_v56, %v2219_v14 }
 0x543   :  { %183 = vperm.xlu1 %1933, %v102_v4  }
 0x547   :  { %1935 = vset.pattern.permute.xlu1 %v2056_v8 }
 0x548   :  { %359 = vperm.xlu1 %1935, %v104_v63   ;;  %v2403_v63 = vrot.slane %v201_v55, %v2216_v13 }
 0x54c   :  { %363 = vperm.xlu1 %1935, %v105_v62  }
 0x550   :  { %1937 = vset.pattern.permute.xlu1 %v2055_v5  ;;  %v2415_v5 = vrot.slane %v213_v6, %v2216_v13 }
 0x551   :  { %271 = vperm.xlu1 %1937, %v103_v3   ;;  %v2409_v3 = vrot.slane %v205_v57, %v2216_v13 }
 0x555   :  { %1938 = vset.pattern.permute.xlu1 %v2056_v8  ;;  %v285_v8 = vrot.slane %v2370_v47, %v2233_v32 }
 0x556   :  { %351 = vperm.xlu1 %1938, %v102_v4  }
 0x557   :  { %v2439_v28 = vrot.slane %v285_v8, %v2233_v32 }
 0x55a   :  { %1940 = vset.pattern.permute.xlu1 %v2678_v0 }
 0x55b   :  { %450 = vperm.xlu1 %1940, %v436_v36  }
 0x55f   :  { %455 = vperm.xlu1 %1940, %v437_v37  }
 0x563   :  { %445 = vperm.xlu1 %1940, %v435_v39  }
 0x597   :  { %v980_v9 = vpop.xlane.xlu0 %979 }
 0x598   :  { %v984_v10 = vmul.f32 0.03125, %v980_v9 }
 0x59a   :  { %v986_v11 = vadd.f32 1e-05, %v984_v10  ;;  %v289_v10 = vrot.slane %v2370_v47, %v288_v60 }
 0x59b   :  { %v983_v15 = vpop.xlane.xlu1 %982 }
 0x59c   :  { %1980 = vrsqrt.f32 %v986_v11  ;;  %v985_v16 = vmul.f32 0.03125, %v983_v15  ;;  %v293_v11 = vrot.slane %v2372_v48, %v2233_v32  ;;  %v2424_v15 = vsub.s32 3, %v2213_v12 }
 0x59d   :  { %v2444_v34 = vrot.slane %v289_v10, %v2233_v32 }
 0x59e   :  { %v987_v17 = vadd.f32 1e-05, %v985_v16  ;;  %2693 = vst [vmem:[#allocation9_spill] sm:$0xff] %v2424_v15  ;;  %v369_v51 = vrot.slane %v2370_v47, %v2424_v15 }
 0x59f   :  { %v126_v41 = vpop.permute.xlu1 %125  ;;  %v121_v9 = vpop.permute.xlu0 %120 }
 0x5a0   :  { %1982 = vrsqrt.f32 %v987_v17  ;;  %v172_v16 = vmul.f32 %v2394_v7, %v126_v41  ;;  %v173_v17 = vmul.f32 %v2397_v61, %v126_v41  ;;  %v170_v6 = vmul.f32 %v2394_v7, %v121_v9 }
 0x5a1   :  { %v179_v8 = vmul.f32 %v2406_v2, %v121_v9 }
 0x5a3   :  { %v192_v42 = vpop.permute.xlu1 %191 }
 0x5a4   :  { %v239_v37 = vmul.f32 %v2409_v3, %v192_v42  ;;  %v247_v39 = vmul.f32 %v2415_v5, %v192_v42 }
 0x5a7   :  { %v196_v43 = vpop.permute.xlu1 %195 }
 0x5a9   :  { %v1981_v19 = vpop.eup %1980 }
 0x5aa   :  { %v990_v20 = vmul.f32 %v1981_v19, %v974_v54  ;;  %v141_v54 = vrot.slane %v2372_v48, %v2219_v14 }
 0x5ac   :  { %v996_v25 = vmul.f32 %v995_v21, %v990_v20  ;;  %v2363_v44 = vpop.permute.xlu1 %275  ;;  %v2400_v62 = vrot.slane %v141_v54, %v2219_v14  ;;  %v297_v14 = vrot.slane %v2372_v48, %v288_v60  ;;  %v240_v20 = vmul.f32 %v2403_v63, %v196_v43 }
 0x5ad   :  { %v1983_v23 = vpop.eup %1982  ;;  %v377_v54 = vrot.slane %v2372_v48, %v2424_v15  ;;  %v171_v60 = vmul.f32 %v2397_v61, %v121_v9  ;;  %v323_v10 = vmul.f32 %v2444_v34, %v2363_v44 }
 0x5ae   :  { %v991_v24 = vmul.f32 %v1983_v23, %v975_v58  ;;  %v2336_v29 = vadd.f32 %v1001_v26, %v996_v25  ;;  %v209_v58 = vrot.slane %v2372_v48, %v2216_v13  ;;  %v180_v19 = vmul.f32 %v2400_v62, %v126_v41 }
 0x5af   :  { %v181_v23 = vmul.f32 %v2406_v2, %v126_v41  ;;  %v2450_v36 = vrot.slane %v297_v14, %v2233_v32  ;;  %v256_v41 = vadd.f32 %v240_v20, %v172_v16  ;;  %v2484_v14 = vrot.slane %v369_v51, %v2424_v15 }
 0x5b0   :  { %v997_v27 = vmul.f32 %v995_v21, %v991_v24  ;;  %v2365_v45 = vpop.permute.xlu1 %279  ;;  %v2412_v4 = vrot.slane %v209_v58, %v2216_v13  ;;  %v241_v24 = vmul.f32 %v2409_v3, %v196_v43 }
 0x5b1   :  { %v324_v52 = vmul.f32 %v2439_v28, %v2365_v45  ;;  %v333_v58 = vmul.f32 %v2450_v36, %v2365_v45 }
 0x5b2   :  { %v2338_v30 = vadd.f32 %v1001_v26, %v997_v27  ;;  %v248_v25 = vmul.f32 %v2412_v4, %v196_v43  ;;  %v249_v26 = vmul.f32 %v2415_v5, %v196_v43  ;;  %v2436_v27 = vrot.slane %v2286_v40, %v2216_v13  ;;  %v188_v43 = vpop.permute.xlu0 %187 }
 0x5b3   :  { %v246_v38 = vmul.f32 %v2412_v4, %v192_v42  ;;  %v2486_v16 = vadd.f32 %v324_v52, %v256_v41  ;;  %v255_v41 = vadd.f32 %v239_v37, %v171_v60  ;;  %v263_v52 = vadd.f32 %v247_v39, %v179_v8 }
 0x5b4   :  { %v1004_v31 = vpack.c.bf16 %v2338_v30, %v2336_v29  ;;  %v264_v46 = vadd.f32 %v248_v25, %v180_v19  ;;  %v265_v49 = vadd.f32 %v249_v26, %v181_v23  ;;  %v2492_v19 = vrot.slane %v377_v54, %v2424_v15 }
 0x5b5   :  { %v2375_v50 = vpop.permute.xlu1 %110  ;;  %v237_v54 = vmul.f32 %v2409_v3, %v188_v43  ;;  %v245_v37 = vmul.f32 %v2415_v5, %v188_v43  ;;  %v339_v8 = vadd.f32 %v323_v10, %v255_v41 }
 0x5b6   :  { %1869 = vmatmul.mubr.msk.bf16.vlgmr.msra.gmra.mxu1 %vm559_vm0, %v1004_v31  ;;  %v372_v31 = vsub.s32 7, %v2213_v12  ;;  %v257_v12 = vadd.f32 %v241_v24, %v173_v17  ;;  %v268_v20 = vpop.permute.xlu0 %267  ;;  %v166_v26 = vmul.f32 %v2394_v7, %v2375_v50 }
 0x5b7   :  { %1873 = vmatpush3.bf16.xpose.msra.mxu1 %v1093_v33  ;;  %1876 = vmatprep.mubr.msk.bf16.mxu1 %vm2053_vm1, %v2676_v1  ;;  %v238_v33 = vmul.f32 %v2403_v63, %v192_v42  ;;  %v325_v42 = vmul.f32 %v2444_v34, %v2365_v45 }
 0x5b8   :  { %1874 = vmatprep.subr.bf16.mxu1 %v2676_v1  ;;  %v373_v53 = vrot.slane %v2370_v47, %v372_v31  ;;  %v381_v55 = vrot.slane %v2372_v48, %v372_v31  ;;  %v322_v47 = vmul.f32 %v2439_v28, %v2363_v44  ;;  %v178_v48 = vmul.f32 %v2400_v62, %v121_v9 }
 0x5b9   :  { %v2390_v59 = vpop.permute.xlu1 %115  ;;  %v2497_v23 = vadd.f32 %v325_v42, %v257_v12  ;;  %v254_v25 = vadd.f32 %v238_v33, %v170_v6  ;;  %v174_v12 = vmul.f32 %v2400_v62, %v2375_v50 }
 0x5ba   :  { %v2489_v17 = vrot.slane %v373_v53, %v2424_v15  ;;  %v2495_v9 = vrot.slane %v381_v55, %v2424_v15  ;;  %v262_v51 = vadd.f32 %v246_v38, %v178_v48  ;;  %v167_v53 = vmul.f32 %v2397_v61, %v2375_v50  ;;  %v356_v60 = vpop.permute.xlu0 %355 }
 0x5bb   :  { %v244_v55 = vmul.f32 %v2412_v4, %v188_v43  ;;  %v338_v6 = vadd.f32 %v322_v47, %v254_v25  ;;  %v168_v48 = vmul.f32 %v2394_v7, %v2390_v59  ;;  %v404_v15 = vmul.f32 %v2484_v14, %v356_v60 }
 0x5bc   :  { %v413_v22 = vmul.f32 %v2495_v9, %v356_v60 }
 0x5be   :  { %v184_v21 = vpop.permute.xlu1 %183 }
 0x5bf   :  { %1875 = vmatpush3.bf16.xpose.msra.mxu1 %v1090_v35  ;;  %v2447_v35 = vrot.slane %v293_v11, %v2233_v32  ;;  %v234_v33 = vmul.f32 %v2403_v63, %v184_v21  ;;  %v235_v38 = vmul.f32 %v2409_v3, %v184_v21  ;;  %v242_v39 = vmul.f32 %v2412_v4, %v184_v21 }
 0x5c0   :  { %v243_v42 = vmul.f32 %v2415_v5, %v184_v21  ;;  %v169_v3 = vmul.f32 %v2397_v61, %v2390_v59  ;;  %v176_v4 = vmul.f32 %v2400_v62, %v2390_v59  ;;  %v177_v5 = vmul.f32 %v2406_v2, %v2390_v59 }
 0x5c1   :  { %v332_v57 = vmul.f32 %v2447_v35, %v2365_v45  ;;  %v330_v11 = vmul.f32 %v2447_v35, %v2363_v44  ;;  %v331_v45 = vmul.f32 %v2450_v36, %v2363_v44  ;;  %v2501_v44 = vadd.f32 %v333_v58, %v265_v49 }
 0x5c2   :  { %v236_v49 = vmul.f32 %v2403_v63, %v188_v43  ;;  %v326_v58 = vmul.f32 %v2447_v35, %v268_v20  ;;  %v327_v63 = vmul.f32 %v2450_v36, %v268_v20  ;;  %v250_v21 = vadd.f32 %v234_v33, %v166_v26 }
 0x5c3   :  { %v2463_v56 = vpop.permute.xlu1 %359  ;;  %v2499_v24 = vadd.f32 %v332_v57, %v264_v46  ;;  %v175_v46 = vmul.f32 %v2406_v2, %v2375_v50  ;;  %v318_v57 = vmul.f32 %v2439_v28, %v268_v20  ;;  %v319_v50 = vmul.f32 %v2444_v34, %v268_v20 }
 0x5c4   :  { %v346_v1 = vadd.f32 %v330_v11, %v262_v51  ;;  %v347_v0 = vadd.f32 %v331_v45, %v263_v52  ;;  %v251_v20 = vadd.f32 %v235_v38, %v167_v53  ;;  %v258_v47 = vadd.f32 %v242_v39, %v174_v12 }
 0x5c5   :  { %v259_v25 = vadd.f32 %v243_v42, %v175_v46  ;;  %v406_v7 = vmul.f32 %v2484_v14, %v2463_v56  ;;  %v405_v61 = vmul.f32 %v2489_v17, %v356_v60  ;;  %v412_v62 = vmul.f32 %v2492_v19, %v356_v60 }
 0x5c6   :  { %v252_v59 = vadd.f32 %v236_v49, %v168_v48  ;;  %v253_v2 = vadd.f32 %v237_v54, %v169_v3  ;;  %v260_v26 = vadd.f32 %v244_v55, %v176_v4  ;;  %v261_v10 = vadd.f32 %v245_v37, %v177_v5 }
 0x5c7   :  { %v2505_v31 = vpop.permute.xlu1 %363  ;;  %v407_v11 = vmul.f32 %v2489_v17, %v2463_v56  ;;  %v414_v45 = vmul.f32 %v2492_v19, %v2463_v56  ;;  %v415_v41 = vmul.f32 %v2495_v9, %v2463_v56  ;;  %v334_v51 = vadd.f32 %v318_v57, %v250_v21 }
 0x5c8   :  { %v335_v53 = vadd.f32 %v319_v50, %v251_v20  ;;  %v342_v12 = vadd.f32 %v326_v58, %v258_v47  ;;  %v343_v46 = vadd.f32 %v327_v63, %v259_v25  ;;  %v408_v49 = vmul.f32 %v2484_v14, %v2505_v31 }
 0x5c9   :  { %v409_v33 = vmul.f32 %v2489_v17, %v2505_v31  ;;  %v416_v54 = vmul.f32 %v2492_v19, %v2505_v31  ;;  %v422_v37 = vadd.f32 %v406_v7, %v338_v6  ;;  %v423_v63 = vadd.f32 %v407_v11, %v339_v8 }
 0x5ca   :  { %v417_v6 = vmul.f32 %v2495_v9, %v2505_v31 }
 0x5cc   :  { %v272_v43 = vpop.permute.xlu1 %271 }
 0x5cd   :  { %v320_v52 = vmul.f32 %v2439_v28, %v272_v43  ;;  %v321_v56 = vmul.f32 %v2444_v34, %v272_v43  ;;  %v328_v39 = vmul.f32 %v2447_v35, %v272_v43  ;;  %v329_v28 = vmul.f32 %v2450_v36, %v272_v43 }
 0x5ce   :  { %v430_v34 = vadd.f32 %v414_v45, %v346_v1  ;;  %v431_v35 = vadd.f32 %v415_v41, %v347_v0  ;;  %v424_v36 = vadd.f32 %v408_v49, %v2486_v16  ;;  %v433_v16 = vadd.f32 %v417_v6, %v2501_v44  ;;  %v441_v45 = vpop.permute.xlu0 %440 }
 0x5cf   :  { %v336_v3 = vadd.f32 %v320_v52, %v252_v59  ;;  %v337_v5 = vadd.f32 %v321_v56, %v253_v2  ;;  %v344_v21 = vadd.f32 %v328_v39, %v260_v26  ;;  %v345_v43 = vadd.f32 %v329_v28, %v261_v10 }
 0x5d1   :  { %v352_v55 = vpop.permute.xlu1 %351  ;;  %v420_v7 = vadd.f32 %v404_v15, %v336_v3  ;;  %v421_v26 = vadd.f32 %v405_v61, %v337_v5  ;;  %v428_v10 = vadd.f32 %v412_v62, %v344_v21  ;;  %v429_v41 = vadd.f32 %v413_v22, %v345_v43 }
 0x5d2   :  { %v402_v42 = vmul.f32 %v2484_v14, %v352_v55  ;;  %v403_v57 = vmul.f32 %v2489_v17, %v352_v55  ;;  %v410_v50 = vmul.f32 %v2492_v19, %v352_v55  ;;  %v411_v58 = vmul.f32 %v2495_v9, %v352_v55 }
 0x5d3   :  { %v425_v14 = vadd.f32 %v409_v33, %v2497_v23  ;;  %v432_v17 = vadd.f32 %v416_v54, %v2499_v24  ;;  %v2694_v22 = vmov 0  }
 0x5d4   :  { %v418_v19 = vadd.f32 %v402_v42, %v334_v51  ;;  %v419_v47 = vadd.f32 %v403_v57, %v335_v53  ;;  %v426_v25 = vadd.f32 %v410_v50, %v342_v12  ;;  %v427_v9 = vadd.f32 %v411_v58, %v343_v46 }
 0x5d6   :  { %v451_v20 = vpop.permute.xlu1 %450  ;;  %v458_v2 = vadd.f32 %v441_v45, %v418_v19  ;;  %v459_v52 = vadd.f32 %v441_v45, %v419_v47  ;;  %v466_v53 = vadd.f32 %v441_v45, %v426_v25  ;;  %v467_v12 = vadd.f32 %v441_v45, %v427_v9 }
 0x5d7   :  { %v462_v0 = vadd.f32 %v451_v20, %v422_v37  ;;  %v463_v59 = vadd.f32 %v451_v20, %v423_v63  ;;  %v470_v24 = vadd.f32 %v451_v20, %v430_v34  ;;  %v471_v11 = vadd.f32 %v451_v20, %v431_v35 }
 0x5d8   :  { %v474_v39 = vmax.f32 %v458_v2, 0.0  ;;  %v482_v28 = vmax.f32 %v466_v53, 0.0  ;;  %v475_v57 = vmax.f32 %v459_v52, 0.0  ;;  %v483_v50 = vmax.f32 %v467_v12, 0.0 }
 0x5d9   :  { %v478_v15 = vmax.f32 %v462_v0, 0.0  ;;  %v486_v44 = vmax.f32 %v470_v24, 0.0  ;;  %v479_v55 = vmax.f32 %v463_v59, 0.0  ;;  %v487_v37 = vmax.f32 %v471_v11, 0.0 }
 0x5da   :  { %v456_v51 = vpop.permute.xlu1 %455 }
 0x5db   :  { %v464_v46 = vadd.f32 %v456_v51, %v424_v36  ;;  %v465_v49 = vadd.f32 %v456_v51, %v425_v14  ;;  %v472_v33 = vadd.f32 %v456_v51, %v432_v17  ;;  %v473_v54 = vadd.f32 %v456_v51, %v433_v16 }
 0x5dd   :  { %v488_v56 = vmax.f32 %v472_v33, 0.0  ;;  %v481_v61 = vmax.f32 %v465_v49, 0.0  ;;  %v489_v62 = vmax.f32 %v473_v54, 0.0 }
 0x5de   :  { %v446_v42 = vpop.permute.xlu1 %445 }
 0x5df   :  { %v460_v58 = vadd.f32 %v446_v42, %v420_v7  ;;  %v461_v63 = vadd.f32 %v446_v42, %v421_v26  ;;  %v493_v6 = vpack.c.bf16 %v481_v61, %v479_v55  ;;  %v497_v34 = vpack.c.bf16 %v489_v62, %v487_v37 }
 0x5e0   :  { %v496_v35 = vpack.c.bf16 %v488_v56, %v486_v44 }
 0x5e1   :  { %v476_v36 = vmax.f32 %v460_v58, 0.0  ;;  %v477_v17 = vmax.f32 %v461_v63, 0.0  ;;  %1153 = vmatprep.subr.bf16.mxu1 %v493_v6  ;;  %1197 = vmatprep.subr.bf16.mxu0 %v497_v34 }
 0x5e2   :  { %1198 = vmatpush1.bf16.msra.mxu0 %v496_v35 }
 0x5e3   :  { %v491_v19 = vpack.c.bf16 %v477_v17, %v475_v57  ;;  %v490_v21 = vpack.c.bf16 %v476_v36, %v474_v39 }
 0x676   :  { %v1062_v38 = vpop.f32.mrf.mxu1 }
 0x677   :  { %v1063_v60 = vadd.f32 %v1062_v38, %v2436_v27  ;;  %v480_v38 = vmax.f32 %v464_v46, 0.0 }
 0x678   :  { %v1870_v48 = vpop.f32.mrf.mxu1 }
 0x679   :  { %v1069_v1 = vmul.f32 0.17677669, %v1063_v60  ;;  %v468_v60 = vadd.f32 %v446_v42, %v428_v10  ;;  %v469_v48 = vadd.f32 %v446_v42, %v429_v41  ;;  %v492_v3 = vpack.c.bf16 %v480_v38, %v478_v15 }
 0x67a   :  { %v1065_v4 = vpop.f32.mrf.mxu1 }
 0x67b   :  { %v1066_v8 = vadd.f32 %v1065_v4, %v2436_v27  ;;  %v484_v14 = vmax.f32 %v468_v60, 0.0  ;;  %v485_v4 = vmax.f32 %v469_v48, 0.0  ;;  %v1962_v48 = vld [vmem:[%s2664_s11 + $0x8] sm:$0xff]  }
 0x67c   :  { %v1871_v31 = vpop.f32.mrf.mxu1 }
 0x67d   :  { %v1070_v23 = vmul.f32 0.17677669, %v1066_v8  ;;  %v495_v5 = vpack.c.bf16 %v485_v4, %v483_v50  ;;  %v494_v43 = vpack.c.bf16 %v484_v14, %v482_v28  ;;  %v2695_v31 = vmov 0.0  }
 0x67f   :  { %v1075_v27 = vpack.c.bf16 %v1070_v23, %v1069_v1  ;;  %1199 = vmatprep.subr.bf16.mxu0 %v495_v5 }
 0x680   :  { %1200 = vmatpush1.bf16.msra.mxu0 %v494_v43 }
 0x681   :  { %1877 = vmatmul.mubr.msk.bf16.vlgmr.msra.gmra.mxu1 %vm559_vm0, %v1075_v27  ;;  %1312 = vmatprep.subr.bf16.mxu0 %v497_v34 }
 0x682   :  { %1173 = vmatprep.mubr.bf16.mxu1 %v2694_v22  ;;  %1154 = vmatpush1.bf16.msra.mxu1 %v492_v3 }
 0x683   :  { %1155 = vmatprep.subr.bf16.mxu1 %v491_v19 }
 0x686   :  { %1156 = vmatpush1.bf16.msra.mxu1 %v490_v21 }
 0x687   :  { %1272 = vmatprep.subr.bf16.mxu1 %v493_v6  ;;  %v1963_v6 = vld [vmem:[%s2664_s11] sm:$0xff]  }
 0x741   :  { %v1129_v8 = vpop.f32.mrf.mxu1 }
 0x742   :  { %v1136_v20 = vpack.c.bf16 %v1129_v8, %v1129_v8 }
 0x743   :  { %v1878_v47 = vpop.f32.mrf.mxu1 }
 0x744   :  { %1750 = vmatmul.mubr.msk.bf16.vlgmr.msra.gmra.mxu1 %vm559_vm0, %v1136_v20 }
 0x745   :  { %1273 = vmatpush1.bf16.xpose.msra.mxu1 %v492_v3  ;;  %v1132_v25 = vpop.f32.mrf.mxu1 }
 0x746   :  { %v1137_v9 = vpack.c.bf16 %v1132_v25, %v1132_v25  ;;  %1274 = vmatprep.subr.bf16.mxu1 %v491_v19 }
 0x747   :  { %v1879_v1 = vpop.f32.mrf.mxu1 }
 0x748   :  { %1751 = vmatmul.mubr.msk.bf16.vlgmr.msra.gmra.mxu0 %vm559_vm0, %v1137_v9 }
 0x749   :  { %1313 = vmatpush1.bf16.xpose.msra.mxu0 %v496_v35 }
 0x74a   :  { %1314 = vmatprep.subr.bf16.mxu0 %v495_v5 }
 0x74d   :  { %1275 = vmatpush1.bf16.xpose.msra.mxu1 %v490_v21  ;;  %v1348_v21 = vrot.slane %v2286_v40, %v2233_v32 }
 0x74e   :  { %1880 = vmatprep.subr.bf16.mxu1 %v2695_v31 }
 0x751   :  { %1315 = vmatpush1.bf16.xpose.msra.mxu0 %v494_v43 }
 0x752   :  { %1888 = vmatprep.subr.bf16.mxu0 %v2695_v31 }
 0x804   :  { %v1175_v0 = vpop.f32.mrf.mxu1 }
 0x806   :  { %v1177_v16 = vpop.f32.mrf.mxu1 }
 0x807   :  { %v1226_v7 = vmax.f32 %v1175_v0, %v1177_v16 }
 0x808   :  { %v1179_v23 = vpop.f32.mrf.mxu1  ;;  %v1219_v59 = vpop.f32.mrf.mxu0 }
 0x809   :  { %1227 = vmax.xlane.f32.xlu1 %v1226_v7 }
 0x80a   :  { %v1180_v24 = vpop.f32.mrf.mxu1  ;;  %v1221_v11 = vpop.f32.mrf.mxu0 }
 0x80b   :  { %v1229_v45 = vmax.f32 %v1219_v59, %v1221_v11 }
 0x80c   :  { %v1223_v2 = vpop.f32.mrf.mxu0 }
 0x80d   :  { %1230 = vmax.xlane.f32.xlu0 %v1229_v45 }
 0x80e   :  { %v1224_v26 = vpop.f32.mrf.mxu0 }
 0x892   :  { %v1228_v10 = vpop.xlane.xlu1 %1227 }
 0x893   :  { %v1232_v41 = vsub.f32 %v1175_v0, %v1228_v10  ;;  %v1233_v27 = vsub.f32 %v1177_v16, %v1228_v10 }
 0x895   :  { %v1236_v51 = vmul.f32 1.442695, %v1232_v41  ;;  %v1238_v52 = vmul.f32 1.442695, %v1233_v27  ;;  %v1965_v27 = vld [vmem:[%s2665_s12] sm:$0xff]  }
 0x896   :  { %v1231_v53 = vpop.xlane.xlu0 %1230 }
 0x897   :  { %1984 = vpow2.f32 %v1236_v51  ;;  %v1234_v12 = vsub.f32 %v1219_v59, %v1231_v53  ;;  %v1235_v46 = vsub.f32 %v1221_v11, %v1231_v53  ;;  %v1966_v51 = vld [vmem:[%s2667_s14 + $0x18] sm:$0xff]  }
 0x898   :  { %1986 = vpow2.f32 %v1238_v52 }
 0x899   :  { %v1240_v49 = vmul.f32 1.442695, %v1234_v12  ;;  %v1242_v33 = vmul.f32 1.442695, %v1235_v46 }
 0x89b   :  { %1988 = vpow2.f32 %v1240_v49 }
 0x89c   :  { %1990 = vpow2.f32 %v1242_v33 }
 0x8a4   :  { %v1985_v54 = vpop.eup %1984 }
 0x8a5   :  { %v1987_v15 = vpop.eup %1986 }
 0x8a6   :  { %v1244_v44 = vadd.f32 %v1987_v15, %v1985_v54 }
 0x8a8   :  { %v1989_v55 = vpop.eup %1988  ;;  %1245 = vadd.xlane.f32.xlu0 %v1244_v44  ;;  %v1436_v44 = vrot.slane %v2322_v18, %v2216_v13 }
 0x8a9   :  { %v1991_v37 = vpop.eup %1990 }
 0x8aa   :  { %v1247_v38 = vadd.f32 %v1991_v37, %v1989_v55 }
 0x8ac   :  { %1248 = vadd.xlane.f32.xlu1 %v1247_v38 }
 0x931   :  { %v1246_v56 = vpop.xlane.xlu0 %1245 }
 0x932   :  { %1992 = vrcp.f32 %v1246_v56  ;;  %v2696_v56 = vld [vmem:[#allocation8_spill] sm:$0xff] }
 0x935   :  { %v1249_v61 = vpop.xlane.xlu1 %1248 }
 0x936   :  { %1994 = vrcp.f32 %v1249_v61  ;;  %v1442_v61 = vrot.slane %v2696_v56, %v2216_v13  ;;  %v1968_v13 = vld [vmem:[%s2667_s14 + $0x8] sm:$0xff]  }
 0x93f   :  { %v1993_v62 = vpop.eup %1992 }
 0x940   :  { %v1253_v22 = vmul.f32 %v1993_v62, %v1987_v15  ;;  %v1252_v39 = vmul.f32 %v1993_v62, %v1985_v54 }
 0x942   :  { %v1257_v28 = vpack.c.bf16 %v1253_v22, %v1253_v22  ;;  %v1256_v42 = vpack.c.bf16 %v1252_v39, %v1252_v39 }
 0x943   :  { %v1995_v57 = vpop.eup %1994 }
 0x944   :  { %1292 = vmatprep.mubr.bf16.mxu1 %v1257_v28  ;;  %v1255_v50 = vmul.f32 %v1995_v57, %v1991_v37  ;;  %v1254_v58 = vmul.f32 %v1995_v57, %v1989_v55  ;;  %v1969_v57 = vld [vmem:[%s2667_s14] sm:$0xff]  }
 0x945   :  { %1293 = vmatmul.mubr.bf16.vlgmr.msra.gmra.mxu1 %v1256_v42  ;;  %v1967_v42 = vld [vmem:[%s2667_s14 + $0x10] sm:$0xff]  }
 0x946   :  { %v1259_v63 = vpack.c.bf16 %v1255_v50, %v1255_v50  ;;  %v1258_v60 = vpack.c.bf16 %v1254_v58, %v1254_v58  ;;  %1884 = vmatprep.mubr.msk.bf16.mxu1 %vm2053_vm1, %v2695_v31  ;;  %1881 = vmatpush3.bf16.msra.mxu1 %v1962_v48  ;;  %v1755_v50 = vld [vmem:[%s2666_s13] ss:$0 sm:$0xff] }
 0x947   :  { %1882 = vmatprep.subr.bf16.mxu1 %v2695_v31 }
 0x948   :  { %1332 = vmatprep.mubr.bf16.mxu0 %v1259_v63 }
 0x949   :  { %1333 = vmatmul.mubr.bf16.vlgmr.msra.gmra.mxu0 %v1258_v60 }
 0x94a   :  { %1892 = vmatprep.mubr.msk.bf16.mxu0 %vm2053_vm1, %v2695_v31  ;;  %1883 = vmatpush3.bf16.msra.mxu1 %v1963_v6 }
 0x94b   :  { %1896 = vmatprep.subr.bf16.mxu1 %v2695_v31 }
 0xa05   :  { %v1294_v34 = vpop.f32.mrf.mxu1 }
 0xa07   :  { %v1296_v3 = vpop.f32.mrf.mxu1 }
 0xa09   :  { %v1297_v35 = vpop.f32.mrf.mxu1  ;;  %v1334_v36 = vpop.f32.mrf.mxu0 }
 0xa0a   :  { %v1344_v14 = vpack.c.bf16 %v1334_v36, %v1294_v34 }
 0xa0b   :  { %v1298_v17 = vpop.f32.mrf.mxu1  ;;  %v1336_v4 = vpop.f32.mrf.mxu0 }
 0xa0c   :  { %1885 = vmatmul.mubr.msk.bf16.vlgmr.msra.gmra.mxu1 %vm559_vm0, %v1344_v14  ;;  %v2697_v14 = vld [vmem:[#allocation9_spill] sm:$0xff] }
 0xa0d   :  { %v1337_v19 = vpop.f32.mrf.mxu0  ;;  %1904 = vmatprep.mubr.msk.bf16.mxu1 %vm2053_vm1, %v2695_v31  ;;  %1897 = vmatpush3.bf16.msra.mxu1 %v1966_v51  ;;  %v1527_v17 = vrot.slane %v2286_v40, %v2697_v14 }
 0xa0e   :  { %1898 = vmatprep.subr.bf16.mxu1 %v2695_v31 }
 0xa0f   :  { %v1338_v5 = vpop.f32.mrf.mxu0 }
 0xa11   :  { %1899 = vmatpush3.bf16.msra.mxu1 %v1967_v42 }
 0xa12   :  { %1900 = vmatprep.subr.bf16.mxu1 %v2695_v31 }
 0xa15   :  { %1901 = vmatpush3.bf16.msra.mxu1 %v1968_v13 }
 0xa16   :  { %1902 = vmatprep.subr.bf16.mxu1 %v2695_v31 }
 0xa19   :  { %1903 = vmatpush3.bf16.msra.mxu1 %v1969_v57 }
 0xacc   :  { %v1398_v43 = vpop.f32.mrf.mxu1 }
 0xacd   :  { %v1399_v8 = vadd.f32 %v1398_v43, %v1348_v21 }
 0xace   :  { %v1886_v20 = vpop.f32.mrf.mxu1 }
 0xacf   :  { %v1405_v47 = vadd.f32 %v1399_v8, %v2336_v29 }
 0xad0   :  { %v1401_v25 = vpop.f32.mrf.mxu1 }
 0xad1   :  { %v1402_v9 = vadd.f32 %v1401_v25, %v1348_v21  ;;  %v1407_v1 = vsel %vm559_vm0, %v1405_v47, 0.0 }
 0xad2   :  { %1408 = vadd.xlane.f32.xlu0 %v1407_v1  ;;  %v1887_v0 = vpop.f32.mrf.mxu1 }
 0xad3   :  { %v1406_v16 = vadd.f32 %v1402_v9, %v2338_v30  ;;  %v1964_v30 = vld [vmem:[%s2665_s12 + $0x8] sm:$0xff]  }
 0xad4   :  { %1889 = vmatpush3.bf16.msra.mxu0 %v1964_v30 }
 0xad5   :  { %v1410_v7 = vsel %vm559_vm0, %v1406_v16, 0.0  ;;  %1890 = vmatprep.subr.bf16.mxu0 %v2695_v31 }
 0xad6   :  { %1411 = vadd.xlane.f32.xlu1 %v1410_v7 }
 0xad8   :  { %1891 = vmatpush3.bf16.msra.mxu0 %v1965_v27 }
 0xad9   :  { %1908 = vmatprep.subr.bf16.mxu0 %v2695_v31 }
 0xb5b   :  { %v1409_v23 = vpop.xlane.xlu0 %1408 }
 0xb5c   :  { %v1413_v59 = vmul.f32 0.03125, %v1409_v23 }
 0xb5e   :  { %v1415_v24 = vsub.f32 %v1405_v47, %v1413_v59 }
 0xb5f   :  { %v1412_v11 = vpop.xlane.xlu1 %1411 }
 0xb60   :  { %v1414_v45 = vmul.f32 0.03125, %v1412_v11  ;;  %v1417_v2 = vmul.f32 %v1415_v24, %v1415_v24 }
 0xb62   :  { %v1416_v26 = vsub.f32 %v1406_v16, %v1414_v45  ;;  %v1419_v29 = vsel %vm559_vm0, %v1417_v2, 0.0  ;;  %v1970_v2 = vld [vmem:[%s2671_s18 + $0x8] sm:$0xff]  }
 0xb63   :  { %1420 = vadd.xlane.f32.xlu0 %v1419_v29 }
 0xb64   :  { %v1418_v10 = vmul.f32 %v1416_v26, %v1416_v26 }
 0xb66   :  { %v1422_v41 = vsel %vm559_vm0, %v1418_v10, 0.0 }
 0xb67   :  { %1423 = vadd.xlane.f32.xlu1 %v1422_v41 }
 0xbec   :  { %v1421_v52 = vpop.xlane.xlu0 %1420 }
 0xbed   :  { %v1425_v53 = vmul.f32 0.03125, %v1421_v52 }
 0xbef   :  { %v1427_v12 = vadd.f32 1e-05, %v1425_v53 }
 0xbf0   :  { %v1424_v46 = vpop.xlane.xlu1 %1423 }
 0xbf1   :  { %1996 = vrsqrt.f32 %v1427_v12  ;;  %v1426_v49 = vmul.f32 0.03125, %v1424_v46  ;;  %v1628_v12 = vrot.slane %v2322_v18, %v2233_v32 }
 0xbf3   :  { %v1428_v33 = vadd.f32 1e-05, %v1426_v49 }
 0xbf5   :  { %1998 = vrsqrt.f32 %v1428_v33 }
 0xbfe   :  { %v1997_v54 = vpop.eup %1996 }
 0xbff   :  { %v1431_v15 = vmul.f32 %v1997_v54, %v1415_v24 }
 0xc01   :  { %v1437_v38 = vmul.f32 %v1436_v44, %v1431_v15 }
 0xc02   :  { %v1999_v55 = vpop.eup %1998 }
 0xc03   :  { %v1432_v37 = vmul.f32 %v1999_v55, %v1416_v26  ;;  %v1443_v22 = vadd.f32 %v1442_v61, %v1437_v38  ;;  %v1971_v26 = vld [vmem:[%s2671_s18] sm:$0xff]  }
 0xc05   :  { %v1438_v62 = vmul.f32 %v1436_v44, %v1432_v37  ;;  %v1764_v37 = vld [vmem:[%s2672_s19] ss:$0 sm:$0xff] }
 0xc07   :  { %v1444_v39 = vadd.f32 %v1442_v61, %v1438_v62 }
 0xc09   :  { %v1445_v28 = vpack.c.bf16 %v1444_v39, %v1443_v22 }
 0xc0b   :  { %1893 = vmatmul.mubr.msk.bf16.vlgmr.msra.gmra.mxu0 %vm559_vm0, %v1445_v28 }
 0xc0c   :  { %1912 = vmatprep.mubr.msk.bf16.mxu0 %vm2053_vm1, %v2695_v31  ;;  %1909 = vmatpush3.bf16.msra.mxu0 %v1970_v2 }
 0xc0d   :  { %1910 = vmatprep.subr.bf16.mxu0 %v2695_v31  ;;  %v1634_v31 = vrot.slane %v2696_v56, %v2233_v32 }
 0xc10   :  { %1911 = vmatpush3.bf16.msra.mxu0 %v1971_v26 }
 0xccb   :  { %v1506_v58 = vpop.f32.mrf.mxu0 }
 0xccc   :  { %v1507_v60 = vadd.f32 %v1755_v50, %v1506_v58 }
 0xccd   :  { %v1894_v63 = vpop.f32.mrf.mxu0 }
 0xcce   :  { %v1513_v3 = vmax.f32 %v1507_v60, 0.0 }
 0xccf   :  { %v1509_v48 = vpop.f32.mrf.mxu0 }
 0xcd0   :  { %v1510_v6 = vadd.f32 %v1755_v50, %v1509_v48 }
 0xcd1   :  { %v1895_v34 = vpop.f32.mrf.mxu0 }
 0xcd2   :  { %v1514_v35 = vmax.f32 %v1510_v6, 0.0 }
 0xcd4   :  { %v1523_v36 = vpack.c.bf16 %v1514_v35, %v1513_v3 }
 0xcd6   :  { %1905 = vmatmul.mubr.msk.bf16.vlgmr.msra.gmra.mxu1 %vm1552_vm4, %v1523_v36 }
 0xd96   :  { %v1590_v4 = vpop.f32.mrf.mxu1 }
 0xd97   :  { %v1591_v19 = vadd.f32 %v1590_v4, %v1527_v17 }
 0xd98   :  { %v1906_v5 = vpop.f32.mrf.mxu1 }
 0xd99   :  { %v1597_v21 = vadd.f32 %v1591_v19, %v1443_v22 }
 0xd9a   :  { %v1593_v43 = vpop.f32.mrf.mxu1 }
 0xd9b   :  { %v1594_v8 = vadd.f32 %v1593_v43, %v1527_v17  ;;  %v1599_v20 = vsel %vm559_vm0, %v1597_v21, 0.0 }
 0xd9c   :  { %1600 = vadd.xlane.f32.xlu0 %v1599_v20  ;;  %v1907_v47 = vpop.f32.mrf.mxu1 }
 0xd9d   :  { %v1598_v25 = vadd.f32 %v1594_v8, %v1444_v39 }
 0xd9f   :  { %v1602_v9 = vsel %vm559_vm0, %v1598_v25, 0.0 }
 0xda0   :  { %1603 = vadd.xlane.f32.xlu1 %v1602_v9 }
 0xe25   :  { %v1601_v1 = vpop.xlane.xlu0 %1600 }
 0xe26   :  { %v1605_v0 = vmul.f32 0.03125, %v1601_v1 }
 0xe28   :  { %v1607_v16 = vsub.f32 %v1597_v21, %v1605_v0 }
 0xe29   :  { %v1604_v7 = vpop.xlane.xlu1 %1603 }
 0xe2a   :  { %v1606_v23 = vmul.f32 0.03125, %v1604_v7  ;;  %v1609_v40 = vmul.f32 %v1607_v16, %v1607_v16 }
 0xe2c   :  { %v1608_v59 = vsub.f32 %v1598_v25, %v1606_v23  ;;  %v1611_v24 = vsel %vm559_vm0, %v1609_v40, 0.0 }
 0xe2d   :  { %1612 = vadd.xlane.f32.xlu0 %v1611_v24 }
 0xe2e   :  { %v1610_v11 = vmul.f32 %v1608_v59, %v1608_v59 }
 0xe30   :  { %v1614_v45 = vsel %vm559_vm0, %v1610_v11, 0.0 }
 0xe31   :  { %1615 = vadd.xlane.f32.xlu1 %v1614_v45 }
 0xeb6   :  { %v1613_v29 = vpop.xlane.xlu0 %1612 }
 0xeb7   :  { %v1617_v10 = vmul.f32 0.03125, %v1613_v29 }
 0xeb9   :  { %v1619_v41 = vadd.f32 1e-05, %v1617_v10 }
 0xeba   :  { %v1616_v30 = vpop.xlane.xlu1 %1615 }
 0xebb   :  { %2000 = vrsqrt.f32 %v1619_v41  ;;  %v1618_v27 = vmul.f32 0.03125, %v1616_v30 }
 0xebd   :  { %v1620_v51 = vadd.f32 1e-05, %v1618_v27 }
 0xebf   :  { %2002 = vrsqrt.f32 %v1620_v51 }
 0xec8   :  { %v2001_v52 = vpop.eup %2000 }
 0xec9   :  { %v1623_v53 = vmul.f32 %v2001_v52, %v1607_v16 }
 0xecb   :  { %v1629_v33 = vmul.f32 %v1628_v12, %v1623_v53 }
 0xecc   :  { %v2003_v46 = vpop.eup %2002 }
 0xecd   :  { %v1624_v49 = vmul.f32 %v2003_v46, %v1608_v59  ;;  %v1635_v15 = vadd.f32 %v1634_v31, %v1629_v33 }
 0xecf   :  { %v1630_v54 = vmul.f32 %v1628_v12, %v1624_v49 }
 0xed1   :  { %v1636_v44 = vadd.f32 %v1634_v31, %v1630_v54 }
 0xed3   :  { %v1637_v55 = vpack.c.bf16 %v1636_v44, %v1635_v15 }
 0xed5   :  { %1913 = vmatmul.mubr.msk.bf16.vlgmr.msra.gmra.mxu0 %vm559_vm0, %v1637_v55 }
 0xf95   :  { %v1698_v38 = vpop.f32.mrf.mxu0 }
 0xf96   :  { %v1699_v61 = vadd.f32 %v1764_v37, %v1698_v38 }
 0xf97   :  { %v1914_v18 = vpop.f32.mrf.mxu0 }
 0xf98   :  { %1705 = vst [vmem:[#allocation5] sm:$0xff] %v1699_v61 }
 0xf99   :  { %v1701_v62 = vpop.f32.mrf.mxu0 }
 0xf9a   :  { %v1702_v22 = vadd.f32 %v1764_v37, %v1701_v62 }
 0xf9b   :  { %v1915_v32 = vpop.f32.mrf.mxu0 }
 0xf9c   :  { %1706 = vst [vmem:[#allocation5 + $0x8] sm:$0xff] %v1702_v22 }
 0xf9d   :  { %2035 = shalt.err (!%p2032_p9)
}
 0xf9e   :  { %s2058_s2 = smov 128   ;;  %s2059_s19 = smov 8  }
 0xf9f   :  { %1718 = dma.vmem_to_hbm [thread:$0]  %s1713_s10, 256, %s2673_s20, [#allocation4], %s2058_s2, %s2058_s2, %s2059_s19  }
 0xfa0   :  { %2046 = dma.done.wait [#allocation4], 256  }
 0xfa1   :  { %2047 = vsyncadd [#allocation4], 4294967040 }
 0xfa2   :  { %1722 = vsyncpa [#allocation3], 1 }
 0xfa3   :  { %1723 = vsyncpa [#allocation4], 1 }

// kernel: tpu_custom_call.1
= control target key start
LH: loop header
LB: loop body
LE: loop exit
PB: predicated region body
PF: predicated region fallthrough
CT: control target
= control target key end

     0   :  { %s2653_s0 = inlined_call_operand.vmem [shape: bf16[2,4,256], index: 0, kind: input, shape index: {}]   ;;  %s2654_s1 = inlined_call_operand.vmem [shape: f32[2,8,32], index: 1, kind: input, shape index: {}]   ;;  %s2655_s2 = inlined_call_operand.hbm [shape: f32[2,1,8], index: 2, kind: input, shape index: {}]   ;;  %s2656_s3 = inlined_call_operand.vmem [shape: f32[8,8], index: 3, kind: input, shape index: {}]   ;;  %s2657_s4 = inlined_call_operand.vmem [shape: f32[32,4], index: 4, kind: input, shape index: {}]   ;;  %s2658_s5 = inlined_call_operand.vmem [shape: f32[32,1], index: 5, kind: input, shape index: {}]   ;;  %s2659_s6 = inlined_call_operand.vmem [shape: bf16[32,384], index: 6, kind: input, shape index: {}]   ;;  %s2660_s7 = inlined_call_operand.vmem [shape: f32[1,384], index: 7, kind: input, shape index: {}]   ;;  %s2661_s8 = inlined_call_operand.vmem [shape: bf16[128,32], index: 8, kind: input, shape index: {}]   ;;  %s2662_s9 = inlined_call_operand.vmem [shape: bf16[32,32], index: 9, kind: input, shape index: {}]   ;;  %s2663_s10 = inlined_call_operand.vmem [shape: bf16[32,32], index: 10, kind: input, shape index: {}]   ;;  %s2664_s11 = inlined_call_operand.vmem [shape: bf16[32,32], index: 11, kind: input, shape index: {}]   ;;  %s2665_s12 = inlined_call_operand.vmem [shape: bf16[32,64], index: 12, kind: input, shape index: {}]   ;;  %s2666_s13 = inlined_call_operand.vmem [shape: f32[1,64], index: 13, kind: input, shape index: {}]   ;;  %s2667_s14 = inlined_call_operand.vmem [shape: bf16[64,32], index: 14, kind: input, shape index: {}]   ;;  %s2668_s15 = inlined_call_operand.vmem [shape: f32[4,32], index: 15, kind: input, shape index: {}]   ;;  %s2669_s16 = inlined_call_operand.vmem [shape: f32[3,32], index: 16, kind: input, shape index: {}]   ;;  %s2670_s17 = inlined_call_operand.vmem [shape: f32[3,32], index: 17, kind: input, shape index: {}]   ;;  %s2671_s18 = inlined_call_operand.vmem [shape: bf16[32,128], index: 18, kind: input, shape index: {}]   ;;  %s2672_s19 = inlined_call_operand.vmem [shape: f32[1,128], index: 19, kind: input, shape index: {}]   ;;  %s2673_s20 = inlined_call_operand.hbm [shape: f32[2,8,128], index: 20, kind: output, shape index: {}]  }
   0x1   :  { %2682 = sst [smem:[#allocation10_spill]] %s2653_s0 }
   0x2   :  { %2683 = sst [smem:[#allocation11_spill]] %s2654_s1 }
   0x3   :  { %2684 = sst [smem:[#allocation12_spill]] %s2655_s2 }
   0x4   :  { %2685 = sst [smem:[#allocation13_spill]] %s2656_s3 }
   0x5   :  { %2686 = sst [smem:[#allocation14_spill]] %s2657_s4 }
   0x6   :  { %25 = vsyncpa [#allocation3], 0 }
   0x7   :  { %26 = vsyncpa [#allocation4], 0  ;;  %s2048_s1 = smov [#allocation2]  }
   0x8   :  { %s36_s22 = sshll.u32 %s2048_s1, 4  ;;  %s37_s22 = int_to_ptr.vmem [resolvable:$true] %s36_s22 }
   0x9   :  { %s2012_s23 = scalar_lea.vmem %s37_s22, 32  ;;  %p2017_p1 = scmp.lt.s32.totalorder %s37_s22, %s37_s22 }
   0xa   :  { %p2013_p0 = scmp.ne.s32.totalorder %s37_s22, %s2012_s23  ;;  %p2018_p2 = scmp.lt.s32.totalorder %s2012_s23, %s2012_s23 }
   0xc   :  { %p2019_p3 = por %p2018_p2, %p2017_p1 }
   0xe   :  { %p2020_p4 = pnand %p2019_p3, %p2013_p0 }
  0x10   :  { %2023 = shalt.err (!%p2020_p4)
}
  0x11   :  { %s2049_s24 = smov 16   ;;  %s2050_s2 = smov 1  }
  0x12   :  { %s2687_s26 = sld [smem:[#allocation12_spill]] }
  0x18   :  { %42 = dma.hbm_to_vmem [thread:$0]  %s2687_s26, 32, %s37_s22, [#allocation3], %s2049_s24, %s2049_s24, %s2050_s2  }
  0x19   :  { %2044 = dma.done.wait [#allocation3], 32  }
  0x1a   :  { %2045 = vsyncadd [#allocation3], 4294967264  ;;  %v2678_v0 = vmov 0   ;;  %v2676_v1 = vmov 0.0   ;;  %v1942_v2 = vld [vmem:[%s2659_s6 + $0x1c] ss:$12 sps:$4 sm:$0xff]   ;;  %v130_v11 = vlaneseq }
  0x1b   :  { %595 = vmatprep.mubr.bf16.mxu0 %v2678_v0  ;;  %1812 = vmatprep.subr.bf16.mxu1 %v2676_v1  ;;  %v1944_v3 = vld [vmem:[%s2659_s6 + $0x18] ss:$12 sps:$4 sm:$0xff]   ;;  %v1947_v5 = vld [vmem:[%s2659_s6] ss:$12 sps:$4 sm:$0xff]   ;;  %s2688_s24 = sld [smem:[#allocation11_spill]]  ;;  %vm559_vm0 = vcmask 261120  }
  0x1c   :  { %1929 = vset.pattern.permute.xlu1 %v2678_v0  ;;  %1928 = vset.pattern.permute.xlu0 %v2678_v0  ;;  %v1945_v4 = vld [vmem:[%s2659_s6 + $0x4] ss:$12 sps:$4 sm:$0xff]   ;;  %v1948_v8 = vld [vmem:[%s2659_s6 + $0x20] ss:$12 sps:$4 sm:$0xff]   ;;  %v1949_v10 = vld [vmem:[%s2659_s6 + $0x8] ss:$12 sps:$4 sm:$0xff]  }
  0x1d   :  { %575 = vmatprep.subr.bf16.mxu0 %v1942_v2  ;;  %1813 = vmatpush3.bf16.msra.mxu1 %v1948_v8  ;;  %vm2053_vm1 = vmmov 0   ;;  %v2213_v12 = vshrl.u32 %v130_v11, 7  ;;  %v510_v15 = vld [vmem:[%s2660_s7] sm:$0x7]  ;;  %vm763_vm2 = vcmask 1043456   ;;  %s2689_s30 = sld [smem:[#allocation13_spill]] }
  0x1e   :  { %576 = vmatpush1.bf16.msra.mxu0 %v1944_v3  ;;  %1814 = vmatprep.subr.bf16.mxu1 %v2676_v1  ;;  %v1724_v45 = vld [vmem:[#allocation2] ss:$0 sm:$0xff]  ;;  %v1725_v47 = vld [vmem:[#allocation2 + $0x1] ss:$0 sm:$0xff]  ;;  %vm733_vm3 = vcmask 64512   ;;  %s2692_s25 = sld [smem:[#allocation10_spill]] }
  0x1f   :  { %577 = vmatprep.subr.bf16.mxu0 %v1945_v4  ;;  %1816 = vmatprep.mubr.msk.bf16.mxu1 %vm2053_vm1, %v2676_v1  ;;  %v2216_v13 = vsub.s32 1, %v2213_v12  ;;  %v2219_v14 = vsub.s32 0, %v2213_v12  ;;  %v2233_v32 = vsub.s32 2, %v2213_v12  ;;  %vm1552_vm4 = vcmask 523264   ;;  %s2057_s23 = smov [#allocation5]  }
  0x21   :  { %v2187_v6 = vld [vmem:[%s2688_s24] sm:$0xff]  ;;  %v2192_v7 = vld [vmem:[%s2688_s24 + $0x8] sm:$0xff]  ;;  %1815 = vmatpush3.bf16.msra.mxu1 %v1949_v10  ;;  %v519_v16 = vrot.slane %v510_v15, %v2216_v13  ;;  %v515_v17 = vrot.slane %v510_v15, %v2219_v14  ;;  %v523_v33 = vrot.slane %v510_v15, %v2233_v32  ;;  %s2690_s24 = sld [smem:[#allocation14_spill]] }
  0x22   :  { %v501_v9 = vpack.c.bf16 %v2192_v7, %v2187_v6  ;;  %578 = vmatpush1.bf16.msra.mxu0 %v1947_v5  ;;  %1826 = vmatprep.subr.bf16.mxu1 %v2676_v1 }
  0x23   :  { %1820 = vmatprep.subr.bf16.mxu0 %v2676_v1  ;;  %v81_v44 = vld [vmem:[%s2689_s30] sm:$0xff] }
  0x24   :  { %1817 = vmatmul.mubr.msk.bf16.vlgmr.msra.gmra.mxu1 %vm559_vm0, %v501_v9  ;;  %v96_v46 = vadd.f32 %v1724_v45, %v81_v44  ;;  %v97_v50 = vadd.f32 %v1725_v47, %v81_v44 }
  0x25   :  { %1732 = vmatmul.mubr.msk.bf16.vlgmr.msra.gmra.mxu0 %vm559_vm0, %v501_v9  ;;  %1828 = vmatprep.mubr.msk.bf16.mxu1 %vm2053_vm1, %v2676_v1 }
  0x26   :  { %1822 = vmatprep.mubr.msk.bf16.mxu0 %vm2053_vm1, %v2676_v1 }
  0xe4   :  { %v640_v34 = vpop.f32.mrf.mxu1 }
  0xe5   :  { %v597_v18 = vpop.f32.mrf.mxu0  ;;  %v641_v35 = vadd.f32 %v640_v34, %v523_v33 }
  0xe6   :  { %v598_v21 = vadd.f32 %v597_v18, %v515_v17  ;;  %v1818_v36 = vpop.f32.mrf.mxu1  ;;  %v1950_v18 = vld [vmem:[%s2661_s8 + $0x38] sm:$0xff]  }
  0xe7   :  { %v599_v19 = vpop.f32.mrf.mxu0  ;;  %v758_v37 = vpack.c.bf16 %v641_v35, %v641_v35 }
  0xe8   :  { %v600_v20 = vadd.f32 %v599_v19, %v519_v16  ;;  %v647_v26 = vmul.f32 0.17677669, %v598_v21  ;;  %v643_v38 = vpop.f32.mrf.mxu1 }
  0xe9   :  { %v601_v22 = vpop.f32.mrf.mxu0  ;;  %v765_v39 = vsel %vm763_vm2, %v758_v37, 0  ;;  %v644_v40 = vadd.f32 %v643_v38, %v523_v33 }
  0xea   :  { %v651_v23 = vpack.c.bf16 %v600_v20, %v600_v20  ;;  %v602_v27 = vadd.f32 %v601_v22, %v515_v17  ;;  %v649_v29 = vpack.c.bf16 %v647_v26, %v647_v26  ;;  %v1819_v41 = vpop.f32.mrf.mxu1  ;;  %v1951_v22 = vld [vmem:[%s2661_s8 + $0x30] sm:$0xff]   ;;  %v1954_v26 = vld [vmem:[%s2661_s8 + $0x18] sm:$0xff]  }
  0xeb   :  { %v603_v24 = vpop.f32.mrf.mxu0  ;;  %v759_v42 = vpack.c.bf16 %v644_v40, %v644_v40  ;;  %v2286_v40 = vld [vmem:[%s2668_s15] sm:$0xf] }
  0xec   :  { %v604_v25 = vadd.f32 %v603_v24, %v519_v16  ;;  %1821 = vmatpush3.bf16.xpose.msra.mxu0 %v651_v23  ;;  %v648_v30 = vmul.f32 0.17677669, %v602_v27  ;;  %v1952_v24 = vld [vmem:[%s2661_s8 + $0x28] sm:$0xff]   ;;  %v1955_v27 = vld [vmem:[%s2661_s8 + $0x10] sm:$0xff]   ;;  %v873_v41 = vrot.slane %v2286_v40, %v2219_v14 }
  0xed   :  { %1832 = vmatprep.subr.bf16.mxu0 %v2676_v1  ;;  %v811_v43 = vsel %vm763_vm2, %v759_v42, 0 }
  0xee   :  { %v652_v28 = vpack.c.bf16 %v604_v25, %v604_v25  ;;  %v650_v31 = vpack.c.bf16 %v648_v30, %v648_v30  ;;  %v1953_v25 = vld [vmem:[%s2661_s8 + $0x20] sm:$0xff]  }
  0xf0   :  { %1827 = vmatpush3.bf16.xpose.msra.mxu1 %v652_v28  ;;  %v1956_v28 = vld [vmem:[%s2661_s8 + $0x8] sm:$0xff]  }
  0xf1   :  { %1838 = vmatprep.subr.bf16.mxu1 %v2676_v1 }
  0xf3   :  { %1823 = vmatmul.mubr.bf16.vlgmr.msra.gmra.mxu0 %v649_v29  ;;  %v1957_v29 = vld [vmem:[%s2661_s8] sm:$0xff]  }
  0xf4   :  { %1834 = vmatprep.mubr.msk.bf16.mxu0 %vm2053_vm1, %v2676_v1  ;;  %1833 = vmatpush3.bf16.msra.mxu0 %v765_v39 }
  0xf5   :  { %1844 = vmatprep.subr.bf16.mxu0 %v2676_v1 }
  0xf7   :  { %1829 = vmatmul.mubr.bf16.vlgmr.msra.gmra.mxu1 %v650_v31 }
  0xf8   :  { %1840 = vmatprep.mubr.msk.bf16.mxu1 %vm2053_vm1, %v2676_v1  ;;  %1839 = vmatpush3.bf16.msra.mxu1 %v811_v43 }
  0xf9   :  { %1864 = vmatprep.subr.bf16.mxu1 %v2676_v1 }
 0x1b3   :  { %v687_v48 = vpop.f32.mrf.mxu0 }
 0x1b4   :  { %v688_v49 = vadd.f32 %v687_v48, %v96_v46 }
 0x1b5   :  { %v1824_v51 = vpop.f32.mrf.mxu0 }
 0x1b6   :  { %v734_v52 = vsel %vm733_vm3, %v688_v49, -inf }
 0x1b7   :  { %v690_v53 = vpop.f32.mrf.mxu0  ;;  %v727_v54 = vpop.f32.mrf.mxu1  ;;  %735 = vmax.xlane.f32.xlu0 %v734_v52 }
 0x1b8   :  { %v728_v55 = vadd.f32 %v727_v54, %v97_v50 }
 0x1b9   :  { %v1825_v56 = vpop.f32.mrf.mxu0  ;;  %v1830_v57 = vpop.f32.mrf.mxu1 }
 0x1ba   :  { %v737_v58 = vsel %vm733_vm3, %v728_v55, -inf }
 0x1bb   :  { %v730_v59 = vpop.f32.mrf.mxu1  ;;  %738 = vmax.xlane.f32.xlu0 %v737_v58 }
 0x1bd   :  { %v1831_v60 = vpop.f32.mrf.mxu1 }
 0x240   :  { %v736_v61 = vpop.xlane.xlu0 %735 }
 0x241   :  { %v740_v62 = vsub.f32 %v688_v49, %v736_v61  ;;  %v1959_v61 = vld [vmem:[%s2662_s9] sm:$0xff]  }
 0x243   :  { %v742_v63 = vmul.f32 1.442695, %v740_v62  ;;  %v105_v62 = vld [vmem:[%s2690_s24 + $0x18] sm:$0xff] }
 0x244   :  { %v739_v2 = vpop.xlane.xlu0 %738 }
 0x245   :  { %1972 = vpow2.f32 %v742_v63  ;;  %v741_v3 = vsub.f32 %v728_v55, %v739_v2  ;;  %v104_v63 = vld [vmem:[%s2690_s24 + $0x10] sm:$0xff]  ;;  %v2054_v2 = vmov 1  }
 0x247   :  { %v744_v4 = vmul.f32 1.442695, %v741_v3  ;;  %v103_v3 = vld [vmem:[%s2690_s24 + $0x8] sm:$0xff] }
 0x249   :  { %1974 = vpow2.f32 %v744_v4  ;;  %v102_v4 = vld [vmem:[%s2690_s24] sm:$0xff] }
 0x252   :  { %v1973_v5 = vpop.eup %1972 }
 0x253   :  { %v746_v8 = vsel %vm733_vm3, %v1973_v5, 0.0 }
 0x254   :  { %747 = vadd.xlane.f32.xlu1 %v746_v8  ;;  %v2056_v8 = vmov 3  }
 0x256   :  { %v1975_v9 = vpop.eup %1974 }
 0x257   :  { %v749_v10 = vsel %vm733_vm3, %v1975_v9, 0.0 }
 0x258   :  { %750 = vadd.xlane.f32.xlu1 %v749_v10 }
 0x2dd   :  { %v748_v11 = vpop.xlane.xlu1 %747 }
 0x2de   :  { %1976 = vrcp.f32 %v748_v11 }
 0x2e1   :  { %v751_v15 = vpop.xlane.xlu1 %750 }
 0x2e2   :  { %1978 = vrcp.f32 %v751_v15 }
 0x2eb   :  { %v1977_v16 = vpop.eup %1976 }
 0x2ec   :  { %v754_v17 = vmul.f32 %v1977_v16, %v1973_v5  ;;  %v2055_v5 = vmov 2  }
 0x2ee   :  { %v756_v19 = vpack.c.bf16 %v754_v17, %v754_v17 }
 0x2ef   :  { %v1979_v20 = vpop.eup %1978 }
 0x2f0   :  { %1835 = vmatmul.mubr.msk.bf16.vlgmr.msra.gmra.mxu0 %vm733_vm3, %v756_v19  ;;  %v755_v21 = vmul.f32 %v1979_v20, %v1975_v9 }
 0x2f1   :  { %1845 = vmatpush3.bf16.msra.mxu0 %v1950_v18  ;;  %1860 = vmatprep.mubr.msk.bf16.mxu0 %vm2053_vm1, %v2676_v1  ;;  %v2322_v18 = vld [vmem:[%s2669_s16] sm:$0x7] }
 0x2f2   :  { %v757_v23 = vpack.c.bf16 %v755_v21, %v755_v21  ;;  %1846 = vmatprep.subr.bf16.mxu0 %v2676_v1  ;;  %v995_v21 = vrot.slane %v2322_v18, %v2219_v14 }
 0x2f4   :  { %1841 = vmatmul.mubr.msk.bf16.vlgmr.msra.gmra.mxu1 %vm733_vm3, %v757_v23 }
 0x2f5   :  { %1847 = vmatpush3.bf16.msra.mxu0 %v1951_v22  ;;  %1868 = vmatprep.mubr.msk.bf16.mxu1 %vm2053_vm1, %v2676_v1  ;;  %v2329_v22 = vld [vmem:[%s2670_s17] sm:$0x7] }
 0x2f6   :  { %1848 = vmatprep.subr.bf16.mxu0 %v2676_v1  ;;  %2691 = vst [vmem:[#allocation8_spill] sm:$0xff] %v2329_v22 }
 0x2f9   :  { %1849 = vmatpush3.bf16.msra.mxu0 %v1952_v24 }
 0x2fa   :  { %1850 = vmatprep.subr.bf16.mxu0 %v2676_v1 }
 0x2fd   :  { %1851 = vmatpush3.bf16.msra.mxu0 %v1953_v25 }
 0x2fe   :  { %1852 = vmatprep.subr.bf16.mxu0 %v2676_v1 }
 0x301   :  { %1853 = vmatpush3.bf16.msra.mxu0 %v1954_v26  ;;  %v1001_v26 = vrot.slane %v2329_v22, %v2219_v14 }
 0x302   :  { %1854 = vmatprep.subr.bf16.mxu0 %v2676_v1 }
 0x305   :  { %1855 = vmatpush3.bf16.msra.mxu0 %v1955_v27 }
 0x306   :  { %1856 = vmatprep.subr.bf16.mxu0 %v2676_v1 }
 0x309   :  { %1857 = vmatpush3.bf16.msra.mxu0 %v1956_v28  ;;  %v1960_v28 = vld [vmem:[%s2663_s10 + $0x8] sm:$0xff]  }
 0x30a   :  { %1858 = vmatprep.subr.bf16.mxu0 %v2676_v1 }
 0x30d   :  { %1859 = vmatpush3.bf16.msra.mxu0 %v1957_v29 }
 0x3b0   :  { %v801_v30 = vpop.f32.mrf.mxu0 }
 0x3b2   :  { %v1836_v31 = vpop.f32.mrf.mxu0 }
 0x3b4   :  { %v804_v33 = vpop.f32.mrf.mxu0  ;;  %v847_v34 = vpop.f32.mrf.mxu1 }
 0x3b5   :  { %v869_v35 = vpack.c.bf16 %v847_v34, %v801_v30  ;;  %v1093_v33 = vsel %vm559_vm0, %v1960_v28, 0  ;;  %v1961_v34 = vld [vmem:[%s2663_s10] sm:$0xff]   ;;  %s1712_s10 = sshll.u32 %s2057_s23, 4  ;;  %s1713_s10 = int_to_ptr.vmem [resolvable:$true] %s1712_s10 }
 0x3b6   :  { %v1837_v36 = vpop.f32.mrf.mxu0  ;;  %v1842_v37 = vpop.f32.mrf.mxu1  ;;  %s2024_s24 = scalar_lea.vmem %s1713_s10, 256  ;;  %p2029_p6 = scmp.lt.s32.totalorder %s1713_s10, %s1713_s10 }
 0x3b7   :  { %1861 = vmatmul.mubr.bf16.vlgmr.msra.gmra.mxu0 %v869_v35  ;;  %v1090_v35 = vsel %vm559_vm0, %v1961_v34, 0  ;;  %v436_v36 = vld [vmem:[%s2658_s5 + $0x10] sm:$0xff]  ;;  %v437_v37 = vld [vmem:[%s2658_s5 + $0x18] sm:$0xff]  ;;  %p2025_p5 = scmp.ne.s32.totalorder %s1713_s10, %s2024_s24  ;;  %p2030_p7 = scmp.lt.s32.totalorder %s2024_s24, %s2024_s24 }
 0x3b8   :  { %v850_v38 = vpop.f32.mrf.mxu1  ;;  %1217 = vmatprep.mubr.bf16.mxu0 %v2678_v0 }
 0x3b9   :  { %v434_v38 = vld [vmem:[%s2658_s5] sm:$0xff]  ;;  %p2031_p8 = por %p2030_p7, %p2029_p6 }
 0x3ba   :  { %v1843_v39 = vpop.f32.mrf.mxu1 }
 0x3bb   :  { %v435_v39 = vld [vmem:[%s2658_s5 + $0x8] sm:$0xff]  ;;  %p2032_p9 = pnand %p2031_p8, %p2025_p5 }
 0x477   :  { %v956_v42 = vpop.f32.mrf.mxu0 }
 0x478   :  { %v957_v43 = vadd.f32 %v956_v42, %v873_v41 }
 0x479   :  { %v1862_v44 = vpop.f32.mrf.mxu0 }
 0x47a   :  { %v963_v45 = vadd.f32 %v957_v43, %v2187_v6 }
 0x47b   :  { %v959_v46 = vpop.f32.mrf.mxu0 }
 0x47c   :  { %v960_v47 = vadd.f32 %v959_v46, %v873_v41  ;;  %v965_v48 = vsel %vm559_vm0, %v963_v45, 0.0  ;;  %v1769_v46 = vld [vmem:[%s2692_s25] sm:$0xff]  }
 0x47d   :  { %966 = vadd.xlane.f32.xlu0 %v965_v48  ;;  %v1863_v49 = vpop.f32.mrf.mxu0  ;;  %v2372_v48 = vunpack.c.h.bf16 %v1769_v46 }
 0x47e   :  { %v964_v50 = vadd.f32 %v960_v47, %v2192_v7  ;;  %v1958_v7 = vld [vmem:[%s2662_s9 + $0x8] sm:$0xff]   ;;  %v2370_v47 = vunpack.c.l.bf16 %v1769_v46  ;;  %v136_v49 = vsub.s32 4, %v2213_v12 }
 0x47f   :  { %1865 = vmatpush3.bf16.msra.mxu1 %v1958_v7 }
 0x480   :  { %v968_v51 = vsel %vm559_vm0, %v964_v50, 0.0  ;;  %1866 = vmatprep.subr.bf16.mxu1 %v2676_v1 }
 0x481   :  { %969 = vadd.xlane.f32.xlu1 %v968_v51  ;;  %v204_v51 = vsub.s32 5, %v2213_v12 }
 0x483   :  { %1867 = vmatpush3.bf16.msra.mxu1 %v1959_v61 }
 0x484   :  { %1872 = vmatprep.subr.bf16.mxu1 %v2676_v1 }
 0x506   :  { %v967_v52 = vpop.xlane.xlu0 %966 }
 0x507   :  { %v972_v53 = vmul.f32 0.03125, %v967_v52  ;;  %v133_v52 = vrot.slane %v2370_v47, %v2219_v14 }
 0x509   :  { %v974_v54 = vsub.f32 %v963_v45, %v972_v53  ;;  %v137_v53 = vrot.slane %v2370_v47, %v136_v49  ;;  %v2394_v7 = vrot.slane %v133_v52, %v2219_v14 }
 0x50a   :  { %v970_v55 = vpop.xlane.xlu1 %969 }
 0x50b   :  { %v973_v56 = vmul.f32 0.03125, %v970_v55  ;;  %v976_v57 = vmul.f32 %v974_v54, %v974_v54  ;;  %v201_v55 = vrot.slane %v2370_v47, %v2216_v13  ;;  %v2397_v61 = vrot.slane %v137_v53, %v2219_v14 }
 0x50d   :  { %v975_v58 = vsub.f32 %v964_v50, %v973_v56  ;;  %v978_v6 = vsel %vm559_vm0, %v976_v57, 0.0  ;;  %v145_v56 = vrot.slane %v2372_v48, %v136_v49  ;;  %v205_v57 = vrot.slane %v2370_v47, %v204_v51 }
 0x50e   :  { %979 = vadd.xlane.f32.xlu0 %v978_v6  ;;  %v213_v6 = vrot.slane %v2372_v48, %v204_v51 }
 0x50f   :  { %v977_v59 = vmul.f32 %v975_v58, %v975_v58 }
 0x511   :  { %v981_v60 = vsel %vm559_vm0, %v977_v59, 0.0 }
 0x512   :  { %982 = vadd.xlane.f32.xlu1 %v981_v60  ;;  %v288_v60 = vsub.s32 6, %v2213_v12 }
 0x523   :  { %125 = vperm.xlu1 %1929, %v105_v62  }
 0x524   :  { %120 = vperm.xlu0 %1928, %v104_v63  }
 0x527   :  { %1930 = vset.pattern.permute.xlu1 %v2054_v2 }
 0x528   :  { %1934 = vset.pattern.permute.xlu0 %v2054_v2  ;;  %191 = vperm.xlu1 %1930, %v104_v63  }
 0x529   :  { %187 = vperm.xlu0 %1934, %v103_v3  }
 0x52c   :  { %195 = vperm.xlu1 %1930, %v105_v62  }
 0x52d   :  { %1936 = vset.pattern.permute.xlu0 %v2055_v5 }
 0x52e   :  { %267 = vperm.xlu0 %1936, %v102_v4  }
 0x530   :  { %1931 = vset.pattern.permute.xlu1 %v2055_v5 }
 0x531   :  { %275 = vperm.xlu1 %1931, %v104_v63  }
 0x532   :  { %1939 = vset.pattern.permute.xlu0 %v2056_v8 }
 0x533   :  { %355 = vperm.xlu0 %1939, %v103_v3  }
 0x535   :  { %279 = vperm.xlu1 %1931, %v105_v62  }
 0x537   :  { %1941 = vset.pattern.permute.xlu0 %v2678_v0 }
 0x538   :  { %440 = vperm.xlu0 %1941, %v434_v38  }
 0x539   :  { %1932 = vset.pattern.permute.xlu1 %v2678_v0 }
 0x53a   :  { %110 = vperm.xlu1 %1932, %v102_v4  }
 0x53e   :  { %115 = vperm.xlu1 %1932, %v103_v3  }
 0x542   :  { %1933 = vset.pattern.permute.xlu1 %v2054_v2  ;;  %v2406_v2 = vrot.slane %v145_v56, %v2219_v14 }
 0x543   :  { %183 = vperm.xlu1 %1933, %v102_v4  }
 0x547   :  { %1935 = vset.pattern.permute.xlu1 %v2056_v8 }
 0x548   :  { %359 = vperm.xlu1 %1935, %v104_v63   ;;  %v2403_v63 = vrot.slane %v201_v55, %v2216_v13 }
 0x54c   :  { %363 = vperm.xlu1 %1935, %v105_v62  }
 0x550   :  { %1937 = vset.pattern.permute.xlu1 %v2055_v5  ;;  %v2415_v5 = vrot.slane %v213_v6, %v2216_v13 }
 0x551   :  { %271 = vperm.xlu1 %1937, %v103_v3   ;;  %v2409_v3 = vrot.slane %v205_v57, %v2216_v13 }
 0x555   :  { %1938 = vset.pattern.permute.xlu1 %v2056_v8  ;;  %v285_v8 = vrot.slane %v2370_v47, %v2233_v32 }
 0x556   :  { %351 = vperm.xlu1 %1938, %v102_v4  }
 0x557   :  { %v2439_v28 = vrot.slane %v285_v8, %v2233_v32 }
 0x55a   :  { %1940 = vset.pattern.permute.xlu1 %v2678_v0 }
 0x55b   :  { %450 = vperm.xlu1 %1940, %v436_v36  }
 0x55f   :  { %455 = vperm.xlu1 %1940, %v437_v37  }
 0x563   :  { %445 = vperm.xlu1 %1940, %v435_v39  }
 0x597   :  { %v980_v9 = vpop.xlane.xlu0 %979 }
 0x598   :  { %v984_v10 = vmul.f32 0.03125, %v980_v9 }
 0x59a   :  { %v986_v11 = vadd.f32 1e-05, %v984_v10  ;;  %v289_v10 = vrot.slane %v2370_v47, %v288_v60 }
 0x59b   :  { %v983_v15 = vpop.xlane.xlu1 %982 }
 0x59c   :  { %1980 = vrsqrt.f32 %v986_v11  ;;  %v985_v16 = vmul.f32 0.03125, %v983_v15  ;;  %v293_v11 = vrot.slane %v2372_v48, %v2233_v32  ;;  %v2424_v15 = vsub.s32 3, %v2213_v12 }
 0x59d   :  { %v2444_v34 = vrot.slane %v289_v10, %v2233_v32 }
 0x59e   :  { %v987_v17 = vadd.f32 1e-05, %v985_v16  ;;  %2693 = vst [vmem:[#allocation9_spill] sm:$0xff] %v2424_v15  ;;  %v369_v51 = vrot.slane %v2370_v47, %v2424_v15 }
 0x59f   :  { %v126_v41 = vpop.permute.xlu1 %125  ;;  %v121_v9 = vpop.permute.xlu0 %120 }
 0x5a0   :  { %1982 = vrsqrt.f32 %v987_v17  ;;  %v172_v16 = vmul.f32 %v2394_v7, %v126_v41  ;;  %v173_v17 = vmul.f32 %v2397_v61, %v126_v41  ;;  %v170_v6 = vmul.f32 %v2394_v7, %v121_v9 }
 0x5a1   :  { %v179_v8 = vmul.f32 %v2406_v2, %v121_v9 }
 0x5a3   :  { %v192_v42 = vpop.permute.xlu1 %191 }
 0x5a4   :  { %v239_v37 = vmul.f32 %v2409_v3, %v192_v42  ;;  %v247_v39 = vmul.f32 %v2415_v5, %v192_v42 }
 0x5a7   :  { %v196_v43 = vpop.permute.xlu1 %195 }
 0x5a9   :  { %v1981_v19 = vpop.eup %1980 }
 0x5aa   :  { %v990_v20 = vmul.f32 %v1981_v19, %v974_v54  ;;  %v141_v54 = vrot.slane %v2372_v48, %v2219_v14 }
 0x5ac   :  { %v996_v25 = vmul.f32 %v995_v21, %v990_v20  ;;  %v2363_v44 = vpop.permute.xlu1 %275  ;;  %v2400_v62 = vrot.slane %v141_v54, %v2219_v14  ;;  %v297_v14 = vrot.slane %v2372_v48, %v288_v60  ;;  %v240_v20 = vmul.f32 %v2403_v63, %v196_v43 }
 0x5ad   :  { %v1983_v23 = vpop.eup %1982  ;;  %v377_v54 = vrot.slane %v2372_v48, %v2424_v15  ;;  %v171_v60 = vmul.f32 %v2397_v61, %v121_v9  ;;  %v323_v10 = vmul.f32 %v2444_v34, %v2363_v44 }
 0x5ae   :  { %v991_v24 = vmul.f32 %v1983_v23, %v975_v58  ;;  %v2336_v29 = vadd.f32 %v1001_v26, %v996_v25  ;;  %v209_v58 = vrot.slane %v2372_v48, %v2216_v13  ;;  %v180_v19 = vmul.f32 %v2400_v62, %v126_v41 }
 0x5af   :  { %v181_v23 = vmul.f32 %v2406_v2, %v126_v41  ;;  %v2450_v36 = vrot.slane %v297_v14, %v2233_v32  ;;  %v256_v41 = vadd.f32 %v240_v20, %v172_v16  ;;  %v2484_v14 = vrot.slane %v369_v51, %v2424_v15 }
 0x5b0   :  { %v997_v27 = vmul.f32 %v995_v21, %v991_v24  ;;  %v2365_v45 = vpop.permute.xlu1 %279  ;;  %v2412_v4 = vrot.slane %v209_v58, %v2216_v13  ;;  %v241_v24 = vmul.f32 %v2409_v3, %v196_v43 }
 0x5b1   :  { %v324_v52 = vmul.f32 %v2439_v28, %v2365_v45  ;;  %v333_v58 = vmul.f32 %v2450_v36, %v2365_v45 }
 0x5b2   :  { %v2338_v30 = vadd.f32 %v1001_v26, %v997_v27  ;;  %v248_v25 = vmul.f32 %v2412_v4, %v196_v43  ;;  %v249_v26 = vmul.f32 %v2415_v5, %v196_v43  ;;  %v2436_v27 = vrot.slane %v2286_v40, %v2216_v13  ;;  %v188_v43 = vpop.permute.xlu0 %187 }
 0x5b3   :  { %v246_v38 = vmul.f32 %v2412_v4, %v192_v42  ;;  %v2486_v16 = vadd.f32 %v324_v52, %v256_v41  ;;  %v255_v41 = vadd.f32 %v239_v37, %v171_v60  ;;  %v263_v52 = vadd.f32 %v247_v39, %v179_v8 }
 0x5b4   :  { %v1004_v31 = vpack.c.bf16 %v2338_v30, %v2336_v29  ;;  %v264_v46 = vadd.f32 %v248_v25, %v180_v19  ;;  %v265_v49 = vadd.f32 %v249_v26, %v181_v23  ;;  %v2492_v19 = vrot.slane %v377_v54, %v2424_v15 }
 0x5b5   :  { %v2375_v50 = vpop.permute.xlu1 %110  ;;  %v237_v54 = vmul.f32 %v2409_v3, %v188_v43  ;;  %v245_v37 = vmul.f32 %v2415_v5, %v188_v43  ;;  %v339_v8 = vadd.f32 %v323_v10, %v255_v41 }
 0x5b6   :  { %1869 = vmatmul.mubr.msk.bf16.vlgmr.msra.gmra.mxu1 %vm559_vm0, %v1004_v31  ;;  %v372_v31 = vsub.s32 7, %v2213_v12  ;;  %v257_v12 = vadd.f32 %v241_v24, %v173_v17  ;;  %v268_v20 = vpop.permute.xlu0 %267  ;;  %v166_v26 = vmul.f32 %v2394_v7, %v2375_v50 }
 0x5b7   :  { %1873 = vmatpush3.bf16.xpose.msra.mxu1 %v1093_v33  ;;  %1876 = vmatprep.mubr.msk.bf16.mxu1 %vm2053_vm1, %v2676_v1  ;;  %v238_v33 = vmul.f32 %v2403_v63, %v192_v42  ;;  %v325_v42 = vmul.f32 %v2444_v34, %v2365_v45 }
 0x5b8   :  { %1874 = vmatprep.subr.bf16.mxu1 %v2676_v1  ;;  %v373_v53 = vrot.slane %v2370_v47, %v372_v31  ;;  %v381_v55 = vrot.slane %v2372_v48, %v372_v31  ;;  %v322_v47 = vmul.f32 %v2439_v28, %v2363_v44  ;;  %v178_v48 = vmul.f32 %v2400_v62, %v121_v9 }
 0x5b9   :  { %v2390_v59 = vpop.permute.xlu1 %115  ;;  %v2497_v23 = vadd.f32 %v325_v42, %v257_v12  ;;  %v254_v25 = vadd.f32 %v238_v33, %v170_v6  ;;  %v174_v12 = vmul.f32 %v2400_v62, %v2375_v50 }
 0x5ba   :  { %v2489_v17 = vrot.slane %v373_v53, %v2424_v15  ;;  %v2495_v9 = vrot.slane %v381_v55, %v2424_v15  ;;  %v262_v51 = vadd.f32 %v246_v38, %v178_v48  ;;  %v167_v53 = vmul.f32 %v2397_v61, %v2375_v50  ;;  %v356_v60 = vpop.permute.xlu0 %355 }
 0x5bb   :  { %v244_v55 = vmul.f32 %v2412_v4, %v188_v43  ;;  %v338_v6 = vadd.f32 %v322_v47, %v254_v25  ;;  %v168_v48 = vmul.f32 %v2394_v7, %v2390_v59  ;;  %v404_v15 = vmul.f32 %v2484_v14, %v356_v60 }
 0x5bc   :  { %v413_v22 = vmul.f32 %v2495_v9, %v356_v60 }
 0x5be   :  { %v184_v21 = vpop.permute.xlu1 %183 }
 0x5bf   :  { %1875 = vmatpush3.bf16.xpose.msra.mxu1 %v1090_v35  ;;  %v2447_v35 = vrot.slane %v293_v11, %v2233_v32  ;;  %v234_v33 = vmul.f32 %v2403_v63, %v184_v21  ;;  %v235_v38 = vmul.f32 %v2409_v3, %v184_v21  ;;  %v242_v39 = vmul.f32 %v2412_v4, %v184_v21 }
 0x5c0   :  { %v243_v42 = vmul.f32 %v2415_v5, %v184_v21  ;;  %v169_v3 = vmul.f32 %v2397_v61, %v2390_v59  ;;  %v176_v4 = vmul.f32 %v2400_v62, %v2390_v59  ;;  %v177_v5 = vmul.f32 %v2406_v2, %v2390_v59 }
 0x5c1   :  { %v332_v57 = vmul.f32 %v2447_v35, %v2365_v45  ;;  %v330_v11 = vmul.f32 %v2447_v35, %v2363_v44  ;;  %v331_v45 = vmul.f32 %v2450_v36, %v2363_v44  ;;  %v2501_v44 = vadd.f32 %v333_v58, %v265_v49 }
 0x5c2   :  { %v236_v49 = vmul.f32 %v2403_v63, %v188_v43  ;;  %v326_v58 = vmul.f32 %v2447_v35, %v268_v20  ;;  %v327_v63 = vmul.f32 %v2450_v36, %v268_v20  ;;  %v250_v21 = vadd.f32 %v234_v33, %v166_v26 }
 0x5c3   :  { %v2463_v56 = vpop.permute.xlu1 %359  ;;  %v2499_v24 = vadd.f32 %v332_v57, %v264_v46  ;;  %v175_v46 = vmul.f32 %v2406_v2, %v2375_v50  ;;  %v318_v57 = vmul.f32 %v2439_v28, %v268_v20  ;;  %v319_v50 = vmul.f32 %v2444_v34, %v268_v20 }
 0x5c4   :  { %v346_v1 = vadd.f32 %v330_v11, %v262_v51  ;;  %v347_v0 = vadd.f32 %v331_v45, %v263_v52  ;;  %v251_v20 = vadd.f32 %v235_v38, %v167_v53  ;;  %v258_v47 = vadd.f32 %v242_v39, %v174_v12 }
 0x5c5   :  { %v259_v25 = vadd.f32 %v243_v42, %v175_v46  ;;  %v406_v7 = vmul.f32 %v2484_v14, %v2463_v56  ;;  %v405_v61 = vmul.f32 %v2489_v17, %v356_v60  ;;  %v412_v62 = vmul.f32 %v2492_v19, %v356_v60 }
 0x5c6   :  { %v252_v59 = vadd.f32 %v236_v49, %v168_v48  ;;  %v253_v2 = vadd.f32 %v237_v54, %v169_v3  ;;  %v260_v26 = vadd.f32 %v244_v55, %v176_v4  ;;  %v261_v10 = vadd.f32 %v245_v37, %v177_v5 }
 0x5c7   :  { %v2505_v31 = vpop.permute.xlu1 %363  ;;  %v407_v11 = vmul.f32 %v2489_v17, %v2463_v56  ;;  %v414_v45 = vmul.f32 %v2492_v19, %v2463_v56  ;;  %v415_v41 = vmul.f32 %v2495_v9, %v2463_v56  ;;  %v334_v51 = vadd.f32 %v318_v57, %v250_v21 }
 0x5c8   :  { %v335_v53 = vadd.f32 %v319_v50, %v251_v20  ;;  %v342_v12 = vadd.f32 %v326_v58, %v258_v47  ;;  %v343_v46 = vadd.f32 %v327_v63, %v259_v25  ;;  %v408_v49 = vmul.f32 %v2484_v14, %v2505_v31 }
 0x5c9   :  { %v409_v33 = vmul.f32 %v2489_v17, %v2505_v31  ;;  %v416_v54 = vmul.f32 %v2492_v19, %v2505_v31  ;;  %v422_v37 = vadd.f32 %v406_v7, %v338_v6  ;;  %v423_v63 = vadd.f32 %v407_v11, %v339_v8 }
 0x5ca   :  { %v417_v6 = vmul.f32 %v2495_v9, %v2505_v31 }
 0x5cc   :  { %v272_v43 = vpop.permute.xlu1 %271 }
 0x5cd   :  { %v320_v52 = vmul.f32 %v2439_v28, %v272_v43  ;;  %v321_v56 = vmul.f32 %v2444_v34, %v272_v43  ;;  %v328_v39 = vmul.f32 %v2447_v35, %v272_v43  ;;  %v329_v28 = vmul.f32 %v2450_v36, %v272_v43 }
 0x5ce   :  { %v430_v34 = vadd.f32 %v414_v45, %v346_v1  ;;  %v431_v35 = vadd.f32 %v415_v41, %v347_v0  ;;  %v424_v36 = vadd.f32 %v408_v49, %v2486_v16  ;;  %v433_v16 = vadd.f32 %v417_v6, %v2501_v44  ;;  %v441_v45 = vpop.permute.xlu0 %440 }
 0x5cf   :  { %v336_v3 = vadd.f32 %v320_v52, %v252_v59  ;;  %v337_v5 = vadd.f32 %v321_v56, %v253_v2  ;;  %v344_v21 = vadd.f32 %v328_v39, %v260_v26  ;;  %v345_v43 = vadd.f32 %v329_v28, %v261_v10 }
 0x5d1   :  { %v352_v55 = vpop.permute.xlu1 %351  ;;  %v420_v7 = vadd.f32 %v404_v15, %v336_v3  ;;  %v421_v26 = vadd.f32 %v405_v61, %v337_v5  ;;  %v428_v10 = vadd.f32 %v412_v62, %v344_v21  ;;  %v429_v41 = vadd.f32 %v413_v22, %v345_v43 }
 0x5d2   :  { %v402_v42 = vmul.f32 %v2484_v14, %v352_v55  ;;  %v403_v57 = vmul.f32 %v2489_v17, %v352_v55  ;;  %v410_v50 = vmul.f32 %v2492_v19, %v352_v55  ;;  %v411_v58 = vmul.f32 %v2495_v9, %v352_v55 }
 0x5d3   :  { %v425_v14 = vadd.f32 %v409_v33, %v2497_v23  ;;  %v432_v17 = vadd.f32 %v416_v54, %v2499_v24  ;;  %v2694_v22 = vmov 0  }
 0x5d4   :  { %v418_v19 = vadd.f32 %v402_v42, %v334_v51  ;;  %v419_v47 = vadd.f32 %v403_v57, %v335_v53  ;;  %v426_v25 = vadd.f32 %v410_v50, %v342_v12  ;;  %v427_v9 = vadd.f32 %v411_v58, %v343_v46 }
 0x5d6   :  { %v451_v20 = vpop.permute.xlu1 %450  ;;  %v458_v2 = vadd.f32 %v441_v45, %v418_v19  ;;  %v459_v52 = vadd.f32 %v441_v45, %v419_v47  ;;  %v466_v53 = vadd.f32 %v441_v45, %v426_v25  ;;  %v467_v12 = vadd.f32 %v441_v45, %v427_v9 }
 0x5d7   :  { %v462_v0 = vadd.f32 %v451_v20, %v422_v37  ;;  %v463_v59 = vadd.f32 %v451_v20, %v423_v63  ;;  %v470_v24 = vadd.f32 %v451_v20, %v430_v34  ;;  %v471_v11 = vadd.f32 %v451_v20, %v431_v35 }
 0x5d8   :  { %v474_v39 = vmax.f32 %v458_v2, 0.0  ;;  %v482_v28 = vmax.f32 %v466_v53, 0.0  ;;  %v475_v57 = vmax.f32 %v459_v52, 0.0  ;;  %v483_v50 = vmax.f32 %v467_v12, 0.0 }
 0x5d9   :  { %v478_v15 = vmax.f32 %v462_v0, 0.0  ;;  %v486_v44 = vmax.f32 %v470_v24, 0.0  ;;  %v479_v55 = vmax.f32 %v463_v59, 0.0  ;;  %v487_v37 = vmax.f32 %v471_v11, 0.0 }
 0x5da   :  { %v456_v51 = vpop.permute.xlu1 %455 }
 0x5db   :  { %v464_v46 = vadd.f32 %v456_v51, %v424_v36  ;;  %v465_v49 = vadd.f32 %v456_v51, %v425_v14  ;;  %v472_v33 = vadd.f32 %v456_v51, %v432_v17  ;;  %v473_v54 = vadd.f32 %v456_v51, %v433_v16 }
 0x5dd   :  { %v488_v56 = vmax.f32 %v472_v33, 0.0  ;;  %v481_v61 = vmax.f32 %v465_v49, 0.0  ;;  %v489_v62 = vmax.f32 %v473_v54, 0.0 }
 0x5de   :  { %v446_v42 = vpop.permute.xlu1 %445 }
 0x5df   :  { %v460_v58 = vadd.f32 %v446_v42, %v420_v7  ;;  %v461_v63 = vadd.f32 %v446_v42, %v421_v26  ;;  %v493_v6 = vpack.c.bf16 %v481_v61, %v479_v55  ;;  %v497_v34 = vpack.c.bf16 %v489_v62, %v487_v37 }
 0x5e0   :  { %v496_v35 = vpack.c.bf16 %v488_v56, %v486_v44 }
 0x5e1   :  { %v476_v36 = vmax.f32 %v460_v58, 0.0  ;;  %v477_v17 = vmax.f32 %v461_v63, 0.0  ;;  %1153 = vmatprep.subr.bf16.mxu1 %v493_v6  ;;  %1197 = vmatprep.subr.bf16.mxu0 %v497_v34 }
 0x5e2   :  { %1198 = vmatpush1.bf16.msra.mxu0 %v496_v35 }
 0x5e3   :  { %v491_v19 = vpack.c.bf16 %v477_v17, %v475_v57  ;;  %v490_v21 = vpack.c.bf16 %v476_v36, %v474_v39 }
 0x676   :  { %v1062_v38 = vpop.f32.mrf.mxu1 }
 0x677   :  { %v1063_v60 = vadd.f32 %v1062_v38, %v2436_v27  ;;  %v480_v38 = vmax.f32 %v464_v46, 0.0 }
 0x678   :  { %v1870_v48 = vpop.f32.mrf.mxu1 }
 0x679   :  { %v1069_v1 = vmul.f32 0.17677669, %v1063_v60  ;;  %v468_v60 = vadd.f32 %v446_v42, %v428_v10  ;;  %v469_v48 = vadd.f32 %v446_v42, %v429_v41  ;;  %v492_v3 = vpack.c.bf16 %v480_v38, %v478_v15 }
 0x67a   :  { %v1065_v4 = vpop.f32.mrf.mxu1 }
 0x67b   :  { %v1066_v8 = vadd.f32 %v1065_v4, %v2436_v27  ;;  %v484_v14 = vmax.f32 %v468_v60, 0.0  ;;  %v485_v4 = vmax.f32 %v469_v48, 0.0  ;;  %v1962_v48 = vld [vmem:[%s2664_s11 + $0x8] sm:$0xff]  }
 0x67c   :  { %v1871_v31 = vpop.f32.mrf.mxu1 }
 0x67d   :  { %v1070_v23 = vmul.f32 0.17677669, %v1066_v8  ;;  %v495_v5 = vpack.c.bf16 %v485_v4, %v483_v50  ;;  %v494_v43 = vpack.c.bf16 %v484_v14, %v482_v28  ;;  %v2695_v31 = vmov 0.0  }
 0x67f   :  { %v1075_v27 = vpack.c.bf16 %v1070_v23, %v1069_v1  ;;  %1199 = vmatprep.subr.bf16.mxu0 %v495_v5 }
 0x680   :  { %1200 = vmatpush1.bf16.msra.mxu0 %v494_v43 }
 0x681   :  { %1877 = vmatmul.mubr.msk.bf16.vlgmr.msra.gmra.mxu1 %vm559_vm0, %v1075_v27  ;;  %1312 = vmatprep.subr.bf16.mxu0 %v497_v34 }
 0x682   :  { %1173 = vmatprep.mubr.bf16.mxu1 %v2694_v22  ;;  %1154 = vmatpush1.bf16.msra.mxu1 %v492_v3 }
 0x683   :  { %1155 = vmatprep.subr.bf16.mxu1 %v491_v19 }
 0x686   :  { %1156 = vmatpush1.bf16.msra.mxu1 %v490_v21 }
 0x687   :  { %1272 = vmatprep.subr.bf16.mxu1 %v493_v6  ;;  %v1963_v6 = vld [vmem:[%s2664_s11] sm:$0xff]  }
 0x741   :  { %v1129_v8 = vpop.f32.mrf.mxu1 }
 0x742   :  { %v1136_v20 = vpack.c.bf16 %v1129_v8, %v1129_v8 }
 0x743   :  { %v1878_v47 = vpop.f32.mrf.mxu1 }
 0x744   :  { %1750 = vmatmul.mubr.msk.bf16.vlgmr.msra.gmra.mxu1 %vm559_vm0, %v1136_v20 }
 0x745   :  { %1273 = vmatpush1.bf16.xpose.msra.mxu1 %v492_v3  ;;  %v1132_v25 = vpop.f32.mrf.mxu1 }
 0x746   :  { %v1137_v9 = vpack.c.bf16 %v1132_v25, %v1132_v25  ;;  %1274 = vmatprep.subr.bf16.mxu1 %v491_v19 }
 0x747   :  { %v1879_v1 = vpop.f32.mrf.mxu1 }
 0x748   :  { %1751 = vmatmul.mubr.msk.bf16.vlgmr.msra.gmra.mxu0 %vm559_vm0, %v1137_v9 }
 0x749   :  { %1313 = vmatpush1.bf16.xpose.msra.mxu0 %v496_v35 }
 0x74a   :  { %1314 = vmatprep.subr.bf16.mxu0 %v495_v5 }
 0x74d   :  { %1275 = vmatpush1.bf16.xpose.msra.mxu1 %v490_v21  ;;  %v1348_v21 = vrot.slane %v2286_v40, %v2233_v32 }
 0x74e   :  { %1880 = vmatprep.subr.bf16.mxu1 %v2695_v31 }
 0x751   :  { %1315 = vmatpush1.bf16.xpose.msra.mxu0 %v494_v43 }
 0x752   :  { %1888 = vmatprep.subr.bf16.mxu0 %v2695_v31 }
 0x804   :  { %v1175_v0 = vpop.f32.mrf.mxu1 }
 0x806   :  { %v1177_v16 = vpop.f32.mrf.mxu1 }
 0x807   :  { %v1226_v7 = vmax.f32 %v1175_v0, %v1177_v16 }
 0x808   :  { %v1179_v23 = vpop.f32.mrf.mxu1  ;;  %v1219_v59 = vpop.f32.mrf.mxu0 }
 0x809   :  { %1227 = vmax.xlane.f32.xlu1 %v1226_v7 }
 0x80a   :  { %v1180_v24 = vpop.f32.mrf.mxu1  ;;  %v1221_v11 = vpop.f32.mrf.mxu0 }
 0x80b   :  { %v1229_v45 = vmax.f32 %v1219_v59, %v1221_v11 }
 0x80c   :  { %v1223_v2 = vpop.f32.mrf.mxu0 }
 0x80d   :  { %1230 = vmax.xlane.f32.xlu0 %v1229_v45 }
 0x80e   :  { %v1224_v26 = vpop.f32.mrf.mxu0 }
 0x892   :  { %v1228_v10 = vpop.xlane.xlu1 %1227 }
 0x893   :  { %v1232_v41 = vsub.f32 %v1175_v0, %v1228_v10  ;;  %v1233_v27 = vsub.f32 %v1177_v16, %v1228_v10 }
 0x895   :  { %v1236_v51 = vmul.f32 1.442695, %v1232_v41  ;;  %v1238_v52 = vmul.f32 1.442695, %v1233_v27  ;;  %v1965_v27 = vld [vmem:[%s2665_s12] sm:$0xff]  }
 0x896   :  { %v1231_v53 = vpop.xlane.xlu0 %1230 }
 0x897   :  { %1984 = vpow2.f32 %v1236_v51  ;;  %v1234_v12 = vsub.f32 %v1219_v59, %v1231_v53  ;;  %v1235_v46 = vsub.f32 %v1221_v11, %v1231_v53  ;;  %v1966_v51 = vld [vmem:[%s2667_s14 + $0x18] sm:$0xff]  }
 0x898   :  { %1986 = vpow2.f32 %v1238_v52 }
 0x899   :  { %v1240_v49 = vmul.f32 1.442695, %v1234_v12  ;;  %v1242_v33 = vmul.f32 1.442695, %v1235_v46 }
 0x89b   :  { %1988 = vpow2.f32 %v1240_v49 }
 0x89c   :  { %1990 = vpow2.f32 %v1242_v33 }
 0x8a4   :  { %v1985_v54 = vpop.eup %1984 }
 0x8a5   :  { %v1987_v15 = vpop.eup %1986 }
 0x8a6   :  { %v1244_v44 = vadd.f32 %v1987_v15, %v1985_v54 }
 0x8a8   :  { %v1989_v55 = vpop.eup %1988  ;;  %1245 = vadd.xlane.f32.xlu0 %v1244_v44  ;;  %v1436_v44 = vrot.slane %v2322_v18, %v2216_v13 }
 0x8a9   :  { %v1991_v37 = vpop.eup %1990 }
 0x8aa   :  { %v1247_v38 = vadd.f32 %v1991_v37, %v1989_v55 }
 0x8ac   :  { %1248 = vadd.xlane.f32.xlu1 %v1247_v38 }
 0x931   :  { %v1246_v56 = vpop.xlane.xlu0 %1245 }
 0x932   :  { %1992 = vrcp.f32 %v1246_v56  ;;  %v2696_v56 = vld [vmem:[#allocation8_spill] sm:$0xff] }
 0x935   :  { %v1249_v61 = vpop.xlane.xlu1 %1248 }
 0x936   :  { %1994 = vrcp.f32 %v1249_v61  ;;  %v1442_v61 = vrot.slane %v2696_v56, %v2216_v13  ;;  %v1968_v13 = vld [vmem:[%s2667_s14 + $0x8] sm:$0xff]  }
 0x93f   :  { %v1993_v62 = vpop.eup %1992 }
 0x940   :  { %v1253_v22 = vmul.f32 %v1993_v62, %v1987_v15  ;;  %v1252_v39 = vmul.f32 %v1993_v62, %v1985_v54 }
 0x942   :  { %v1257_v28 = vpack.c.bf16 %v1253_v22, %v1253_v22  ;;  %v1256_v42 = vpack.c.bf16 %v1252_v39, %v1252_v39 }
 0x943   :  { %v1995_v57 = vpop.eup %1994 }
 0x944   :  { %1292 = vmatprep.mubr.bf16.mxu1 %v1257_v28  ;;  %v1255_v50 = vmul.f32 %v1995_v57, %v1991_v37  ;;  %v1254_v58 = vmul.f32 %v1995_v57, %v1989_v55  ;;  %v1969_v57 = vld [vmem:[%s2667_s14] sm:$0xff]  }
 0x945   :  { %1293 = vmatmul.mubr.bf16.vlgmr.msra.gmra.mxu1 %v1256_v42  ;;  %v1967_v42 = vld [vmem:[%s2667_s14 + $0x10] sm:$0xff]  }
 0x946   :  { %v1259_v63 = vpack.c.bf16 %v1255_v50, %v1255_v50  ;;  %v1258_v60 = vpack.c.bf16 %v1254_v58, %v1254_v58  ;;  %1884 = vmatprep.mubr.msk.bf16.mxu1 %vm2053_vm1, %v2695_v31  ;;  %1881 = vmatpush3.bf16.msra.mxu1 %v1962_v48  ;;  %v1755_v50 = vld [vmem:[%s2666_s13] ss:$0 sm:$0xff] }
 0x947   :  { %1882 = vmatprep.subr.bf16.mxu1 %v2695_v31 }
 0x948   :  { %1332 = vmatprep.mubr.bf16.mxu0 %v1259_v63 }
 0x949   :  { %1333 = vmatmul.mubr.bf16.vlgmr.msra.gmra.mxu0 %v1258_v60 }
 0x94a   :  { %1892 = vmatprep.mubr.msk.bf16.mxu0 %vm2053_vm1, %v2695_v31  ;;  %1883 = vmatpush3.bf16.msra.mxu1 %v1963_v6 }
 0x94b   :  { %1896 = vmatprep.subr.bf16.mxu1 %v2695_v31 }
 0xa05   :  { %v1294_v34 = vpop.f32.mrf.mxu1 }
 0xa07   :  { %v1296_v3 = vpop.f32.mrf.mxu1 }
 0xa09   :  { %v1297_v35 = vpop.f32.mrf.mxu1  ;;  %v1334_v36 = vpop.f32.mrf.mxu0 }
 0xa0a   :  { %v1344_v14 = vpack.c.bf16 %v1334_v36, %v1294_v34 }
 0xa0b   :  { %v1298_v17 = vpop.f32.mrf.mxu1  ;;  %v1336_v4 = vpop.f32.mrf.mxu0 }
 0xa0c   :  { %1885 = vmatmul.mubr.msk.bf16.vlgmr.msra.gmra.mxu1 %vm559_vm0, %v1344_v14  ;;  %v2697_v14 = vld [vmem:[#allocation9_spill] sm:$0xff] }
 0xa0d   :  { %v1337_v19 = vpop.f32.mrf.mxu0  ;;  %1904 = vmatprep.mubr.msk.bf16.mxu1 %vm2053_vm1, %v2695_v31  ;;  %1897 = vmatpush3.bf16.msra.mxu1 %v1966_v51  ;;  %v1527_v17 = vrot.slane %v2286_v40, %v2697_v14 }
 0xa0e   :  { %1898 = vmatprep.subr.bf16.mxu1 %v2695_v31 }
 0xa0f   :  { %v1338_v5 = vpop.f32.mrf.mxu0 }
 0xa11   :  { %1899 = vmatpush3.bf16.msra.mxu1 %v1967_v42 }
 0xa12   :  { %1900 = vmatprep.subr.bf16.mxu1 %v2695_v31 }
 0xa15   :  { %1901 = vmatpush3.bf16.msra.mxu1 %v1968_v13 }
 0xa16   :  { %1902 = vmatprep.subr.bf16.mxu1 %v2695_v31 }
 0xa19   :  { %1903 = vmatpush3.bf16.msra.mxu1 %v1969_v57 }
 0xacc   :  { %v1398_v43 = vpop.f32.mrf.mxu1 }
 0xacd   :  { %v1399_v8 = vadd.f32 %v1398_v43, %v1348_v21 }
 0xace   :  { %v1886_v20 = vpop.f32.mrf.mxu1 }
 0xacf   :  { %v1405_v47 = vadd.f32 %v1399_v8, %v2336_v29 }
 0xad0   :  { %v1401_v25 = vpop.f32.mrf.mxu1 }
 0xad1   :  { %v1402_v9 = vadd.f32 %v1401_v25, %v1348_v21  ;;  %v1407_v1 = vsel %vm559_vm0, %v1405_v47, 0.0 }
 0xad2   :  { %1408 = vadd.xlane.f32.xlu0 %v1407_v1  ;;  %v1887_v0 = vpop.f32.mrf.mxu1 }
 0xad3   :  { %v1406_v16 = vadd.f32 %v1402_v9, %v2338_v30  ;;  %v1964_v30 = vld [vmem:[%s2665_s12 + $0x8] sm:$0xff]  }
 0xad4   :  { %1889 = vmatpush3.bf16.msra.mxu0 %v1964_v30 }
 0xad5   :  { %v1410_v7 = vsel %vm559_vm0, %v1406_v16, 0.0  ;;  %1890 = vmatprep.subr.bf16.mxu0 %v2695_v31 }
 0xad6   :  { %1411 = vadd.xlane.f32.xlu1 %v1410_v7 }
 0xad8   :  { %1891 = vmatpush3.bf16.msra.mxu0 %v1965_v27 }
 0xad9   :  { %1908 = vmatprep.subr.bf16.mxu0 %v2695_v31 }
 0xb5b   :  { %v1409_v23 = vpop.xlane.xlu0 %1408 }
 0xb5c   :  { %v1413_v59 = vmul.f32 0.03125, %v1409_v23 }
 0xb5e   :  { %v1415_v24 = vsub.f32 %v1405_v47, %v1413_v59 }
 0xb5f   :  { %v1412_v11 = vpop.xlane.xlu1 %1411 }
 0xb60   :  { %v1414_v45 = vmul.f32 0.03125, %v1412_v11  ;;  %v1417_v2 = vmul.f32 %v1415_v24, %v1415_v24 }
 0xb62   :  { %v1416_v26 = vsub.f32 %v1406_v16, %v1414_v45  ;;  %v1419_v29 = vsel %vm559_vm0, %v1417_v2, 0.0  ;;  %v1970_v2 = vld [vmem:[%s2671_s18 + $0x8] sm:$0xff]  }
 0xb63   :  { %1420 = vadd.xlane.f32.xlu0 %v1419_v29 }
 0xb64   :  { %v1418_v10 = vmul.f32 %v1416_v26, %v1416_v26 }
 0xb66   :  { %v1422_v41 = vsel %vm559_vm0, %v1418_v10, 0.0 }
 0xb67   :  { %1423 = vadd.xlane.f32.xlu1 %v1422_v41 }
 0xbec   :  { %v1421_v52 = vpop.xlane.xlu0 %1420 }
 0xbed   :  { %v1425_v53 = vmul.f32 0.03125, %v1421_v52 }
 0xbef   :  { %v1427_v12 = vadd.f32 1e-05, %v1425_v53 }
 0xbf0   :  { %v1424_v46 = vpop.xlane.xlu1 %1423 }
 0xbf1   :  { %1996 = vrsqrt.f32 %v1427_v12  ;;  %v1426_v49 = vmul.f32 0.03125, %v1424_v46  ;;  %v1628_v12 = vrot.slane %v2322_v18, %v2233_v32 }
 0xbf3   :  { %v1428_v33 = vadd.f32 1e-05, %v1426_v49 }
 0xbf5   :  { %1998 = vrsqrt.f32 %v1428_v33 }
 0xbfe   :  { %v1997_v54 = vpop.eup %1996 }
 0xbff   :  { %v1431_v15 = vmul.f32 %v1997_v54, %v1415_v24 }
 0xc01   :  { %v1437_v38 = vmul.f32 %v1436_v44, %v1431_v15 }
 0xc02   :  { %v1999_v55 = vpop.eup %1998 }
 0xc03   :  { %v1432_v37 = vmul.f32 %v1999_v55, %v1416_v26  ;;  %v1443_v22 = vadd.f32 %v1442_v61, %v1437_v38  ;;  %v1971_v26 = vld [vmem:[%s2671_s18] sm:$0xff]  }
 0xc05   :  { %v1438_v62 = vmul.f32 %v1436_v44, %v1432_v37  ;;  %v1764_v37 = vld [vmem:[%s2672_s19] ss:$0 sm:$0xff] }
 0xc07   :  { %v1444_v39 = vadd.f32 %v1442_v61, %v1438_v62 }
 0xc09   :  { %v1445_v28 = vpack.c.bf16 %v1444_v39, %v1443_v22 }
 0xc0b   :  { %1893 = vmatmul.mubr.msk.bf16.vlgmr.msra.gmra.mxu0 %vm559_vm0, %v1445_v28 }
 0xc0c   :  { %1912 = vmatprep.mubr.msk.bf16.mxu0 %vm2053_vm1, %v2695_v31  ;;  %1909 = vmatpush3.bf16.msra.mxu0 %v1970_v2 }
 0xc0d   :  { %1910 = vmatprep.subr.bf16.mxu0 %v2695_v31  ;;  %v1634_v31 = vrot.slane %v2696_v56, %v2233_v32 }
 0xc10   :  { %1911 = vmatpush3.bf16.msra.mxu0 %v1971_v26 }
 0xccb   :  { %v1506_v58 = vpop.f32.mrf.mxu0 }
 0xccc   :  { %v1507_v60 = vadd.f32 %v1755_v50, %v1506_v58 }
 0xccd   :  { %v1894_v63 = vpop.f32.mrf.mxu0 }
 0xcce   :  { %v1513_v3 = vmax.f32 %v1507_v60, 0.0 }
 0xccf   :  { %v1509_v48 = vpop.f32.mrf.mxu0 }
 0xcd0   :  { %v1510_v6 = vadd.f32 %v1755_v50, %v1509_v48 }
 0xcd1   :  { %v1895_v34 = vpop.f32.mrf.mxu0 }
 0xcd2   :  { %v1514_v35 = vmax.f32 %v1510_v6, 0.0 }
 0xcd4   :  { %v1523_v36 = vpack.c.bf16 %v1514_v35, %v1513_v3 }
 0xcd6   :  { %1905 = vmatmul.mubr.msk.bf16.vlgmr.msra.gmra.mxu1 %vm1552_vm4, %v1523_v36 }
 0xd96   :  { %v1590_v4 = vpop.f32.mrf.mxu1 }
 0xd97   :  { %v1591_v19 = vadd.f32 %v1590_v4, %v1527_v17 }
 0xd98   :  { %v1906_v5 = vpop.f32.mrf.mxu1 }
 0xd99   :  { %v1597_v21 = vadd.f32 %v1591_v19, %v1443_v22 }
 0xd9a   :  { %v1593_v43 = vpop.f32.mrf.mxu1 }
 0xd9b   :  { %v1594_v8 = vadd.f32 %v1593_v43, %v1527_v17  ;;  %v1599_v20 = vsel %vm559_vm0, %v1597_v21, 0.0 }
 0xd9c   :  { %1600 = vadd.xlane.f32.xlu0 %v1599_v20  ;;  %v1907_v47 = vpop.f32.mrf.mxu1 }
 0xd9d   :  { %v1598_v25 = vadd.f32 %v1594_v8, %v1444_v39 }
 0xd9f   :  { %v1602_v9 = vsel %vm559_vm0, %v1598_v25, 0.0 }
 0xda0   :  { %1603 = vadd.xlane.f32.xlu1 %v1602_v9 }
 0xe25   :  { %v1601_v1 = vpop.xlane.xlu0 %1600 }
 0xe26   :  { %v1605_v0 = vmul.f32 0.03125, %v1601_v1 }
 0xe28   :  { %v1607_v16 = vsub.f32 %v1597_v21, %v1605_v0 }
 0xe29   :  { %v1604_v7 = vpop.xlane.xlu1 %1603 }
 0xe2a   :  { %v1606_v23 = vmul.f32 0.03125, %v1604_v7  ;;  %v1609_v40 = vmul.f32 %v1607_v16, %v1607_v16 }
 0xe2c   :  { %v1608_v59 = vsub.f32 %v1598_v25, %v1606_v23  ;;  %v1611_v24 = vsel %vm559_vm0, %v1609_v40, 0.0 }
 0xe2d   :  { %1612 = vadd.xlane.f32.xlu0 %v1611_v24 }
 0xe2e   :  { %v1610_v11 = vmul.f32 %v1608_v59, %v1608_v59 }
 0xe30   :  { %v1614_v45 = vsel %vm559_vm0, %v1610_v11, 0.0 }
 0xe31   :  { %1615 = vadd.xlane.f32.xlu1 %v1614_v45 }
 0xeb6   :  { %v1613_v29 = vpop.xlane.xlu0 %1612 }
 0xeb7   :  { %v1617_v10 = vmul.f32 0.03125, %v1613_v29 }
 0xeb9   :  { %v1619_v41 = vadd.f32 1e-05, %v1617_v10 }
 0xeba   :  { %v1616_v30 = vpop.xlane.xlu1 %1615 }
 0xebb   :  { %2000 = vrsqrt.f32 %v1619_v41  ;;  %v1618_v27 = vmul.f32 0.03125, %v1616_v30 }
 0xebd   :  { %v1620_v51 = vadd.f32 1e-05, %v1618_v27 }
 0xebf   :  { %2002 = vrsqrt.f32 %v1620_v51 }
 0xec8   :  { %v2001_v52 = vpop.eup %2000 }
 0xec9   :  { %v1623_v53 = vmul.f32 %v2001_v52, %v1607_v16 }
 0xecb   :  { %v1629_v33 = vmul.f32 %v1628_v12, %v1623_v53 }
 0xecc   :  { %v2003_v46 = vpop.eup %2002 }
 0xecd   :  { %v1624_v49 = vmul.f32 %v2003_v46, %v1608_v59  ;;  %v1635_v15 = vadd.f32 %v1634_v31, %v1629_v33 }
 0xecf   :  { %v1630_v54 = vmul.f32 %v1628_v12, %v1624_v49 }
 0xed1   :  { %v1636_v44 = vadd.f32 %v1634_v31, %v1630_v54 }
 0xed3   :  { %v1637_v55 = vpack.c.bf16 %v1636_v44, %v1635_v15 }
 0xed5   :  { %1913 = vmatmul.mubr.msk.bf16.vlgmr.msra.gmra.mxu0 %vm559_vm0, %v1637_v55 }
 0xf95   :  { %v1698_v38 = vpop.f32.mrf.mxu0 }
 0xf96   :  { %v1699_v61 = vadd.f32 %v1764_v37, %v1698_v38 }
 0xf97   :  { %v1914_v18 = vpop.f32.mrf.mxu0 }
 0xf98   :  { %1705 = vst [vmem:[#allocation5] sm:$0xff] %v1699_v61 }
 0xf99   :  { %v1701_v62 = vpop.f32.mrf.mxu0 }
 0xf9a   :  { %v1702_v22 = vadd.f32 %v1764_v37, %v1701_v62 }
 0xf9b   :  { %v1915_v32 = vpop.f32.mrf.mxu0 }
 0xf9c   :  { %1706 = vst [vmem:[#allocation5 + $0x8] sm:$0xff] %v1702_v22 }
 0xf9d   :  { %2035 = shalt.err (!%p2032_p9)
}
 0xf9e   :  { %s2058_s2 = smov 128   ;;  %s2059_s19 = smov 8  }
 0xf9f   :  { %1718 = dma.vmem_to_hbm [thread:$0]  %s1713_s10, 256, %s2673_s20, [#allocation4], %s2058_s2, %s2058_s2, %s2059_s19  }
 0xfa0   :  { %2046 = dma.done.wait [#allocation4], 256  }
 0xfa1   :  { %2047 = vsyncadd [#allocation4], 4294967040 }
 0xfa2   :  { %1722 = vsyncpa [#allocation3], 1 }
 0xfa3   :  { %1723 = vsyncpa [#allocation4], 1 }

</bundles_post_ra>
